<compile_context>
chip_gen: v7x
topology: tpu7x:2x2x1
jax: 0.10.0
libtpu: 0.0.40
codegen_flags: <defaults>
</compile_context>

<pallas_src>
import math
import jax
import jax.numpy as jnp
from jax.experimental import pallas as pl
from jax.experimental.pallas import tpu as pltpu  # noqa: F401  (TPU backend)

# ---------------- config (small, deterministic, consistent with __init__) ----
VOCAB = 100        # config.vocab_size
EMB = 32           # config.embedding_dim
HID = 32           # config.hidden_dim_lstm
NUM_LAYERS = 1     # config.num_layers
B = 2              # config.batch_size
L = 8              # sequence length
NUM_TT = 5         # config.num_token_type
TT_DIM = 8         # config.token_type_dim
NUM_REL = 4        # config.num_relations
REL_EMB = 16       # config.rel_emb_size
PAD_ID = 0         # config.pad_token_id
THRESH_REL = 0.6   # config.threshold_rel
HIN = 2 * HID + TT_DIM
# round(sigmoid(x) - (thr - 0.5)) == 1   <=>   sigmoid(x) > thr   <=>   x > logit(thr)
LOGIT_THRESH = math.log(THRESH_REL / (1.0 - THRESH_REL))


# ---------------- deterministic parameter init --------------------------------
def init_params(key):
    ks = jax.random.split(key, 25)
    rnd = lambda k, shape, s=0.1: jax.random.normal(k, shape, jnp.float32) * s
    p = {}
    p['word_emb'] = rnd(ks[0], (VOCAB, EMB), 1.0).at[PAD_ID].set(0.0)  # padding_idx row = 0
    p['tt_emb'] = rnd(ks[1], (NUM_TT, TT_DIM), 1.0)
    p['rel_emb'] = rnd(ks[2], (NUM_REL, REL_EMB), 1.0)
    # GRU (1 layer, bidirectional), PyTorch gate order: r, z, n
    p['gru_wih_f'] = rnd(ks[3], (3 * HID, EMB))
    p['gru_whh_f'] = rnd(ks[4], (3 * HID, HID))
    p['gru_bih_f'] = rnd(ks[5], (3 * HID,))
    p['gru_bhh_f'] = rnd(ks[6], (3 * HID,))
    p['gru_wih_b'] = rnd(ks[7], (3 * HID, EMB))
    p['gru_whh_b'] = rnd(ks[8], (3 * HID, HID))
    p['gru_bih_b'] = rnd(ks[9], (3 * HID,))
    p['gru_bhh_b'] = rnd(ks[10], (3 * HID,))
    # NER head
    p['ner_w'] = rnd(ks[11], (NUM_TT, 2 * HID))
    p['ner_b'] = rnd(ks[12], (NUM_TT,))
    # CRF
    p['crf_start'] = rnd(ks[13], (NUM_TT,))
    p['crf_end'] = rnd(ks[14], (NUM_TT,))
    p['crf_trans'] = rnd(ks[15], (NUM_TT, NUM_TT))
    # selection heads
    p['sel_u_w'] = rnd(ks[16], (REL_EMB, HIN))
    p['sel_u_b'] = rnd(ks[17], (REL_EMB,))
    p['sel_v_w'] = rnd(ks[18], (REL_EMB, HIN))
    p['sel_v_b'] = rnd(ks[19], (REL_EMB,))
    p['sel_uv_w'] = rnd(ks[20], (REL_EMB, 2 * REL_EMB))
    p['sel_uv_b'] = rnd(ks[21], (REL_EMB,))
    return p


# ---------------- wrapper-side algebraic folding of the selection heads -------
def fold_params(p):
    wu_t = p['sel_u_w'].T                       # (HIN, Re)
    wv_t = p['sel_v_w'].T                       # (HIN, Re)
    wa_t = p['sel_uv_w'][:, :REL_EMB].T         # (Re, Re)  multiplies u  (position j)
    wb_t = p['sel_uv_w'][:, REL_EMB:].T         # (Re, Re)  multiplies v  (position i)
    WA = wu_t @ wa_t                            # (HIN, Re)  x_j @ WA == sel_uv_a(sel_u(x_j))
    WB = wv_t @ wb_t                            # (HIN, Re)
    bias_total = (p['sel_u_b'] @ wa_t + p['sel_v_b'] @ wb_t
                  + p['sel_uv_b']).reshape(1, REL_EMB)
    # token-type contribution becomes a 5x16 lookup table
    TA = p['tt_emb'] @ WA[2 * HID:]             # (NUM_TT, Re)
    TB = p['tt_emb'] @ WB[2 * HID:]             # (NUM_TT, Re)
    # one combined post-GRU projection: [a_lstm | c_lstm | ner]
    wcomb = jnp.concatenate([WA[:2 * HID], WB[:2 * HID], p['ner_w'].T], axis=1)  # (2H, 2Re+T)
    return dict(
        wemb=p['word_emb'],
        wih_f=p['gru_wih_f'].T, whh_f=p['gru_whh_f'].T,
        bih_f=p['gru_bih_f'].reshape(1, -1), bhh_f=p['gru_bhh_f'].reshape(1, -1),
        wih_b=p['gru_wih_b'].T, whh_b=p['gru_whh_b'].T,
        bih_b=p['gru_bih_b'].reshape(1, -1), bhh_b=p['gru_bhh_b'].reshape(1, -1),
        wcomb=wcomb, ner_b=p['ner_b'].reshape(1, -1),
        crf_start=p['crf_start'].reshape(1, -1),
        crf_end=p['crf_end'].reshape(1, -1),
        crf_trans=p['crf_trans'],
        ta=TA, tb=TB, bias=bias_total, relw=p['rel_emb'],
    )


# ---------------- the single fused Pallas kernel -------------------------------
def joint_kernel(tok_ref, wemb_ref, h0f_ref, h0b_ref,
                 wihf_ref, whhf_ref, bihf_ref, bhhf_ref,
                 wihb_ref, whhb_ref, bihb_ref, bhhb_ref,
                 wcomb_ref, nerb_ref,
                 start_ref, end_ref, trans_ref,
                 ta_ref, tb_ref, bias_ref, relw_ref,
                 ner_out_ref, logits_ref, pred_ref):
    f32 = jnp.float32

    # ---- word embedding lookup via one-hot matmul (pad row of table is zero) ----
    tok = tok_ref[...]                                             # (L*B, 1) int32, time-major
    vocab_iota = jax.lax.broadcasted_iota(jnp.int32, (L * B, VOCAB), 1)
    onehot_tok = (vocab_iota == tok).astype(f32)                   # (L*B, VOCAB)
    emb = jnp.dot(onehot_tok, wemb_ref[...], preferred_element_type=f32)   # (L*B, EMB)
    # TODO(synk): dropout_embedding_layer omitted (identity in eval/inference mode).

    # ---- BiGRU, statically unrolled over L (PyTorch gate order r, z, n) ----
    def gru_cell(x_t, h, wih, whh, bih, bhh):
        gi = jnp.dot(x_t, wih, preferred_element_type=f32) + bih   # (B, 3H)
        gh = jnp.dot(h, whh, preferred_element_type=f32) + bhh     # (B, 3H)
        r = jax.nn.sigmoid(gi[:, :HID] + gh[:, :HID])
        z = jax.nn.sigmoid(gi[:, HID:2 * HID] + gh[:, HID:2 * HID])
        n = jnp.tanh(gi[:, 2 * HID:] + r * gh[:, 2 * HID:])
        return (1.0 - z) * n + z * h

    wihf, whhf, bihf, bhhf = wihf_ref[...], whhf_ref[...], bihf_ref[...], bhhf_ref[...]
    wihb, whhb, bihb, bhhb = wihb_ref[...], whhb_ref[...], bihb_ref[...], bhhb_ref[...]
    x_steps = [emb[t * B:(t + 1) * B, :] for t in range(L)]        # each (B, EMB)

    h = h0f_ref[...]
    hs_f = []
    for t in range(L):
        h = gru_cell(x_steps[t], h, wihf, whhf, bihf, bhhf)
        hs_f.append(h)
    h = h0b_ref[...]
    hs_b = [None] * L
    for t in range(L - 1, -1, -1):
        h = gru_cell(x_steps[t], h, wihb, whhb, bihb, bhhb)
        hs_b[t] = h

    o_steps = [jnp.concatenate([hs_f[t], hs_b[t]], axis=1) for t in range(L)]   # (B, 2H)
    # batch-major row order: row = b*L + t
    out2d = jnp.concatenate([o_steps[t][b:b + 1, :] for b in range(B) for t in range(L)],
                            axis=0)                                # (B*L, 2H)

    # ---- fused post-GRU projection: [a_lstm | c_lstm | ner] in one matmul ----
    proj = jnp.dot(out2d, wcomb_ref[...], preferred_element_type=f32)   # (B*L, 2Re+T)
    a_lstm = proj[:, :REL_EMB]                                     # (B*L, Re)
    c_lstm = proj[:, REL_EMB:2 * REL_EMB]                          # (B*L, Re)
    ner2d = proj[:, 2 * REL_EMB:] + nerb_ref[...]                  # (B*L, NUM_TT)

    # ---- CRF Viterbi decode (no mask, like crf.decode(ner_score)), fully unrolled ----
    trans = trans_ref[...]                                         # (T, T)
    em = [jnp.concatenate([ner2d[b * L + t:b * L + t + 1, :] for b in range(B)], axis=0)
          for t in range(L)]                                       # (B, T) per timestep
    score = start_ref[...] + em[0]                                 # (B, T)
    history = []
    for t in range(1, L):
        best_v = score[:, 0:1] + trans[0:1, :]                     # best over previous tag
        best_i = jnp.zeros((B, NUM_TT), jnp.int32)
        for i in range(1, NUM_TT):
            cand = score[:, i:i + 1] + trans[i:i + 1, :]
            better = cand > best_v
            best_v = jnp.where(better, cand, best_v)
            best_i = jnp.where(better, jnp.int32(i), best_i)
        history.append(best_i)
        score = best_v + em[t]
    score = score + end_ref[...]
    best_v = score[:, 0:1]
    last_tag = jnp.zeros((B, 1), jnp.int32)
    for j in range(1, NUM_TT):
        better = score[:, j:j + 1] > best_v
        best_v = jnp.where(better, score[:, j:j + 1], best_v)
        last_tag = jnp.where(better, jnp.int32(j), last_tag)

    # backtrack (one-hot select, no gathers); keep per-position tag columns
    pos_tag = [None] * L
    pos_tag[L - 1] = last_tag                                      # (B, 1) int32
    cur = last_tag
    for t in range(L - 2, -1, -1):
        h_t = history[t]                                           # (B, T) int32
        prev = jnp.zeros((B, 1), jnp.int32)
        for j in range(NUM_TT):
            prev = jnp.where(cur == j, h_t[:, j:j + 1], prev)
        pos_tag[t] = prev
        cur = prev

    col = jax.lax.broadcasted_iota(jnp.int32, (B, L), 1)
    tags = jnp.zeros((B, L), jnp.int32)
    for t in range(L):
        tags = jnp.where(col == t, pos_tag[t], tags)
    ner_out_ref[...] = tags                                        # (B, L)

    # ---- pairwise selection scoring (folded selection_u / selection_v / selection_uv) ----
    tt_iota = jax.lax.broadcasted_iota(jnp.int32, (L, NUM_TT), 1)
    ta, tb_, bias = ta_ref[...], tb_ref[...], bias_ref[...]
    uv_rows = []
    for b in range(B):
        tag_col = jnp.concatenate([pos_tag[t][b:b + 1, :] for t in range(L)], axis=0)  # (L, 1)
        onehot_tag = (tt_iota == tag_col).astype(f32)              # (L, T)
        a_b = a_lstm[b * L:(b + 1) * L, :] + jnp.dot(onehot_tag, ta,
                                                     preferred_element_type=f32)   # (L, Re)
        c_b = c_lstm[b * L:(b + 1) * L, :] + jnp.dot(onehot_tag, tb_,
                                                     preferred_element_type=f32)   # (L, Re)
        uv_b = jnp.tanh(a_b[None, :, :] + c_b[:, None, :] + bias[None, :, :])       # (L, L, Re)
        uv_rows.append(uv_b.reshape(L * L, REL_EMB))
    uv_all = jnp.concatenate(uv_rows, axis=0)                      # (B*L*L, Re) = (128, 16)

    # logitsT[r, p] = uv_all[p, :] . rel_emb[r, :]  -> lane-dense (R, 128) output block
    logits_t = jax.lax.dot_general(relw_ref[...], uv_all,
                                   dimension_numbers=(((1,), (1,)), ((), ())),
                                   preferred_element_type=f32)     # (R, B*L*L)
    logits_ref[...] = logits_t
    # round(sigmoid(x) - (thr-0.5)) == (x > logit(thr))   (differs only at the exact tie)
    pred_ref[...] = (logits_t > LOGIT_THRESH).astype(jnp.int32)


# ---------------- full forward (is_test=True path) -----------------------------
def joint_model_forward(params, text_tokened, hidden_init):
    f = fold_params(params)
    # time-major flat token column: row = t*B + b (lets the kernel slice x_t contiguously)
    tok_tm = jnp.swapaxes(text_tokened, 0, 1).reshape(L * B, 1).astype(jnp.int32)

    pred_ner, logits_t, pred_t = pl.pallas_call(
        joint_kernel,
        out_shape=(jax.ShapeDtypeStruct((B, L), jnp.int32),
                   jax.ShapeDtypeStruct((NUM_REL, B * L * L), jnp.float32),
                   jax.ShapeDtypeStruct((NUM_REL, B * L * L), jnp.int32)),
    )(tok_tm, f['wemb'], hidden_init[0], hidden_init[1],
      f['wih_f'], f['whh_f'], f['bih_f'], f['bhh_f'],
      f['wih_b'], f['whh_b'], f['bih_b'], f['bhh_b'],
      f['wcomb'], f['ner_b'],
      f['crf_start'], f['crf_end'], f['crf_trans'],
      f['ta'], f['tb'], f['bias'], f['relw'])

    # wrapper-side layout plumbing only (lane-dense kernel outputs -> torch layout)
    selection_logits = logits_t.T.reshape(B, L, L, NUM_REL)
    # TODO(synk): torch returns pred_rel as int64; JAX default int dtype (int32) used here.
    pred_rel = pred_t.T.reshape(B, L, L, NUM_REL)
    return pred_ner, pred_rel, selection_logits


if __name__ == "__main__":
    key = jax.random.PRNGKey(0)
    kp, kx, kh = jax.random.split(key, 3)
    params = init_params(kp)
    text_tokened = jax.random.randint(kx, (B, L), 1, VOCAB, dtype=jnp.int32)
    # forward() draws hidden_init = randn(2*num_layers, B, H); generated deterministically here
    hidden_init = jax.random.normal(kh, (2 * NUM_LAYERS, B, HID), jnp.float32)

    fwd = jax.jit(joint_model_forward)
    pred_ner, pred_rel, sel_logits = fwd(params, text_tokened, hidden_init)
    jax.block_until_ready((pred_ner, pred_rel, sel_logits))
    print("KERNEL_OK")
</pallas_src>

<mosaic_0001>
module attributes {stable_mosaic.version = 11 : i64} {
  func.func @joint_kernel(%arg0: memref<16x1xi32, #tpu.memory_space<vmem>>, %arg1: memref<100x32xf32, #tpu.memory_space<vmem>>, %arg2: memref<2x32xf32, #tpu.memory_space<vmem>>, %arg3: memref<2x32xf32, #tpu.memory_space<vmem>>, %arg4: memref<32x96xf32, #tpu.memory_space<vmem>>, %arg5: memref<32x96xf32, #tpu.memory_space<vmem>>, %arg6: memref<1x96xf32, #tpu.memory_space<vmem>>, %arg7: memref<1x96xf32, #tpu.memory_space<vmem>>, %arg8: memref<32x96xf32, #tpu.memory_space<vmem>>, %arg9: memref<32x96xf32, #tpu.memory_space<vmem>>, %arg10: memref<1x96xf32, #tpu.memory_space<vmem>>, %arg11: memref<1x96xf32, #tpu.memory_space<vmem>>, %arg12: memref<64x37xf32, #tpu.memory_space<vmem>>, %arg13: memref<1x5xf32, #tpu.memory_space<vmem>>, %arg14: memref<1x5xf32, #tpu.memory_space<vmem>>, %arg15: memref<1x5xf32, #tpu.memory_space<vmem>>, %arg16: memref<5x5xf32, #tpu.memory_space<vmem>>, %arg17: memref<5x16xf32, #tpu.memory_space<vmem>>, %arg18: memref<5x16xf32, #tpu.memory_space<vmem>>, %arg19: memref<1x16xf32, #tpu.memory_space<vmem>>, %arg20: memref<4x16xf32, #tpu.memory_space<vmem>>, %arg21: memref<2x8xi32, #tpu.memory_space<vmem>>, %arg22: memref<4x128xf32, #tpu.memory_space<vmem>>, %arg23: memref<4x128xi32, #tpu.memory_space<vmem>>) attributes {dimension_semantics = [], scalar_prefetch = 0 : i64, scratch_operands = 0 : i64, tpu.core_type = #tpu.core_type<tc>} {
    %c0 = arith.constant 0 : index
    %c0_0 = arith.constant 0 : index
    %0 = vector.load %arg0[%c0, %c0_0] : memref<16x1xi32, #tpu.memory_space<vmem>>, vector<16x1xi32>
    %1 = tpu.iota {dimensions = array<i32: 1>} : vector<16x100xi32>
    %2 = vector.broadcast %0 : vector<16x1xi32> to vector<16x100xi32>
    %3 = arith.cmpi eq, %1, %2 : vector<16x100xi32>
    %4 = arith.extui %3 : vector<16x100xi1> to vector<16x100xi32>
    %5 = arith.sitofp %4 : vector<16x100xi32> to vector<16x100xf32>
    %c0_1 = arith.constant 0 : index
    %c0_2 = arith.constant 0 : index
    %6 = vector.load %arg1[%c0_1, %c0_2] : memref<100x32xf32, #tpu.memory_space<vmem>>, vector<100x32xf32>
    %cst = arith.constant dense<0.000000e+00> : vector<16x32xf32>
    %7 = tpu.matmul %5, %6, %cst {dimension_numbers = #tpu.dot_dimension_numbers<[1], [0], [0], [1], [0, 0, 1, 1], [], []>} : vector<16x100xf32>, vector<100x32xf32>, vector<16x32xf32> -> vector<16x32xf32>
    %c0_3 = arith.constant 0 : index
    %c0_4 = arith.constant 0 : index
    %8 = vector.load %arg4[%c0_3, %c0_4] : memref<32x96xf32, #tpu.memory_space<vmem>>, vector<32x96xf32>
    %c0_5 = arith.constant 0 : index
    %c0_6 = arith.constant 0 : index
    %9 = vector.load %arg5[%c0_5, %c0_6] : memref<32x96xf32, #tpu.memory_space<vmem>>, vector<32x96xf32>
    %c0_7 = arith.constant 0 : index
    %c0_8 = arith.constant 0 : index
    %10 = vector.load %arg6[%c0_7, %c0_8] : memref<1x96xf32, #tpu.memory_space<vmem>>, vector<1x96xf32>
    %c0_9 = arith.constant 0 : index
    %c0_10 = arith.constant 0 : index
    %11 = vector.load %arg7[%c0_9, %c0_10] : memref<1x96xf32, #tpu.memory_space<vmem>>, vector<1x96xf32>
    %c0_11 = arith.constant 0 : index
    %c0_12 = arith.constant 0 : index
    %12 = vector.load %arg8[%c0_11, %c0_12] : memref<32x96xf32, #tpu.memory_space<vmem>>, vector<32x96xf32>
    %c0_13 = arith.constant 0 : index
    %c0_14 = arith.constant 0 : index
    %13 = vector.load %arg9[%c0_13, %c0_14] : memref<32x96xf32, #tpu.memory_space<vmem>>, vector<32x96xf32>
    %c0_15 = arith.constant 0 : index
    %c0_16 = arith.constant 0 : index
    %14 = vector.load %arg10[%c0_15, %c0_16] : memref<1x96xf32, #tpu.memory_space<vmem>>, vector<1x96xf32>
    %c0_17 = arith.constant 0 : index
    %c0_18 = arith.constant 0 : index
    %15 = vector.load %arg11[%c0_17, %c0_18] : memref<1x96xf32, #tpu.memory_space<vmem>>, vector<1x96xf32>
    %16 = vector.extract_strided_slice %7 {offsets = [0, 0], sizes = [2, 32], strides = [1, 1]} : vector<16x32xf32> to vector<2x32xf32>
    %17 = vector.extract_strided_slice %7 {offsets = [2, 0], sizes = [2, 32], strides = [1, 1]} : vector<16x32xf32> to vector<2x32xf32>
    %18 = vector.extract_strided_slice %7 {offsets = [4, 0], sizes = [2, 32], strides = [1, 1]} : vector<16x32xf32> to vector<2x32xf32>
    %19 = vector.extract_strided_slice %7 {offsets = [6, 0], sizes = [2, 32], strides = [1, 1]} : vector<16x32xf32> to vector<2x32xf32>
    %20 = vector.extract_strided_slice %7 {offsets = [8, 0], sizes = [2, 32], strides = [1, 1]} : vector<16x32xf32> to vector<2x32xf32>
    %21 = vector.extract_strided_slice %7 {offsets = [10, 0], sizes = [2, 32], strides = [1, 1]} : vector<16x32xf32> to vector<2x32xf32>
    %22 = vector.extract_strided_slice %7 {offsets = [12, 0], sizes = [2, 32], strides = [1, 1]} : vector<16x32xf32> to vector<2x32xf32>
    %23 = vector.extract_strided_slice %7 {offsets = [14, 0], sizes = [2, 32], strides = [1, 1]} : vector<16x32xf32> to vector<2x32xf32>
    %c0_19 = arith.constant 0 : index
    %c0_20 = arith.constant 0 : index
    %24 = vector.load %arg2[%c0_19, %c0_20] : memref<2x32xf32, #tpu.memory_space<vmem>>, vector<2x32xf32>
    %cst_21 = arith.constant dense<0.000000e+00> : vector<2x96xf32>
    %25 = tpu.matmul %16, %8, %cst_21 {dimension_numbers = #tpu.dot_dimension_numbers<[1], [0], [0], [1], [0, 0, 1, 1], [], []>} : vector<2x32xf32>, vector<32x96xf32>, vector<2x96xf32> -> vector<2x96xf32>
    %26 = vector.broadcast %10 : vector<1x96xf32> to vector<2x96xf32>
    %27 = arith.addf %25, %26 : vector<2x96xf32>
    %cst_22 = arith.constant dense<0.000000e+00> : vector<2x96xf32>
    %28 = tpu.matmul %24, %9, %cst_22 {dimension_numbers = #tpu.dot_dimension_numbers<[1], [0], [0], [1], [0, 0, 1, 1], [], []>} : vector<2x32xf32>, vector<32x96xf32>, vector<2x96xf32> -> vector<2x96xf32>
    %29 = vector.broadcast %11 : vector<1x96xf32> to vector<2x96xf32>
    %30 = arith.addf %28, %29 : vector<2x96xf32>
    %31 = vector.extract_strided_slice %27 {offsets = [0, 0], sizes = [2, 32], strides = [1, 1]} : vector<2x96xf32> to vector<2x32xf32>
    %32 = vector.extract_strided_slice %30 {offsets = [0, 0], sizes = [2, 32], strides = [1, 1]} : vector<2x96xf32> to vector<2x32xf32>
    %33 = arith.addf %31, %32 : vector<2x32xf32>
    %34 = arith.negf %33 : vector<2x32xf32>
    %35 = math.exp %34 : vector<2x32xf32>
    %cst_23 = arith.constant 1.000000e+00 : f32
    %36 = vector.broadcast %cst_23 : f32 to vector<2x32xf32>
    %37 = arith.addf %36, %35 : vector<2x32xf32>
    %38 = arith.divf %36, %37 : vector<2x32xf32>
    %39 = vector.extract_strided_slice %27 {offsets = [0, 32], sizes = [2, 32], strides = [1, 1]} : vector<2x96xf32> to vector<2x32xf32>
    %40 = vector.extract_strided_slice %30 {offsets = [0, 32], sizes = [2, 32], strides = [1, 1]} : vector<2x96xf32> to vector<2x32xf32>
    %41 = arith.addf %39, %40 : vector<2x32xf32>
    %42 = arith.negf %41 : vector<2x32xf32>
    %43 = math.exp %42 : vector<2x32xf32>
    %cst_24 = arith.constant 1.000000e+00 : f32
    %44 = vector.broadcast %cst_24 : f32 to vector<2x32xf32>
    %45 = arith.addf %44, %43 : vector<2x32xf32>
    %46 = arith.divf %44, %45 : vector<2x32xf32>
    %47 = vector.extract_strided_slice %27 {offsets = [0, 64], sizes = [2, 32], strides = [1, 1]} : vector<2x96xf32> to vector<2x32xf32>
    %48 = vector.extract_strided_slice %30 {offsets = [0, 64], sizes = [2, 32], strides = [1, 1]} : vector<2x96xf32> to vector<2x32xf32>
    %49 = arith.mulf %38, %48 : vector<2x32xf32>
    %50 = arith.addf %47, %49 : vector<2x32xf32>
    %51 = math.tanh %50 : vector<2x32xf32>
    %cst_25 = arith.constant 1.000000e+00 : f32
    %52 = vector.broadcast %cst_25 : f32 to vector<2x32xf32>
    %53 = arith.subf %52, %46 : vector<2x32xf32>
    %54 = arith.mulf %53, %51 : vector<2x32xf32>
    %55 = arith.mulf %46, %24 : vector<2x32xf32>
    %56 = arith.addf %54, %55 : vector<2x32xf32>
    %cst_26 = arith.constant dense<0.000000e+00> : vector<2x96xf32>
    %57 = tpu.matmul %17, %8, %cst_26 {dimension_numbers = #tpu.dot_dimension_numbers<[1], [0], [0], [1], [0, 0, 1, 1], [], []>} : vector<2x32xf32>, vector<32x96xf32>, vector<2x96xf32> -> vector<2x96xf32>
    %58 = vector.broadcast %10 : vector<1x96xf32> to vector<2x96xf32>
    %59 = arith.addf %57, %58 : vector<2x96xf32>
    %cst_27 = arith.constant dense<0.000000e+00> : vector<2x96xf32>
    %60 = tpu.matmul %56, %9, %cst_27 {dimension_numbers = #tpu.dot_dimension_numbers<[1], [0], [0], [1], [0, 0, 1, 1], [], []>} : vector<2x32xf32>, vector<32x96xf32>, vector<2x96xf32> -> vector<2x96xf32>
    %61 = vector.broadcast %11 : vector<1x96xf32> to vector<2x96xf32>
    %62 = arith.addf %60, %61 : vector<2x96xf32>
    %63 = vector.extract_strided_slice %59 {offsets = [0, 0], sizes = [2, 32], strides = [1, 1]} : vector<2x96xf32> to vector<2x32xf32>
    %64 = vector.extract_strided_slice %62 {offsets = [0, 0], sizes = [2, 32], strides = [1, 1]} : vector<2x96xf32> to vector<2x32xf32>
    %65 = arith.addf %63, %64 : vector<2x32xf32>
    %66 = arith.negf %65 : vector<2x32xf32>
    %67 = math.exp %66 : vector<2x32xf32>
    %cst_28 = arith.constant 1.000000e+00 : f32
    %68 = vector.broadcast %cst_28 : f32 to vector<2x32xf32>
    %69 = arith.addf %68, %67 : vector<2x32xf32>
    %70 = arith.divf %68, %69 : vector<2x32xf32>
    %71 = vector.extract_strided_slice %59 {offsets = [0, 32], sizes = [2, 32], strides = [1, 1]} : vector<2x96xf32> to vector<2x32xf32>
    %72 = vector.extract_strided_slice %62 {offsets = [0, 32], sizes = [2, 32], strides = [1, 1]} : vector<2x96xf32> to vector<2x32xf32>
    %73 = arith.addf %71, %72 : vector<2x32xf32>
    %74 = arith.negf %73 : vector<2x32xf32>
    %75 = math.exp %74 : vector<2x32xf32>
    %cst_29 = arith.constant 1.000000e+00 : f32
    %76 = vector.broadcast %cst_29 : f32 to vector<2x32xf32>
    %77 = arith.addf %76, %75 : vector<2x32xf32>
    %78 = arith.divf %76, %77 : vector<2x32xf32>
    %79 = vector.extract_strided_slice %59 {offsets = [0, 64], sizes = [2, 32], strides = [1, 1]} : vector<2x96xf32> to vector<2x32xf32>
    %80 = vector.extract_strided_slice %62 {offsets = [0, 64], sizes = [2, 32], strides = [1, 1]} : vector<2x96xf32> to vector<2x32xf32>
    %81 = arith.mulf %70, %80 : vector<2x32xf32>
    %82 = arith.addf %79, %81 : vector<2x32xf32>
    %83 = math.tanh %82 : vector<2x32xf32>
    %cst_30 = arith.constant 1.000000e+00 : f32
    %84 = vector.broadcast %cst_30 : f32 to vector<2x32xf32>
    %85 = arith.subf %84, %78 : vector<2x32xf32>
    %86 = arith.mulf %85, %83 : vector<2x32xf32>
    %87 = arith.mulf %78, %56 : vector<2x32xf32>
    %88 = arith.addf %86, %87 : vector<2x32xf32>
    %cst_31 = arith.constant dense<0.000000e+00> : vector<2x96xf32>
    %89 = tpu.matmul %18, %8, %cst_31 {dimension_numbers = #tpu.dot_dimension_numbers<[1], [0], [0], [1], [0, 0, 1, 1], [], []>} : vector<2x32xf32>, vector<32x96xf32>, vector<2x96xf32> -> vector<2x96xf32>
    %90 = vector.broadcast %10 : vector<1x96xf32> to vector<2x96xf32>
    %91 = arith.addf %89, %90 : vector<2x96xf32>
    %cst_32 = arith.constant dense<0.000000e+00> : vector<2x96xf32>
    %92 = tpu.matmul %88, %9, %cst_32 {dimension_numbers = #tpu.dot_dimension_numbers<[1], [0], [0], [1], [0, 0, 1, 1], [], []>} : vector<2x32xf32>, vector<32x96xf32>, vector<2x96xf32> -> vector<2x96xf32>
    %93 = vector.broadcast %11 : vector<1x96xf32> to vector<2x96xf32>
    %94 = arith.addf %92, %93 : vector<2x96xf32>
    %95 = vector.extract_strided_slice %91 {offsets = [0, 0], sizes = [2, 32], strides = [1, 1]} : vector<2x96xf32> to vector<2x32xf32>
    %96 = vector.extract_strided_slice %94 {offsets = [0, 0], sizes = [2, 32], strides = [1, 1]} : vector<2x96xf32> to vector<2x32xf32>
    %97 = arith.addf %95, %96 : vector<2x32xf32>
    %98 = arith.negf %97 : vector<2x32xf32>
    %99 = math.exp %98 : vector<2x32xf32>
    %cst_33 = arith.constant 1.000000e+00 : f32
    %100 = vector.broadcast %cst_33 : f32 to vector<2x32xf32>
    %101 = arith.addf %100, %99 : vector<2x32xf32>
    %102 = arith.divf %100, %101 : vector<2x32xf32>
    %103 = vector.extract_strided_slice %91 {offsets = [0, 32], sizes = [2, 32], strides = [1, 1]} : vector<2x96xf32> to vector<2x32xf32>
    %104 = vector.extract_strided_slice %94 {offsets = [0, 32], sizes = [2, 32], strides = [1, 1]} : vector<2x96xf32> to vector<2x32xf32>
    %105 = arith.addf %103, %104 : vector<2x32xf32>
    %106 = arith.negf %105 : vector<2x32xf32>
    %107 = math.exp %106 : vector<2x32xf32>
    %cst_34 = arith.constant 1.000000e+00 : f32
    %108 = vector.broadcast %cst_34 : f32 to vector<2x32xf32>
    %109 = arith.addf %108, %107 : vector<2x32xf32>
    %110 = arith.divf %108, %109 : vector<2x32xf32>
    %111 = vector.extract_strided_slice %91 {offsets = [0, 64], sizes = [2, 32], strides = [1, 1]} : vector<2x96xf32> to vector<2x32xf32>
    %112 = vector.extract_strided_slice %94 {offsets = [0, 64], sizes = [2, 32], strides = [1, 1]} : vector<2x96xf32> to vector<2x32xf32>
    %113 = arith.mulf %102, %112 : vector<2x32xf32>
    %114 = arith.addf %111, %113 : vector<2x32xf32>
    %115 = math.tanh %114 : vector<2x32xf32>
    %cst_35 = arith.constant 1.000000e+00 : f32
    %116 = vector.broadcast %cst_35 : f32 to vector<2x32xf32>
    %117 = arith.subf %116, %110 : vector<2x32xf32>
    %118 = arith.mulf %117, %115 : vector<2x32xf32>
    %119 = arith.mulf %110, %88 : vector<2x32xf32>
    %120 = arith.addf %118, %119 : vector<2x32xf32>
    %cst_36 = arith.constant dense<0.000000e+00> : vector<2x96xf32>
    %121 = tpu.matmul %19, %8, %cst_36 {dimension_numbers = #tpu.dot_dimension_numbers<[1], [0], [0], [1], [0, 0, 1, 1], [], []>} : vector<2x32xf32>, vector<32x96xf32>, vector<2x96xf32> -> vector<2x96xf32>
    %122 = vector.broadcast %10 : vector<1x96xf32> to vector<2x96xf32>
    %123 = arith.addf %121, %122 : vector<2x96xf32>
    %cst_37 = arith.constant dense<0.000000e+00> : vector<2x96xf32>
    %124 = tpu.matmul %120, %9, %cst_37 {dimension_numbers = #tpu.dot_dimension_numbers<[1], [0], [0], [1], [0, 0, 1, 1], [], []>} : vector<2x32xf32>, vector<32x96xf32>, vector<2x96xf32> -> vector<2x96xf32>
    %125 = vector.broadcast %11 : vector<1x96xf32> to vector<2x96xf32>
    %126 = arith.addf %124, %125 : vector<2x96xf32>
    %127 = vector.extract_strided_slice %123 {offsets = [0, 0], sizes = [2, 32], strides = [1, 1]} : vector<2x96xf32> to vector<2x32xf32>
    %128 = vector.extract_strided_slice %126 {offsets = [0, 0], sizes = [2, 32], strides = [1, 1]} : vector<2x96xf32> to vector<2x32xf32>
    %129 = arith.addf %127, %128 : vector<2x32xf32>
    %130 = arith.negf %129 : vector<2x32xf32>
    %131 = math.exp %130 : vector<2x32xf32>
    %cst_38 = arith.constant 1.000000e+00 : f32
    %132 = vector.broadcast %cst_38 : f32 to vector<2x32xf32>
    %133 = arith.addf %132, %131 : vector<2x32xf32>
    %134 = arith.divf %132, %133 : vector<2x32xf32>
    %135 = vector.extract_strided_slice %123 {offsets = [0, 32], sizes = [2, 32], strides = [1, 1]} : vector<2x96xf32> to vector<2x32xf32>
    %136 = vector.extract_strided_slice %126 {offsets = [0, 32], sizes = [2, 32], strides = [1, 1]} : vector<2x96xf32> to vector<2x32xf32>
    %137 = arith.addf %135, %136 : vector<2x32xf32>
    %138 = arith.negf %137 : vector<2x32xf32>
    %139 = math.exp %138 : vector<2x32xf32>
    %cst_39 = arith.constant 1.000000e+00 : f32
    %140 = vector.broadcast %cst_39 : f32 to vector<2x32xf32>
    %141 = arith.addf %140, %139 : vector<2x32xf32>
    %142 = arith.divf %140, %141 : vector<2x32xf32>
    %143 = vector.extract_strided_slice %123 {offsets = [0, 64], sizes = [2, 32], strides = [1, 1]} : vector<2x96xf32> to vector<2x32xf32>
    %144 = vector.extract_strided_slice %126 {offsets = [0, 64], sizes = [2, 32], strides = [1, 1]} : vector<2x96xf32> to vector<2x32xf32>
    %145 = arith.mulf %134, %144 : vector<2x32xf32>
    %146 = arith.addf %143, %145 : vector<2x32xf32>
    %147 = math.tanh %146 : vector<2x32xf32>
    %cst_40 = arith.constant 1.000000e+00 : f32
    %148 = vector.broadcast %cst_40 : f32 to vector<2x32xf32>
    %149 = arith.subf %148, %142 : vector<2x32xf32>
    %150 = arith.mulf %149, %147 : vector<2x32xf32>
    %151 = arith.mulf %142, %120 : vector<2x32xf32>
    %152 = arith.addf %150, %151 : vector<2x32xf32>
    %cst_41 = arith.constant dense<0.000000e+00> : vector<2x96xf32>
    %153 = tpu.matmul %20, %8, %cst_41 {dimension_numbers = #tpu.dot_dimension_numbers<[1], [0], [0], [1], [0, 0, 1, 1], [], []>} : vector<2x32xf32>, vector<32x96xf32>, vector<2x96xf32> -> vector<2x96xf32>
    %154 = vector.broadcast %10 : vector<1x96xf32> to vector<2x96xf32>
    %155 = arith.addf %153, %154 : vector<2x96xf32>
    %cst_42 = arith.constant dense<0.000000e+00> : vector<2x96xf32>
    %156 = tpu.matmul %152, %9, %cst_42 {dimension_numbers = #tpu.dot_dimension_numbers<[1], [0], [0], [1], [0, 0, 1, 1], [], []>} : vector<2x32xf32>, vector<32x96xf32>, vector<2x96xf32> -> vector<2x96xf32>
    %157 = vector.broadcast %11 : vector<1x96xf32> to vector<2x96xf32>
    %158 = arith.addf %156, %157 : vector<2x96xf32>
    %159 = vector.extract_strided_slice %155 {offsets = [0, 0], sizes = [2, 32], strides = [1, 1]} : vector<2x96xf32> to vector<2x32xf32>
    %160 = vector.extract_strided_slice %158 {offsets = [0, 0], sizes = [2, 32], strides = [1, 1]} : vector<2x96xf32> to vector<2x32xf32>
    %161 = arith.addf %159, %160 : vector<2x32xf32>
    %162 = arith.negf %161 : vector<2x32xf32>
    %163 = math.exp %162 : vector<2x32xf32>
    %cst_43 = arith.constant 1.000000e+00 : f32
    %164 = vector.broadcast %cst_43 : f32 to vector<2x32xf32>
    %165 = arith.addf %164, %163 : vector<2x32xf32>
    %166 = arith.divf %164, %165 : vector<2x32xf32>
    %167 = vector.extract_strided_slice %155 {offsets = [0, 32], sizes = [2, 32], strides = [1, 1]} : vector<2x96xf32> to vector<2x32xf32>
    %168 = vector.extract_strided_slice %158 {offsets = [0, 32], sizes = [2, 32], strides = [1, 1]} : vector<2x96xf32> to vector<2x32xf32>
    %169 = arith.addf %167, %168 : vector<2x32xf32>
    %170 = arith.negf %169 : vector<2x32xf32>
    %171 = math.exp %170 : vector<2x32xf32>
    %cst_44 = arith.constant 1.000000e+00 : f32
    %172 = vector.broadcast %cst_44 : f32 to vector<2x32xf32>
    %173 = arith.addf %172, %171 : vector<2x32xf32>
    %174 = arith.divf %172, %173 : vector<2x32xf32>
    %175 = vector.extract_strided_slice %155 {offsets = [0, 64], sizes = [2, 32], strides = [1, 1]} : vector<2x96xf32> to vector<2x32xf32>
    %176 = vector.extract_strided_slice %158 {offsets = [0, 64], sizes = [2, 32], strides = [1, 1]} : vector<2x96xf32> to vector<2x32xf32>
    %177 = arith.mulf %166, %176 : vector<2x32xf32>
    %178 = arith.addf %175, %177 : vector<2x32xf32>
    %179 = math.tanh %178 : vector<2x32xf32>
    %cst_45 = arith.constant 1.000000e+00 : f32
    %180 = vector.broadcast %cst_45 : f32 to vector<2x32xf32>
    %181 = arith.subf %180, %174 : vector<2x32xf32>
    %182 = arith.mulf %181, %179 : vector<2x32xf32>
    %183 = arith.mulf %174, %152 : vector<2x32xf32>
    %184 = arith.addf %182, %183 : vector<2x32xf32>
    %cst_46 = arith.constant dense<0.000000e+00> : vector<2x96xf32>
    %185 = tpu.matmul %21, %8, %cst_46 {dimension_numbers = #tpu.dot_dimension_numbers<[1], [0], [0], [1], [0, 0, 1, 1], [], []>} : vector<2x32xf32>, vector<32x96xf32>, vector<2x96xf32> -> vector<2x96xf32>
    %186 = vector.broadcast %10 : vector<1x96xf32> to vector<2x96xf32>
    %187 = arith.addf %185, %186 : vector<2x96xf32>
    %cst_47 = arith.constant dense<0.000000e+00> : vector<2x96xf32>
    %188 = tpu.matmul %184, %9, %cst_47 {dimension_numbers = #tpu.dot_dimension_numbers<[1], [0], [0], [1], [0, 0, 1, 1], [], []>} : vector<2x32xf32>, vector<32x96xf32>, vector<2x96xf32> -> vector<2x96xf32>
    %189 = vector.broadcast %11 : vector<1x96xf32> to vector<2x96xf32>
    %190 = arith.addf %188, %189 : vector<2x96xf32>
    %191 = vector.extract_strided_slice %187 {offsets = [0, 0], sizes = [2, 32], strides = [1, 1]} : vector<2x96xf32> to vector<2x32xf32>
    %192 = vector.extract_strided_slice %190 {offsets = [0, 0], sizes = [2, 32], strides = [1, 1]} : vector<2x96xf32> to vector<2x32xf32>
    %193 = arith.addf %191, %192 : vector<2x32xf32>
    %194 = arith.negf %193 : vector<2x32xf32>
    %195 = math.exp %194 : vector<2x32xf32>
    %cst_48 = arith.constant 1.000000e+00 : f32
    %196 = vector.broadcast %cst_48 : f32 to vector<2x32xf32>
    %197 = arith.addf %196, %195 : vector<2x32xf32>
    %198 = arith.divf %196, %197 : vector<2x32xf32>
    %199 = vector.extract_strided_slice %187 {offsets = [0, 32], sizes = [2, 32], strides = [1, 1]} : vector<2x96xf32> to vector<2x32xf32>
    %200 = vector.extract_strided_slice %190 {offsets = [0, 32], sizes = [2, 32], strides = [1, 1]} : vector<2x96xf32> to vector<2x32xf32>
    %201 = arith.addf %199, %200 : vector<2x32xf32>
    %202 = arith.negf %201 : vector<2x32xf32>
    %203 = math.exp %202 : vector<2x32xf32>
    %cst_49 = arith.constant 1.000000e+00 : f32
    %204 = vector.broadcast %cst_49 : f32 to vector<2x32xf32>
    %205 = arith.addf %204, %203 : vector<2x32xf32>
    %206 = arith.divf %204, %205 : vector<2x32xf32>
    %207 = vector.extract_strided_slice %187 {offsets = [0, 64], sizes = [2, 32], strides = [1, 1]} : vector<2x96xf32> to vector<2x32xf32>
    %208 = vector.extract_strided_slice %190 {offsets = [0, 64], sizes = [2, 32], strides = [1, 1]} : vector<2x96xf32> to vector<2x32xf32>
    %209 = arith.mulf %198, %208 : vector<2x32xf32>
    %210 = arith.addf %207, %209 : vector<2x32xf32>
    %211 = math.tanh %210 : vector<2x32xf32>
    %cst_50 = arith.constant 1.000000e+00 : f32
    %212 = vector.broadcast %cst_50 : f32 to vector<2x32xf32>
    %213 = arith.subf %212, %206 : vector<2x32xf32>
    %214 = arith.mulf %213, %211 : vector<2x32xf32>
    %215 = arith.mulf %206, %184 : vector<2x32xf32>
    %216 = arith.addf %214, %215 : vector<2x32xf32>
    %cst_51 = arith.constant dense<0.000000e+00> : vector<2x96xf32>
    %217 = tpu.matmul %22, %8, %cst_51 {dimension_numbers = #tpu.dot_dimension_numbers<[1], [0], [0], [1], [0, 0, 1, 1], [], []>} : vector<2x32xf32>, vector<32x96xf32>, vector<2x96xf32> -> vector<2x96xf32>
    %218 = vector.broadcast %10 : vector<1x96xf32> to vector<2x96xf32>
    %219 = arith.addf %217, %218 : vector<2x96xf32>
    %cst_52 = arith.constant dense<0.000000e+00> : vector<2x96xf32>
    %220 = tpu.matmul %216, %9, %cst_52 {dimension_numbers = #tpu.dot_dimension_numbers<[1], [0], [0], [1], [0, 0, 1, 1], [], []>} : vector<2x32xf32>, vector<32x96xf32>, vector<2x96xf32> -> vector<2x96xf32>
    %221 = vector.broadcast %11 : vector<1x96xf32> to vector<2x96xf32>
    %222 = arith.addf %220, %221 : vector<2x96xf32>
    %223 = vector.extract_strided_slice %219 {offsets = [0, 0], sizes = [2, 32], strides = [1, 1]} : vector<2x96xf32> to vector<2x32xf32>
    %224 = vector.extract_strided_slice %222 {offsets = [0, 0], sizes = [2, 32], strides = [1, 1]} : vector<2x96xf32> to vector<2x32xf32>
    %225 = arith.addf %223, %224 : vector<2x32xf32>
    %226 = arith.negf %225 : vector<2x32xf32>
    %227 = math.exp %226 : vector<2x32xf32>
    %cst_53 = arith.constant 1.000000e+00 : f32
    %228 = vector.broadcast %cst_53 : f32 to vector<2x32xf32>
    %229 = arith.addf %228, %227 : vector<2x32xf32>
    %230 = arith.divf %228, %229 : vector<2x32xf32>
    %231 = vector.extract_strided_slice %219 {offsets = [0, 32], sizes = [2, 32], strides = [1, 1]} : vector<2x96xf32> to vector<2x32xf32>
    %232 = vector.extract_strided_slice %222 {offsets = [0, 32], sizes = [2, 32], strides = [1, 1]} : vector<2x96xf32> to vector<2x32xf32>
    %233 = arith.addf %231, %232 : vector<2x32xf32>
    %234 = arith.negf %233 : vector<2x32xf32>
    %235 = math.exp %234 : vector<2x32xf32>
    %cst_54 = arith.constant 1.000000e+00 : f32
    %236 = vector.broadcast %cst_54 : f32 to vector<2x32xf32>
    %237 = arith.addf %236, %235 : vector<2x32xf32>
    %238 = arith.divf %236, %237 : vector<2x32xf32>
    %239 = vector.extract_strided_slice %219 {offsets = [0, 64], sizes = [2, 32], strides = [1, 1]} : vector<2x96xf32> to vector<2x32xf32>
    %240 = vector.extract_strided_slice %222 {offsets = [0, 64], sizes = [2, 32], strides = [1, 1]} : vector<2x96xf32> to vector<2x32xf32>
    %241 = arith.mulf %230, %240 : vector<2x32xf32>
    %242 = arith.addf %239, %241 : vector<2x32xf32>
    %243 = math.tanh %242 : vector<2x32xf32>
    %cst_55 = arith.constant 1.000000e+00 : f32
    %244 = vector.broadcast %cst_55 : f32 to vector<2x32xf32>
    %245 = arith.subf %244, %238 : vector<2x32xf32>
    %246 = arith.mulf %245, %243 : vector<2x32xf32>
    %247 = arith.mulf %238, %216 : vector<2x32xf32>
    %248 = arith.addf %246, %247 : vector<2x32xf32>
    %cst_56 = arith.constant dense<0.000000e+00> : vector<2x96xf32>
    %249 = tpu.matmul %23, %8, %cst_56 {dimension_numbers = #tpu.dot_dimension_numbers<[1], [0], [0], [1], [0, 0, 1, 1], [], []>} : vector<2x32xf32>, vector<32x96xf32>, vector<2x96xf32> -> vector<2x96xf32>
    %250 = vector.broadcast %10 : vector<1x96xf32> to vector<2x96xf32>
    %251 = arith.addf %249, %250 : vector<2x96xf32>
    %cst_57 = arith.constant dense<0.000000e+00> : vector<2x96xf32>
    %252 = tpu.matmul %248, %9, %cst_57 {dimension_numbers = #tpu.dot_dimension_numbers<[1], [0], [0], [1], [0, 0, 1, 1], [], []>} : vector<2x32xf32>, vector<32x96xf32>, vector<2x96xf32> -> vector<2x96xf32>
    %253 = vector.broadcast %11 : vector<1x96xf32> to vector<2x96xf32>
    %254 = arith.addf %252, %253 : vector<2x96xf32>
    %255 = vector.extract_strided_slice %251 {offsets = [0, 0], sizes = [2, 32], strides = [1, 1]} : vector<2x96xf32> to vector<2x32xf32>
    %256 = vector.extract_strided_slice %254 {offsets = [0, 0], sizes = [2, 32], strides = [1, 1]} : vector<2x96xf32> to vector<2x32xf32>
    %257 = arith.addf %255, %256 : vector<2x32xf32>
    %258 = arith.negf %257 : vector<2x32xf32>
    %259 = math.exp %258 : vector<2x32xf32>
    %cst_58 = arith.constant 1.000000e+00 : f32
    %260 = vector.broadcast %cst_58 : f32 to vector<2x32xf32>
    %261 = arith.addf %260, %259 : vector<2x32xf32>
    %262 = arith.divf %260, %261 : vector<2x32xf32>
    %263 = vector.extract_strided_slice %251 {offsets = [0, 32], sizes = [2, 32], strides = [1, 1]} : vector<2x96xf32> to vector<2x32xf32>
    %264 = vector.extract_strided_slice %254 {offsets = [0, 32], sizes = [2, 32], strides = [1, 1]} : vector<2x96xf32> to vector<2x32xf32>
    %265 = arith.addf %263, %264 : vector<2x32xf32>
    %266 = arith.negf %265 : vector<2x32xf32>
    %267 = math.exp %266 : vector<2x32xf32>
    %cst_59 = arith.constant 1.000000e+00 : f32
    %268 = vector.broadcast %cst_59 : f32 to vector<2x32xf32>
    %269 = arith.addf %268, %267 : vector<2x32xf32>
    %270 = arith.divf %268, %269 : vector<2x32xf32>
    %271 = vector.extract_strided_slice %251 {offsets = [0, 64], sizes = [2, 32], strides = [1, 1]} : vector<2x96xf32> to vector<2x32xf32>
    %272 = vector.extract_strided_slice %254 {offsets = [0, 64], sizes = [2, 32], strides = [1, 1]} : vector<2x96xf32> to vector<2x32xf32>
    %273 = arith.mulf %262, %272 : vector<2x32xf32>
    %274 = arith.addf %271, %273 : vector<2x32xf32>
    %275 = math.tanh %274 : vector<2x32xf32>
    %cst_60 = arith.constant 1.000000e+00 : f32
    %276 = vector.broadcast %cst_60 : f32 to vector<2x32xf32>
    %277 = arith.subf %276, %270 : vector<2x32xf32>
    %278 = arith.mulf %277, %275 : vector<2x32xf32>
    %279 = arith.mulf %270, %248 : vector<2x32xf32>
    %280 = arith.addf %278, %279 : vector<2x32xf32>
    %c0_61 = arith.constant 0 : index
    %c0_62 = arith.constant 0 : index
    %281 = vector.load %arg3[%c0_61, %c0_62] : memref<2x32xf32, #tpu.memory_space<vmem>>, vector<2x32xf32>
    %cst_63 = arith.constant dense<0.000000e+00> : vector<2x96xf32>
    %282 = tpu.matmul %23, %12, %cst_63 {dimension_numbers = #tpu.dot_dimension_numbers<[1], [0], [0], [1], [0, 0, 1, 1], [], []>} : vector<2x32xf32>, vector<32x96xf32>, vector<2x96xf32> -> vector<2x96xf32>
    %283 = vector.broadcast %14 : vector<1x96xf32> to vector<2x96xf32>
    %284 = arith.addf %282, %283 : vector<2x96xf32>
    %cst_64 = arith.constant dense<0.000000e+00> : vector<2x96xf32>
    %285 = tpu.matmul %281, %13, %cst_64 {dimension_numbers = #tpu.dot_dimension_numbers<[1], [0], [0], [1], [0, 0, 1, 1], [], []>} : vector<2x32xf32>, vector<32x96xf32>, vector<2x96xf32> -> vector<2x96xf32>
    %286 = vector.broadcast %15 : vector<1x96xf32> to vector<2x96xf32>
    %287 = arith.addf %285, %286 : vector<2x96xf32>
    %288 = vector.extract_strided_slice %284 {offsets = [0, 0], sizes = [2, 32], strides = [1, 1]} : vector<2x96xf32> to vector<2x32xf32>
    %289 = vector.extract_strided_slice %287 {offsets = [0, 0], sizes = [2, 32], strides = [1, 1]} : vector<2x96xf32> to vector<2x32xf32>
    %290 = arith.addf %288, %289 : vector<2x32xf32>
    %291 = arith.negf %290 : vector<2x32xf32>
    %292 = math.exp %291 : vector<2x32xf32>
    %cst_65 = arith.constant 1.000000e+00 : f32
    %293 = vector.broadcast %cst_65 : f32 to vector<2x32xf32>
    %294 = arith.addf %293, %292 : vector<2x32xf32>
    %295 = arith.divf %293, %294 : vector<2x32xf32>
    %296 = vector.extract_strided_slice %284 {offsets = [0, 32], sizes = [2, 32], strides = [1, 1]} : vector<2x96xf32> to vector<2x32xf32>
    %297 = vector.extract_strided_slice %287 {offsets = [0, 32], sizes = [2, 32], strides = [1, 1]} : vector<2x96xf32> to vector<2x32xf32>
    %298 = arith.addf %296, %297 : vector<2x32xf32>
    %299 = arith.negf %298 : vector<2x32xf32>
    %300 = math.exp %299 : vector<2x32xf32>
    %cst_66 = arith.constant 1.000000e+00 : f32
    %301 = vector.broadcast %cst_66 : f32 to vector<2x32xf32>
    %302 = arith.addf %301, %300 : vector<2x32xf32>
    %303 = arith.divf %301, %302 : vector<2x32xf32>
    %304 = vector.extract_strided_slice %284 {offsets = [0, 64], sizes = [2, 32], strides = [1, 1]} : vector<2x96xf32> to vector<2x32xf32>
    %305 = vector.extract_strided_slice %287 {offsets = [0, 64], sizes = [2, 32], strides = [1, 1]} : vector<2x96xf32> to vector<2x32xf32>
    %306 = arith.mulf %295, %305 : vector<2x32xf32>
    %307 = arith.addf %304, %306 : vector<2x32xf32>
    %308 = math.tanh %307 : vector<2x32xf32>
    %cst_67 = arith.constant 1.000000e+00 : f32
    %309 = vector.broadcast %cst_67 : f32 to vector<2x32xf32>
    %310 = arith.subf %309, %303 : vector<2x32xf32>
    %311 = arith.mulf %310, %308 : vector<2x32xf32>
    %312 = arith.mulf %303, %281 : vector<2x32xf32>
    %313 = arith.addf %311, %312 : vector<2x32xf32>
    %cst_68 = arith.constant dense<0.000000e+00> : vector<2x96xf32>
    %314 = tpu.matmul %22, %12, %cst_68 {dimension_numbers = #tpu.dot_dimension_numbers<[1], [0], [0], [1], [0, 0, 1, 1], [], []>} : vector<2x32xf32>, vector<32x96xf32>, vector<2x96xf32> -> vector<2x96xf32>
    %315 = vector.broadcast %14 : vector<1x96xf32> to vector<2x96xf32>
    %316 = arith.addf %314, %315 : vector<2x96xf32>
    %cst_69 = arith.constant dense<0.000000e+00> : vector<2x96xf32>
    %317 = tpu.matmul %313, %13, %cst_69 {dimension_numbers = #tpu.dot_dimension_numbers<[1], [0], [0], [1], [0, 0, 1, 1], [], []>} : vector<2x32xf32>, vector<32x96xf32>, vector<2x96xf32> -> vector<2x96xf32>
    %318 = vector.broadcast %15 : vector<1x96xf32> to vector<2x96xf32>
    %319 = arith.addf %317, %318 : vector<2x96xf32>
    %320 = vector.extract_strided_slice %316 {offsets = [0, 0], sizes = [2, 32], strides = [1, 1]} : vector<2x96xf32> to vector<2x32xf32>
    %321 = vector.extract_strided_slice %319 {offsets = [0, 0], sizes = [2, 32], strides = [1, 1]} : vector<2x96xf32> to vector<2x32xf32>
    %322 = arith.addf %320, %321 : vector<2x32xf32>
    %323 = arith.negf %322 : vector<2x32xf32>
    %324 = math.exp %323 : vector<2x32xf32>
    %cst_70 = arith.constant 1.000000e+00 : f32
    %325 = vector.broadcast %cst_70 : f32 to vector<2x32xf32>
    %326 = arith.addf %325, %324 : vector<2x32xf32>
    %327 = arith.divf %325, %326 : vector<2x32xf32>
    %328 = vector.extract_strided_slice %316 {offsets = [0, 32], sizes = [2, 32], strides = [1, 1]} : vector<2x96xf32> to vector<2x32xf32>
    %329 = vector.extract_strided_slice %319 {offsets = [0, 32], sizes = [2, 32], strides = [1, 1]} : vector<2x96xf32> to vector<2x32xf32>
    %330 = arith.addf %328, %329 : vector<2x32xf32>
    %331 = arith.negf %330 : vector<2x32xf32>
    %332 = math.exp %331 : vector<2x32xf32>
    %cst_71 = arith.constant 1.000000e+00 : f32
    %333 = vector.broadcast %cst_71 : f32 to vector<2x32xf32>
    %334 = arith.addf %333, %332 : vector<2x32xf32>
    %335 = arith.divf %333, %334 : vector<2x32xf32>
    %336 = vector.extract_strided_slice %316 {offsets = [0, 64], sizes = [2, 32], strides = [1, 1]} : vector<2x96xf32> to vector<2x32xf32>
    %337 = vector.extract_strided_slice %319 {offsets = [0, 64], sizes = [2, 32], strides = [1, 1]} : vector<2x96xf32> to vector<2x32xf32>
    %338 = arith.mulf %327, %337 : vector<2x32xf32>
    %339 = arith.addf %336, %338 : vector<2x32xf32>
    %340 = math.tanh %339 : vector<2x32xf32>
    %cst_72 = arith.constant 1.000000e+00 : f32
    %341 = vector.broadcast %cst_72 : f32 to vector<2x32xf32>
    %342 = arith.subf %341, %335 : vector<2x32xf32>
    %343 = arith.mulf %342, %340 : vector<2x32xf32>
    %344 = arith.mulf %335, %313 : vector<2x32xf32>
    %345 = arith.addf %343, %344 : vector<2x32xf32>
    %cst_73 = arith.constant dense<0.000000e+00> : vector<2x96xf32>
    %346 = tpu.matmul %21, %12, %cst_73 {dimension_numbers = #tpu.dot_dimension_numbers<[1], [0], [0], [1], [0, 0, 1, 1], [], []>} : vector<2x32xf32>, vector<32x96xf32>, vector<2x96xf32> -> vector<2x96xf32>
    %347 = vector.broadcast %14 : vector<1x96xf32> to vector<2x96xf32>
    %348 = arith.addf %346, %347 : vector<2x96xf32>
    %cst_74 = arith.constant dense<0.000000e+00> : vector<2x96xf32>
    %349 = tpu.matmul %345, %13, %cst_74 {dimension_numbers = #tpu.dot_dimension_numbers<[1], [0], [0], [1], [0, 0, 1, 1], [], []>} : vector<2x32xf32>, vector<32x96xf32>, vector<2x96xf32> -> vector<2x96xf32>
    %350 = vector.broadcast %15 : vector<1x96xf32> to vector<2x96xf32>
    %351 = arith.addf %349, %350 : vector<2x96xf32>
    %352 = vector.extract_strided_slice %348 {offsets = [0, 0], sizes = [2, 32], strides = [1, 1]} : vector<2x96xf32> to vector<2x32xf32>
    %353 = vector.extract_strided_slice %351 {offsets = [0, 0], sizes = [2, 32], strides = [1, 1]} : vector<2x96xf32> to vector<2x32xf32>
    %354 = arith.addf %352, %353 : vector<2x32xf32>
    %355 = arith.negf %354 : vector<2x32xf32>
    %356 = math.exp %355 : vector<2x32xf32>
    %cst_75 = arith.constant 1.000000e+00 : f32
    %357 = vector.broadcast %cst_75 : f32 to vector<2x32xf32>
    %358 = arith.addf %357, %356 : vector<2x32xf32>
    %359 = arith.divf %357, %358 : vector<2x32xf32>
    %360 = vector.extract_strided_slice %348 {offsets = [0, 32], sizes = [2, 32], strides = [1, 1]} : vector<2x96xf32> to vector<2x32xf32>
    %361 = vector.extract_strided_slice %351 {offsets = [0, 32], sizes = [2, 32], strides = [1, 1]} : vector<2x96xf32> to vector<2x32xf32>
    %362 = arith.addf %360, %361 : vector<2x32xf32>
    %363 = arith.negf %362 : vector<2x32xf32>
    %364 = math.exp %363 : vector<2x32xf32>
    %cst_76 = arith.constant 1.000000e+00 : f32
    %365 = vector.broadcast %cst_76 : f32 to vector<2x32xf32>
    %366 = arith.addf %365, %364 : vector<2x32xf32>
    %367 = arith.divf %365, %366 : vector<2x32xf32>
    %368 = vector.extract_strided_slice %348 {offsets = [0, 64], sizes = [2, 32], strides = [1, 1]} : vector<2x96xf32> to vector<2x32xf32>
    %369 = vector.extract_strided_slice %351 {offsets = [0, 64], sizes = [2, 32], strides = [1, 1]} : vector<2x96xf32> to vector<2x32xf32>
    %370 = arith.mulf %359, %369 : vector<2x32xf32>
    %371 = arith.addf %368, %370 : vector<2x32xf32>
    %372 = math.tanh %371 : vector<2x32xf32>
    %cst_77 = arith.constant 1.000000e+00 : f32
    %373 = vector.broadcast %cst_77 : f32 to vector<2x32xf32>
    %374 = arith.subf %373, %367 : vector<2x32xf32>
    %375 = arith.mulf %374, %372 : vector<2x32xf32>
    %376 = arith.mulf %367, %345 : vector<2x32xf32>
    %377 = arith.addf %375, %376 : vector<2x32xf32>
    %cst_78 = arith.constant dense<0.000000e+00> : vector<2x96xf32>
    %378 = tpu.matmul %20, %12, %cst_78 {dimension_numbers = #tpu.dot_dimension_numbers<[1], [0], [0], [1], [0, 0, 1, 1], [], []>} : vector<2x32xf32>, vector<32x96xf32>, vector<2x96xf32> -> vector<2x96xf32>
    %379 = vector.broadcast %14 : vector<1x96xf32> to vector<2x96xf32>
    %380 = arith.addf %378, %379 : vector<2x96xf32>
    %cst_79 = arith.constant dense<0.000000e+00> : vector<2x96xf32>
    %381 = tpu.matmul %377, %13, %cst_79 {dimension_numbers = #tpu.dot_dimension_numbers<[1], [0], [0], [1], [0, 0, 1, 1], [], []>} : vector<2x32xf32>, vector<32x96xf32>, vector<2x96xf32> -> vector<2x96xf32>
    %382 = vector.broadcast %15 : vector<1x96xf32> to vector<2x96xf32>
    %383 = arith.addf %381, %382 : vector<2x96xf32>
    %384 = vector.extract_strided_slice %380 {offsets = [0, 0], sizes = [2, 32], strides = [1, 1]} : vector<2x96xf32> to vector<2x32xf32>
    %385 = vector.extract_strided_slice %383 {offsets = [0, 0], sizes = [2, 32], strides = [1, 1]} : vector<2x96xf32> to vector<2x32xf32>
    %386 = arith.addf %384, %385 : vector<2x32xf32>
    %387 = arith.negf %386 : vector<2x32xf32>
    %388 = math.exp %387 : vector<2x32xf32>
    %cst_80 = arith.constant 1.000000e+00 : f32
    %389 = vector.broadcast %cst_80 : f32 to vector<2x32xf32>
    %390 = arith.addf %389, %388 : vector<2x32xf32>
    %391 = arith.divf %389, %390 : vector<2x32xf32>
    %392 = vector.extract_strided_slice %380 {offsets = [0, 32], sizes = [2, 32], strides = [1, 1]} : vector<2x96xf32> to vector<2x32xf32>
    %393 = vector.extract_strided_slice %383 {offsets = [0, 32], sizes = [2, 32], strides = [1, 1]} : vector<2x96xf32> to vector<2x32xf32>
    %394 = arith.addf %392, %393 : vector<2x32xf32>
    %395 = arith.negf %394 : vector<2x32xf32>
    %396 = math.exp %395 : vector<2x32xf32>
    %cst_81 = arith.constant 1.000000e+00 : f32
    %397 = vector.broadcast %cst_81 : f32 to vector<2x32xf32>
    %398 = arith.addf %397, %396 : vector<2x32xf32>
    %399 = arith.divf %397, %398 : vector<2x32xf32>
    %400 = vector.extract_strided_slice %380 {offsets = [0, 64], sizes = [2, 32], strides = [1, 1]} : vector<2x96xf32> to vector<2x32xf32>
    %401 = vector.extract_strided_slice %383 {offsets = [0, 64], sizes = [2, 32], strides = [1, 1]} : vector<2x96xf32> to vector<2x32xf32>
    %402 = arith.mulf %391, %401 : vector<2x32xf32>
    %403 = arith.addf %400, %402 : vector<2x32xf32>
    %404 = math.tanh %403 : vector<2x32xf32>
    %cst_82 = arith.constant 1.000000e+00 : f32
    %405 = vector.broadcast %cst_82 : f32 to vector<2x32xf32>
    %406 = arith.subf %405, %399 : vector<2x32xf32>
    %407 = arith.mulf %406, %404 : vector<2x32xf32>
    %408 = arith.mulf %399, %377 : vector<2x32xf32>
    %409 = arith.addf %407, %408 : vector<2x32xf32>
    %cst_83 = arith.constant dense<0.000000e+00> : vector<2x96xf32>
    %410 = tpu.matmul %19, %12, %cst_83 {dimension_numbers = #tpu.dot_dimension_numbers<[1], [0], [0], [1], [0, 0, 1, 1], [], []>} : vector<2x32xf32>, vector<32x96xf32>, vector<2x96xf32> -> vector<2x96xf32>
    %411 = vector.broadcast %14 : vector<1x96xf32> to vector<2x96xf32>
    %412 = arith.addf %410, %411 : vector<2x96xf32>
    %cst_84 = arith.constant dense<0.000000e+00> : vector<2x96xf32>
    %413 = tpu.matmul %409, %13, %cst_84 {dimension_numbers = #tpu.dot_dimension_numbers<[1], [0], [0], [1], [0, 0, 1, 1], [], []>} : vector<2x32xf32>, vector<32x96xf32>, vector<2x96xf32> -> vector<2x96xf32>
    %414 = vector.broadcast %15 : vector<1x96xf32> to vector<2x96xf32>
    %415 = arith.addf %413, %414 : vector<2x96xf32>
    %416 = vector.extract_strided_slice %412 {offsets = [0, 0], sizes = [2, 32], strides = [1, 1]} : vector<2x96xf32> to vector<2x32xf32>
    %417 = vector.extract_strided_slice %415 {offsets = [0, 0], sizes = [2, 32], strides = [1, 1]} : vector<2x96xf32> to vector<2x32xf32>
    %418 = arith.addf %416, %417 : vector<2x32xf32>
    %419 = arith.negf %418 : vector<2x32xf32>
    %420 = math.exp %419 : vector<2x32xf32>
    %cst_85 = arith.constant 1.000000e+00 : f32
    %421 = vector.broadcast %cst_85 : f32 to vector<2x32xf32>
    %422 = arith.addf %421, %420 : vector<2x32xf32>
    %423 = arith.divf %421, %422 : vector<2x32xf32>
    %424 = vector.extract_strided_slice %412 {offsets = [0, 32], sizes = [2, 32], strides = [1, 1]} : vector<2x96xf32> to vector<2x32xf32>
    %425 = vector.extract_strided_slice %415 {offsets = [0, 32], sizes = [2, 32], strides = [1, 1]} : vector<2x96xf32> to vector<2x32xf32>
    %426 = arith.addf %424, %425 : vector<2x32xf32>
    %427 = arith.negf %426 : vector<2x32xf32>
    %428 = math.exp %427 : vector<2x32xf32>
    %cst_86 = arith.constant 1.000000e+00 : f32
    %429 = vector.broadcast %cst_86 : f32 to vector<2x32xf32>
    %430 = arith.addf %429, %428 : vector<2x32xf32>
    %431 = arith.divf %429, %430 : vector<2x32xf32>
    %432 = vector.extract_strided_slice %412 {offsets = [0, 64], sizes = [2, 32], strides = [1, 1]} : vector<2x96xf32> to vector<2x32xf32>
    %433 = vector.extract_strided_slice %415 {offsets = [0, 64], sizes = [2, 32], strides = [1, 1]} : vector<2x96xf32> to vector<2x32xf32>
    %434 = arith.mulf %423, %433 : vector<2x32xf32>
    %435 = arith.addf %432, %434 : vector<2x32xf32>
    %436 = math.tanh %435 : vector<2x32xf32>
    %cst_87 = arith.constant 1.000000e+00 : f32
    %437 = vector.broadcast %cst_87 : f32 to vector<2x32xf32>
    %438 = arith.subf %437, %431 : vector<2x32xf32>
    %439 = arith.mulf %438, %436 : vector<2x32xf32>
    %440 = arith.mulf %431, %409 : vector<2x32xf32>
    %441 = arith.addf %439, %440 : vector<2x32xf32>
    %cst_88 = arith.constant dense<0.000000e+00> : vector<2x96xf32>
    %442 = tpu.matmul %18, %12, %cst_88 {dimension_numbers = #tpu.dot_dimension_numbers<[1], [0], [0], [1], [0, 0, 1, 1], [], []>} : vector<2x32xf32>, vector<32x96xf32>, vector<2x96xf32> -> vector<2x96xf32>
    %443 = vector.broadcast %14 : vector<1x96xf32> to vector<2x96xf32>
    %444 = arith.addf %442, %443 : vector<2x96xf32>
    %cst_89 = arith.constant dense<0.000000e+00> : vector<2x96xf32>
    %445 = tpu.matmul %441, %13, %cst_89 {dimension_numbers = #tpu.dot_dimension_numbers<[1], [0], [0], [1], [0, 0, 1, 1], [], []>} : vector<2x32xf32>, vector<32x96xf32>, vector<2x96xf32> -> vector<2x96xf32>
    %446 = vector.broadcast %15 : vector<1x96xf32> to vector<2x96xf32>
    %447 = arith.addf %445, %446 : vector<2x96xf32>
    %448 = vector.extract_strided_slice %444 {offsets = [0, 0], sizes = [2, 32], strides = [1, 1]} : vector<2x96xf32> to vector<2x32xf32>
    %449 = vector.extract_strided_slice %447 {offsets = [0, 0], sizes = [2, 32], strides = [1, 1]} : vector<2x96xf32> to vector<2x32xf32>
    %450 = arith.addf %448, %449 : vector<2x32xf32>
    %451 = arith.negf %450 : vector<2x32xf32>
    %452 = math.exp %451 : vector<2x32xf32>
    %cst_90 = arith.constant 1.000000e+00 : f32
    %453 = vector.broadcast %cst_90 : f32 to vector<2x32xf32>
    %454 = arith.addf %453, %452 : vector<2x32xf32>
    %455 = arith.divf %453, %454 : vector<2x32xf32>
    %456 = vector.extract_strided_slice %444 {offsets = [0, 32], sizes = [2, 32], strides = [1, 1]} : vector<2x96xf32> to vector<2x32xf32>
    %457 = vector.extract_strided_slice %447 {offsets = [0, 32], sizes = [2, 32], strides = [1, 1]} : vector<2x96xf32> to vector<2x32xf32>
    %458 = arith.addf %456, %457 : vector<2x32xf32>
    %459 = arith.negf %458 : vector<2x32xf32>
    %460 = math.exp %459 : vector<2x32xf32>
    %cst_91 = arith.constant 1.000000e+00 : f32
    %461 = vector.broadcast %cst_91 : f32 to vector<2x32xf32>
    %462 = arith.addf %461, %460 : vector<2x32xf32>
    %463 = arith.divf %461, %462 : vector<2x32xf32>
    %464 = vector.extract_strided_slice %444 {offsets = [0, 64], sizes = [2, 32], strides = [1, 1]} : vector<2x96xf32> to vector<2x32xf32>
    %465 = vector.extract_strided_slice %447 {offsets = [0, 64], sizes = [2, 32], strides = [1, 1]} : vector<2x96xf32> to vector<2x32xf32>
    %466 = arith.mulf %455, %465 : vector<2x32xf32>
    %467 = arith.addf %464, %466 : vector<2x32xf32>
    %468 = math.tanh %467 : vector<2x32xf32>
    %cst_92 = arith.constant 1.000000e+00 : f32
    %469 = vector.broadcast %cst_92 : f32 to vector<2x32xf32>
    %470 = arith.subf %469, %463 : vector<2x32xf32>
    %471 = arith.mulf %470, %468 : vector<2x32xf32>
    %472 = arith.mulf %463, %441 : vector<2x32xf32>
    %473 = arith.addf %471, %472 : vector<2x32xf32>
    %cst_93 = arith.constant dense<0.000000e+00> : vector<2x96xf32>
    %474 = tpu.matmul %17, %12, %cst_93 {dimension_numbers = #tpu.dot_dimension_numbers<[1], [0], [0], [1], [0, 0, 1, 1], [], []>} : vector<2x32xf32>, vector<32x96xf32>, vector<2x96xf32> -> vector<2x96xf32>
    %475 = vector.broadcast %14 : vector<1x96xf32> to vector<2x96xf32>
    %476 = arith.addf %474, %475 : vector<2x96xf32>
    %cst_94 = arith.constant dense<0.000000e+00> : vector<2x96xf32>
    %477 = tpu.matmul %473, %13, %cst_94 {dimension_numbers = #tpu.dot_dimension_numbers<[1], [0], [0], [1], [0, 0, 1, 1], [], []>} : vector<2x32xf32>, vector<32x96xf32>, vector<2x96xf32> -> vector<2x96xf32>
    %478 = vector.broadcast %15 : vector<1x96xf32> to vector<2x96xf32>
    %479 = arith.addf %477, %478 : vector<2x96xf32>
    %480 = vector.extract_strided_slice %476 {offsets = [0, 0], sizes = [2, 32], strides = [1, 1]} : vector<2x96xf32> to vector<2x32xf32>
    %481 = vector.extract_strided_slice %479 {offsets = [0, 0], sizes = [2, 32], strides = [1, 1]} : vector<2x96xf32> to vector<2x32xf32>
    %482 = arith.addf %480, %481 : vector<2x32xf32>
    %483 = arith.negf %482 : vector<2x32xf32>
    %484 = math.exp %483 : vector<2x32xf32>
    %cst_95 = arith.constant 1.000000e+00 : f32
    %485 = vector.broadcast %cst_95 : f32 to vector<2x32xf32>
    %486 = arith.addf %485, %484 : vector<2x32xf32>
    %487 = arith.divf %485, %486 : vector<2x32xf32>
    %488 = vector.extract_strided_slice %476 {offsets = [0, 32], sizes = [2, 32], strides = [1, 1]} : vector<2x96xf32> to vector<2x32xf32>
    %489 = vector.extract_strided_slice %479 {offsets = [0, 32], sizes = [2, 32], strides = [1, 1]} : vector<2x96xf32> to vector<2x32xf32>
    %490 = arith.addf %488, %489 : vector<2x32xf32>
    %491 = arith.negf %490 : vector<2x32xf32>
    %492 = math.exp %491 : vector<2x32xf32>
    %cst_96 = arith.constant 1.000000e+00 : f32
    %493 = vector.broadcast %cst_96 : f32 to vector<2x32xf32>
    %494 = arith.addf %493, %492 : vector<2x32xf32>
    %495 = arith.divf %493, %494 : vector<2x32xf32>
    %496 = vector.extract_strided_slice %476 {offsets = [0, 64], sizes = [2, 32], strides = [1, 1]} : vector<2x96xf32> to vector<2x32xf32>
    %497 = vector.extract_strided_slice %479 {offsets = [0, 64], sizes = [2, 32], strides = [1, 1]} : vector<2x96xf32> to vector<2x32xf32>
    %498 = arith.mulf %487, %497 : vector<2x32xf32>
    %499 = arith.addf %496, %498 : vector<2x32xf32>
    %500 = math.tanh %499 : vector<2x32xf32>
    %cst_97 = arith.constant 1.000000e+00 : f32
    %501 = vector.broadcast %cst_97 : f32 to vector<2x32xf32>
    %502 = arith.subf %501, %495 : vector<2x32xf32>
    %503 = arith.mulf %502, %500 : vector<2x32xf32>
    %504 = arith.mulf %495, %473 : vector<2x32xf32>
    %505 = arith.addf %503, %504 : vector<2x32xf32>
    %cst_98 = arith.constant dense<0.000000e+00> : vector<2x96xf32>
    %506 = tpu.matmul %16, %12, %cst_98 {dimension_numbers = #tpu.dot_dimension_numbers<[1], [0], [0], [1], [0, 0, 1, 1], [], []>} : vector<2x32xf32>, vector<32x96xf32>, vector<2x96xf32> -> vector<2x96xf32>
    %507 = vector.broadcast %14 : vector<1x96xf32> to vector<2x96xf32>
    %508 = arith.addf %506, %507 : vector<2x96xf32>
    %cst_99 = arith.constant dense<0.000000e+00> : vector<2x96xf32>
    %509 = tpu.matmul %505, %13, %cst_99 {dimension_numbers = #tpu.dot_dimension_numbers<[1], [0], [0], [1], [0, 0, 1, 1], [], []>} : vector<2x32xf32>, vector<32x96xf32>, vector<2x96xf32> -> vector<2x96xf32>
    %510 = vector.broadcast %15 : vector<1x96xf32> to vector<2x96xf32>
    %511 = arith.addf %509, %510 : vector<2x96xf32>
    %512 = vector.extract_strided_slice %508 {offsets = [0, 0], sizes = [2, 32], strides = [1, 1]} : vector<2x96xf32> to vector<2x32xf32>
    %513 = vector.extract_strided_slice %511 {offsets = [0, 0], sizes = [2, 32], strides = [1, 1]} : vector<2x96xf32> to vector<2x32xf32>
    %514 = arith.addf %512, %513 : vector<2x32xf32>
    %515 = arith.negf %514 : vector<2x32xf32>
    %516 = math.exp %515 : vector<2x32xf32>
    %cst_100 = arith.constant 1.000000e+00 : f32
    %517 = vector.broadcast %cst_100 : f32 to vector<2x32xf32>
    %518 = arith.addf %517, %516 : vector<2x32xf32>
    %519 = arith.divf %517, %518 : vector<2x32xf32>
    %520 = vector.extract_strided_slice %508 {offsets = [0, 32], sizes = [2, 32], strides = [1, 1]} : vector<2x96xf32> to vector<2x32xf32>
    %521 = vector.extract_strided_slice %511 {offsets = [0, 32], sizes = [2, 32], strides = [1, 1]} : vector<2x96xf32> to vector<2x32xf32>
    %522 = arith.addf %520, %521 : vector<2x32xf32>
    %523 = arith.negf %522 : vector<2x32xf32>
    %524 = math.exp %523 : vector<2x32xf32>
    %cst_101 = arith.constant 1.000000e+00 : f32
    %525 = vector.broadcast %cst_101 : f32 to vector<2x32xf32>
    %526 = arith.addf %525, %524 : vector<2x32xf32>
    %527 = arith.divf %525, %526 : vector<2x32xf32>
    %528 = vector.extract_strided_slice %508 {offsets = [0, 64], sizes = [2, 32], strides = [1, 1]} : vector<2x96xf32> to vector<2x32xf32>
    %529 = vector.extract_strided_slice %511 {offsets = [0, 64], sizes = [2, 32], strides = [1, 1]} : vector<2x96xf32> to vector<2x32xf32>
    %530 = arith.mulf %519, %529 : vector<2x32xf32>
    %531 = arith.addf %528, %530 : vector<2x32xf32>
    %532 = math.tanh %531 : vector<2x32xf32>
    %cst_102 = arith.constant 1.000000e+00 : f32
    %533 = vector.broadcast %cst_102 : f32 to vector<2x32xf32>
    %534 = arith.subf %533, %527 : vector<2x32xf32>
    %535 = arith.mulf %534, %532 : vector<2x32xf32>
    %536 = arith.mulf %527, %505 : vector<2x32xf32>
    %537 = arith.addf %535, %536 : vector<2x32xf32>
    %538 = tpu.concatenate %56, %537 in 1 : vector<2x32xf32>, vector<2x32xf32> -> vector<2x64xf32>
    %539 = tpu.concatenate %88, %505 in 1 : vector<2x32xf32>, vector<2x32xf32> -> vector<2x64xf32>
    %540 = tpu.concatenate %120, %473 in 1 : vector<2x32xf32>, vector<2x32xf32> -> vector<2x64xf32>
    %541 = tpu.concatenate %152, %441 in 1 : vector<2x32xf32>, vector<2x32xf32> -> vector<2x64xf32>
    %542 = tpu.concatenate %184, %409 in 1 : vector<2x32xf32>, vector<2x32xf32> -> vector<2x64xf32>
    %543 = tpu.concatenate %216, %377 in 1 : vector<2x32xf32>, vector<2x32xf32> -> vector<2x64xf32>
    %544 = tpu.concatenate %248, %345 in 1 : vector<2x32xf32>, vector<2x32xf32> -> vector<2x64xf32>
    %545 = tpu.concatenate %280, %313 in 1 : vector<2x32xf32>, vector<2x32xf32> -> vector<2x64xf32>
    %546 = vector.extract_strided_slice %538 {offsets = [0, 0], sizes = [1, 64], strides = [1, 1]} : vector<2x64xf32> to vector<1x64xf32>
    %547 = vector.extract_strided_slice %539 {offsets = [0, 0], sizes = [1, 64], strides = [1, 1]} : vector<2x64xf32> to vector<1x64xf32>
    %548 = vector.extract_strided_slice %540 {offsets = [0, 0], sizes = [1, 64], strides = [1, 1]} : vector<2x64xf32> to vector<1x64xf32>
    %549 = vector.extract_strided_slice %541 {offsets = [0, 0], sizes = [1, 64], strides = [1, 1]} : vector<2x64xf32> to vector<1x64xf32>
    %550 = vector.extract_strided_slice %542 {offsets = [0, 0], sizes = [1, 64], strides = [1, 1]} : vector<2x64xf32> to vector<1x64xf32>
    %551 = vector.extract_strided_slice %543 {offsets = [0, 0], sizes = [1, 64], strides = [1, 1]} : vector<2x64xf32> to vector<1x64xf32>
    %552 = vector.extract_strided_slice %544 {offsets = [0, 0], sizes = [1, 64], strides = [1, 1]} : vector<2x64xf32> to vector<1x64xf32>
    %553 = vector.extract_strided_slice %545 {offsets = [0, 0], sizes = [1, 64], strides = [1, 1]} : vector<2x64xf32> to vector<1x64xf32>
    %554 = vector.extract_strided_slice %538 {offsets = [1, 0], sizes = [1, 64], strides = [1, 1]} : vector<2x64xf32> to vector<1x64xf32>
    %555 = vector.extract_strided_slice %539 {offsets = [1, 0], sizes = [1, 64], strides = [1, 1]} : vector<2x64xf32> to vector<1x64xf32>
    %556 = vector.extract_strided_slice %540 {offsets = [1, 0], sizes = [1, 64], strides = [1, 1]} : vector<2x64xf32> to vector<1x64xf32>
    %557 = vector.extract_strided_slice %541 {offsets = [1, 0], sizes = [1, 64], strides = [1, 1]} : vector<2x64xf32> to vector<1x64xf32>
    %558 = vector.extract_strided_slice %542 {offsets = [1, 0], sizes = [1, 64], strides = [1, 1]} : vector<2x64xf32> to vector<1x64xf32>
    %559 = vector.extract_strided_slice %543 {offsets = [1, 0], sizes = [1, 64], strides = [1, 1]} : vector<2x64xf32> to vector<1x64xf32>
    %560 = vector.extract_strided_slice %544 {offsets = [1, 0], sizes = [1, 64], strides = [1, 1]} : vector<2x64xf32> to vector<1x64xf32>
    %561 = vector.extract_strided_slice %545 {offsets = [1, 0], sizes = [1, 64], strides = [1, 1]} : vector<2x64xf32> to vector<1x64xf32>
    %562 = tpu.concatenate %546, %547, %548, %549, %550, %551, %552, %553, %554, %555, %556, %557, %558, %559, %560, %561 in 0 : vector<1x64xf32>, vector<1x64xf32>, vector<1x64xf32>, vector<1x64xf32>, vector<1x64xf32>, vector<1x64xf32>, vector<1x64xf32>, vector<1x64xf32>, vector<1x64xf32>, vector<1x64xf32>, vector<1x64xf32>, vector<1x64xf32>, vector<1x64xf32>, vector<1x64xf32>, vector<1x64xf32>, vector<1x64xf32> -> vector<16x64xf32>
    %c0_103 = arith.constant 0 : index
    %c0_104 = arith.constant 0 : index
    %563 = vector.load %arg12[%c0_103, %c0_104] : memref<64x37xf32, #tpu.memory_space<vmem>>, vector<64x37xf32>
    %cst_105 = arith.constant dense<0.000000e+00> : vector<16x37xf32>
    %564 = tpu.matmul %562, %563, %cst_105 {dimension_numbers = #tpu.dot_dimension_numbers<[1], [0], [0], [1], [0, 0, 1, 1], [], []>} : vector<16x64xf32>, vector<64x37xf32>, vector<16x37xf32> -> vector<16x37xf32>
    %565 = vector.extract_strided_slice %564 {offsets = [0, 0], sizes = [16, 16], strides = [1, 1]} : vector<16x37xf32> to vector<16x16xf32>
    %566 = vector.extract_strided_slice %564 {offsets = [0, 16], sizes = [16, 16], strides = [1, 1]} : vector<16x37xf32> to vector<16x16xf32>
    %567 = vector.extract_strided_slice %564 {offsets = [0, 32], sizes = [16, 5], strides = [1, 1]} : vector<16x37xf32> to vector<16x5xf32>
    %c0_106 = arith.constant 0 : index
    %c0_107 = arith.constant 0 : index
    %568 = vector.load %arg13[%c0_106, %c0_107] : memref<1x5xf32, #tpu.memory_space<vmem>>, vector<1x5xf32>
    %569 = vector.broadcast %568 : vector<1x5xf32> to vector<16x5xf32>
    %570 = arith.addf %567, %569 : vector<16x5xf32>
    %c0_108 = arith.constant 0 : index
    %c0_109 = arith.constant 0 : index
    %571 = vector.load %arg16[%c0_108, %c0_109] : memref<5x5xf32, #tpu.memory_space<vmem>>, vector<5x5xf32>
    %572 = vector.extract_strided_slice %570 {offsets = [0, 0], sizes = [1, 5], strides = [1, 1]} : vector<16x5xf32> to vector<1x5xf32>
    %573 = vector.extract_strided_slice %570 {offsets = [8, 0], sizes = [1, 5], strides = [1, 1]} : vector<16x5xf32> to vector<1x5xf32>
    %574 = tpu.concatenate %572, %573 in 0 : vector<1x5xf32>, vector<1x5xf32> -> vector<2x5xf32>
    %575 = vector.extract_strided_slice %570 {offsets = [1, 0], sizes = [1, 5], strides = [1, 1]} : vector<16x5xf32> to vector<1x5xf32>
    %576 = vector.extract_strided_slice %570 {offsets = [9, 0], sizes = [1, 5], strides = [1, 1]} : vector<16x5xf32> to vector<1x5xf32>
    %577 = tpu.concatenate %575, %576 in 0 : vector<1x5xf32>, vector<1x5xf32> -> vector<2x5xf32>
    %578 = vector.extract_strided_slice %570 {offsets = [2, 0], sizes = [1, 5], strides = [1, 1]} : vector<16x5xf32> to vector<1x5xf32>
    %579 = vector.extract_strided_slice %570 {offsets = [10, 0], sizes = [1, 5], strides = [1, 1]} : vector<16x5xf32> to vector<1x5xf32>
    %580 = tpu.concatenate %578, %579 in 0 : vector<1x5xf32>, vector<1x5xf32> -> vector<2x5xf32>
    %581 = vector.extract_strided_slice %570 {offsets = [3, 0], sizes = [1, 5], strides = [1, 1]} : vector<16x5xf32> to vector<1x5xf32>
    %582 = vector.extract_strided_slice %570 {offsets = [11, 0], sizes = [1, 5], strides = [1, 1]} : vector<16x5xf32> to vector<1x5xf32>
    %583 = tpu.concatenate %581, %582 in 0 : vector<1x5xf32>, vector<1x5xf32> -> vector<2x5xf32>
    %584 = vector.extract_strided_slice %570 {offsets = [4, 0], sizes = [1, 5], strides = [1, 1]} : vector<16x5xf32> to vector<1x5xf32>
    %585 = vector.extract_strided_slice %570 {offsets = [12, 0], sizes = [1, 5], strides = [1, 1]} : vector<16x5xf32> to vector<1x5xf32>
    %586 = tpu.concatenate %584, %585 in 0 : vector<1x5xf32>, vector<1x5xf32> -> vector<2x5xf32>
    %587 = vector.extract_strided_slice %570 {offsets = [5, 0], sizes = [1, 5], strides = [1, 1]} : vector<16x5xf32> to vector<1x5xf32>
    %588 = vector.extract_strided_slice %570 {offsets = [13, 0], sizes = [1, 5], strides = [1, 1]} : vector<16x5xf32> to vector<1x5xf32>
    %589 = tpu.concatenate %587, %588 in 0 : vector<1x5xf32>, vector<1x5xf32> -> vector<2x5xf32>
    %590 = vector.extract_strided_slice %570 {offsets = [6, 0], sizes = [1, 5], strides = [1, 1]} : vector<16x5xf32> to vector<1x5xf32>
    %591 = vector.extract_strided_slice %570 {offsets = [14, 0], sizes = [1, 5], strides = [1, 1]} : vector<16x5xf32> to vector<1x5xf32>
    %592 = tpu.concatenate %590, %591 in 0 : vector<1x5xf32>, vector<1x5xf32> -> vector<2x5xf32>
    %593 = vector.extract_strided_slice %570 {offsets = [7, 0], sizes = [1, 5], strides = [1, 1]} : vector<16x5xf32> to vector<1x5xf32>
    %594 = vector.extract_strided_slice %570 {offsets = [15, 0], sizes = [1, 5], strides = [1, 1]} : vector<16x5xf32> to vector<1x5xf32>
    %595 = tpu.concatenate %593, %594 in 0 : vector<1x5xf32>, vector<1x5xf32> -> vector<2x5xf32>
    %c0_110 = arith.constant 0 : index
    %c0_111 = arith.constant 0 : index
    %596 = vector.load %arg14[%c0_110, %c0_111] : memref<1x5xf32, #tpu.memory_space<vmem>>, vector<1x5xf32>
    %597 = vector.broadcast %596 : vector<1x5xf32> to vector<2x5xf32>
    %598 = arith.addf %597, %574 : vector<2x5xf32>
    %599 = vector.extract_strided_slice %598 {offsets = [0, 0], sizes = [2, 1], strides = [1, 1]} : vector<2x5xf32> to vector<2x1xf32>
    %600 = vector.extract_strided_slice %571 {offsets = [0, 0], sizes = [1, 5], strides = [1, 1]} : vector<5x5xf32> to vector<1x5xf32>
    %601 = vector.broadcast %599 : vector<2x1xf32> to vector<2x5xf32>
    %602 = vector.broadcast %600 : vector<1x5xf32> to vector<2x5xf32>
    %603 = arith.addf %601, %602 : vector<2x5xf32>
    %c0_i32 = arith.constant 0 : i32
    %604 = vector.broadcast %c0_i32 : i32 to vector<2x5xi32>
    %605 = vector.extract_strided_slice %598 {offsets = [0, 1], sizes = [2, 1], strides = [1, 1]} : vector<2x5xf32> to vector<2x1xf32>
    %606 = vector.extract_strided_slice %571 {offsets = [1, 0], sizes = [1, 5], strides = [1, 1]} : vector<5x5xf32> to vector<1x5xf32>
    %607 = vector.broadcast %605 : vector<2x1xf32> to vector<2x5xf32>
    %608 = vector.broadcast %606 : vector<1x5xf32> to vector<2x5xf32>
    %609 = arith.addf %607, %608 : vector<2x5xf32>
    %610 = arith.cmpf ogt, %609, %603 : vector<2x5xf32>
    %611 = arith.select %610, %609, %603 : vector<2x5xi1>, vector<2x5xf32>
    %c1_i32 = arith.constant 1 : i32
    %612 = vector.broadcast %c1_i32 : i32 to vector<2x5xi32>
    %613 = arith.select %610, %612, %604 : vector<2x5xi1>, vector<2x5xi32>
    %614 = vector.extract_strided_slice %598 {offsets = [0, 2], sizes = [2, 1], strides = [1, 1]} : vector<2x5xf32> to vector<2x1xf32>
    %615 = vector.extract_strided_slice %571 {offsets = [2, 0], sizes = [1, 5], strides = [1, 1]} : vector<5x5xf32> to vector<1x5xf32>
    %616 = vector.broadcast %614 : vector<2x1xf32> to vector<2x5xf32>
    %617 = vector.broadcast %615 : vector<1x5xf32> to vector<2x5xf32>
    %618 = arith.addf %616, %617 : vector<2x5xf32>
    %619 = arith.cmpf ogt, %618, %611 : vector<2x5xf32>
    %620 = arith.select %619, %618, %611 : vector<2x5xi1>, vector<2x5xf32>
    %c2_i32 = arith.constant 2 : i32
    %621 = vector.broadcast %c2_i32 : i32 to vector<2x5xi32>
    %622 = arith.select %619, %621, %613 : vector<2x5xi1>, vector<2x5xi32>
    %623 = vector.extract_strided_slice %598 {offsets = [0, 3], sizes = [2, 1], strides = [1, 1]} : vector<2x5xf32> to vector<2x1xf32>
    %624 = vector.extract_strided_slice %571 {offsets = [3, 0], sizes = [1, 5], strides = [1, 1]} : vector<5x5xf32> to vector<1x5xf32>
    %625 = vector.broadcast %623 : vector<2x1xf32> to vector<2x5xf32>
    %626 = vector.broadcast %624 : vector<1x5xf32> to vector<2x5xf32>
    %627 = arith.addf %625, %626 : vector<2x5xf32>
    %628 = arith.cmpf ogt, %627, %620 : vector<2x5xf32>
    %629 = arith.select %628, %627, %620 : vector<2x5xi1>, vector<2x5xf32>
    %c3_i32 = arith.constant 3 : i32
    %630 = vector.broadcast %c3_i32 : i32 to vector<2x5xi32>
    %631 = arith.select %628, %630, %622 : vector<2x5xi1>, vector<2x5xi32>
    %632 = vector.extract_strided_slice %598 {offsets = [0, 4], sizes = [2, 1], strides = [1, 1]} : vector<2x5xf32> to vector<2x1xf32>
    %633 = vector.extract_strided_slice %571 {offsets = [4, 0], sizes = [1, 5], strides = [1, 1]} : vector<5x5xf32> to vector<1x5xf32>
    %634 = vector.broadcast %632 : vector<2x1xf32> to vector<2x5xf32>
    %635 = vector.broadcast %633 : vector<1x5xf32> to vector<2x5xf32>
    %636 = arith.addf %634, %635 : vector<2x5xf32>
    %637 = arith.cmpf ogt, %636, %629 : vector<2x5xf32>
    %638 = arith.select %637, %636, %629 : vector<2x5xi1>, vector<2x5xf32>
    %c4_i32 = arith.constant 4 : i32
    %639 = vector.broadcast %c4_i32 : i32 to vector<2x5xi32>
    %640 = arith.select %637, %639, %631 : vector<2x5xi1>, vector<2x5xi32>
    %641 = arith.addf %638, %577 : vector<2x5xf32>
    %642 = vector.extract_strided_slice %641 {offsets = [0, 0], sizes = [2, 1], strides = [1, 1]} : vector<2x5xf32> to vector<2x1xf32>
    %643 = vector.extract_strided_slice %571 {offsets = [0, 0], sizes = [1, 5], strides = [1, 1]} : vector<5x5xf32> to vector<1x5xf32>
    %644 = vector.broadcast %642 : vector<2x1xf32> to vector<2x5xf32>
    %645 = vector.broadcast %643 : vector<1x5xf32> to vector<2x5xf32>
    %646 = arith.addf %644, %645 : vector<2x5xf32>
    %c0_i32_112 = arith.constant 0 : i32
    %647 = vector.broadcast %c0_i32_112 : i32 to vector<2x5xi32>
    %648 = vector.extract_strided_slice %641 {offsets = [0, 1], sizes = [2, 1], strides = [1, 1]} : vector<2x5xf32> to vector<2x1xf32>
    %649 = vector.extract_strided_slice %571 {offsets = [1, 0], sizes = [1, 5], strides = [1, 1]} : vector<5x5xf32> to vector<1x5xf32>
    %650 = vector.broadcast %648 : vector<2x1xf32> to vector<2x5xf32>
    %651 = vector.broadcast %649 : vector<1x5xf32> to vector<2x5xf32>
    %652 = arith.addf %650, %651 : vector<2x5xf32>
    %653 = arith.cmpf ogt, %652, %646 : vector<2x5xf32>
    %654 = arith.select %653, %652, %646 : vector<2x5xi1>, vector<2x5xf32>
    %c1_i32_113 = arith.constant 1 : i32
    %655 = vector.broadcast %c1_i32_113 : i32 to vector<2x5xi32>
    %656 = arith.select %653, %655, %647 : vector<2x5xi1>, vector<2x5xi32>
    %657 = vector.extract_strided_slice %641 {offsets = [0, 2], sizes = [2, 1], strides = [1, 1]} : vector<2x5xf32> to vector<2x1xf32>
    %658 = vector.extract_strided_slice %571 {offsets = [2, 0], sizes = [1, 5], strides = [1, 1]} : vector<5x5xf32> to vector<1x5xf32>
    %659 = vector.broadcast %657 : vector<2x1xf32> to vector<2x5xf32>
    %660 = vector.broadcast %658 : vector<1x5xf32> to vector<2x5xf32>
    %661 = arith.addf %659, %660 : vector<2x5xf32>
    %662 = arith.cmpf ogt, %661, %654 : vector<2x5xf32>
    %663 = arith.select %662, %661, %654 : vector<2x5xi1>, vector<2x5xf32>
    %c2_i32_114 = arith.constant 2 : i32
    %664 = vector.broadcast %c2_i32_114 : i32 to vector<2x5xi32>
    %665 = arith.select %662, %664, %656 : vector<2x5xi1>, vector<2x5xi32>
    %666 = vector.extract_strided_slice %641 {offsets = [0, 3], sizes = [2, 1], strides = [1, 1]} : vector<2x5xf32> to vector<2x1xf32>
    %667 = vector.extract_strided_slice %571 {offsets = [3, 0], sizes = [1, 5], strides = [1, 1]} : vector<5x5xf32> to vector<1x5xf32>
    %668 = vector.broadcast %666 : vector<2x1xf32> to vector<2x5xf32>
    %669 = vector.broadcast %667 : vector<1x5xf32> to vector<2x5xf32>
    %670 = arith.addf %668, %669 : vector<2x5xf32>
    %671 = arith.cmpf ogt, %670, %663 : vector<2x5xf32>
    %672 = arith.select %671, %670, %663 : vector<2x5xi1>, vector<2x5xf32>
    %c3_i32_115 = arith.constant 3 : i32
    %673 = vector.broadcast %c3_i32_115 : i32 to vector<2x5xi32>
    %674 = arith.select %671, %673, %665 : vector<2x5xi1>, vector<2x5xi32>
    %675 = vector.extract_strided_slice %641 {offsets = [0, 4], sizes = [2, 1], strides = [1, 1]} : vector<2x5xf32> to vector<2x1xf32>
    %676 = vector.extract_strided_slice %571 {offsets = [4, 0], sizes = [1, 5], strides = [1, 1]} : vector<5x5xf32> to vector<1x5xf32>
    %677 = vector.broadcast %675 : vector<2x1xf32> to vector<2x5xf32>
    %678 = vector.broadcast %676 : vector<1x5xf32> to vector<2x5xf32>
    %679 = arith.addf %677, %678 : vector<2x5xf32>
    %680 = arith.cmpf ogt, %679, %672 : vector<2x5xf32>
    %681 = arith.select %680, %679, %672 : vector<2x5xi1>, vector<2x5xf32>
    %c4_i32_116 = arith.constant 4 : i32
    %682 = vector.broadcast %c4_i32_116 : i32 to vector<2x5xi32>
    %683 = arith.select %680, %682, %674 : vector<2x5xi1>, vector<2x5xi32>
    %684 = arith.addf %681, %580 : vector<2x5xf32>
    %685 = vector.extract_strided_slice %684 {offsets = [0, 0], sizes = [2, 1], strides = [1, 1]} : vector<2x5xf32> to vector<2x1xf32>
    %686 = vector.extract_strided_slice %571 {offsets = [0, 0], sizes = [1, 5], strides = [1, 1]} : vector<5x5xf32> to vector<1x5xf32>
    %687 = vector.broadcast %685 : vector<2x1xf32> to vector<2x5xf32>
    %688 = vector.broadcast %686 : vector<1x5xf32> to vector<2x5xf32>
    %689 = arith.addf %687, %688 : vector<2x5xf32>
    %c0_i32_117 = arith.constant 0 : i32
    %690 = vector.broadcast %c0_i32_117 : i32 to vector<2x5xi32>
    %691 = vector.extract_strided_slice %684 {offsets = [0, 1], sizes = [2, 1], strides = [1, 1]} : vector<2x5xf32> to vector<2x1xf32>
    %692 = vector.extract_strided_slice %571 {offsets = [1, 0], sizes = [1, 5], strides = [1, 1]} : vector<5x5xf32> to vector<1x5xf32>
    %693 = vector.broadcast %691 : vector<2x1xf32> to vector<2x5xf32>
    %694 = vector.broadcast %692 : vector<1x5xf32> to vector<2x5xf32>
    %695 = arith.addf %693, %694 : vector<2x5xf32>
    %696 = arith.cmpf ogt, %695, %689 : vector<2x5xf32>
    %697 = arith.select %696, %695, %689 : vector<2x5xi1>, vector<2x5xf32>
    %c1_i32_118 = arith.constant 1 : i32
    %698 = vector.broadcast %c1_i32_118 : i32 to vector<2x5xi32>
    %699 = arith.select %696, %698, %690 : vector<2x5xi1>, vector<2x5xi32>
    %700 = vector.extract_strided_slice %684 {offsets = [0, 2], sizes = [2, 1], strides = [1, 1]} : vector<2x5xf32> to vector<2x1xf32>
    %701 = vector.extract_strided_slice %571 {offsets = [2, 0], sizes = [1, 5], strides = [1, 1]} : vector<5x5xf32> to vector<1x5xf32>
    %702 = vector.broadcast %700 : vector<2x1xf32> to vector<2x5xf32>
    %703 = vector.broadcast %701 : vector<1x5xf32> to vector<2x5xf32>
    %704 = arith.addf %702, %703 : vector<2x5xf32>
    %705 = arith.cmpf ogt, %704, %697 : vector<2x5xf32>
    %706 = arith.select %705, %704, %697 : vector<2x5xi1>, vector<2x5xf32>
    %c2_i32_119 = arith.constant 2 : i32
    %707 = vector.broadcast %c2_i32_119 : i32 to vector<2x5xi32>
    %708 = arith.select %705, %707, %699 : vector<2x5xi1>, vector<2x5xi32>
    %709 = vector.extract_strided_slice %684 {offsets = [0, 3], sizes = [2, 1], strides = [1, 1]} : vector<2x5xf32> to vector<2x1xf32>
    %710 = vector.extract_strided_slice %571 {offsets = [3, 0], sizes = [1, 5], strides = [1, 1]} : vector<5x5xf32> to vector<1x5xf32>
    %711 = vector.broadcast %709 : vector<2x1xf32> to vector<2x5xf32>
    %712 = vector.broadcast %710 : vector<1x5xf32> to vector<2x5xf32>
    %713 = arith.addf %711, %712 : vector<2x5xf32>
    %714 = arith.cmpf ogt, %713, %706 : vector<2x5xf32>
    %715 = arith.select %714, %713, %706 : vector<2x5xi1>, vector<2x5xf32>
    %c3_i32_120 = arith.constant 3 : i32
    %716 = vector.broadcast %c3_i32_120 : i32 to vector<2x5xi32>
    %717 = arith.select %714, %716, %708 : vector<2x5xi1>, vector<2x5xi32>
    %718 = vector.extract_strided_slice %684 {offsets = [0, 4], sizes = [2, 1], strides = [1, 1]} : vector<2x5xf32> to vector<2x1xf32>
    %719 = vector.extract_strided_slice %571 {offsets = [4, 0], sizes = [1, 5], strides = [1, 1]} : vector<5x5xf32> to vector<1x5xf32>
    %720 = vector.broadcast %718 : vector<2x1xf32> to vector<2x5xf32>
    %721 = vector.broadcast %719 : vector<1x5xf32> to vector<2x5xf32>
    %722 = arith.addf %720, %721 : vector<2x5xf32>
    %723 = arith.cmpf ogt, %722, %715 : vector<2x5xf32>
    %724 = arith.select %723, %722, %715 : vector<2x5xi1>, vector<2x5xf32>
    %c4_i32_121 = arith.constant 4 : i32
    %725 = vector.broadcast %c4_i32_121 : i32 to vector<2x5xi32>
    %726 = arith.select %723, %725, %717 : vector<2x5xi1>, vector<2x5xi32>
    %727 = arith.addf %724, %583 : vector<2x5xf32>
    %728 = vector.extract_strided_slice %727 {offsets = [0, 0], sizes = [2, 1], strides = [1, 1]} : vector<2x5xf32> to vector<2x1xf32>
    %729 = vector.extract_strided_slice %571 {offsets = [0, 0], sizes = [1, 5], strides = [1, 1]} : vector<5x5xf32> to vector<1x5xf32>
    %730 = vector.broadcast %728 : vector<2x1xf32> to vector<2x5xf32>
    %731 = vector.broadcast %729 : vector<1x5xf32> to vector<2x5xf32>
    %732 = arith.addf %730, %731 : vector<2x5xf32>
    %c0_i32_122 = arith.constant 0 : i32
    %733 = vector.broadcast %c0_i32_122 : i32 to vector<2x5xi32>
    %734 = vector.extract_strided_slice %727 {offsets = [0, 1], sizes = [2, 1], strides = [1, 1]} : vector<2x5xf32> to vector<2x1xf32>
    %735 = vector.extract_strided_slice %571 {offsets = [1, 0], sizes = [1, 5], strides = [1, 1]} : vector<5x5xf32> to vector<1x5xf32>
    %736 = vector.broadcast %734 : vector<2x1xf32> to vector<2x5xf32>
    %737 = vector.broadcast %735 : vector<1x5xf32> to vector<2x5xf32>
    %738 = arith.addf %736, %737 : vector<2x5xf32>
    %739 = arith.cmpf ogt, %738, %732 : vector<2x5xf32>
    %740 = arith.select %739, %738, %732 : vector<2x5xi1>, vector<2x5xf32>
    %c1_i32_123 = arith.constant 1 : i32
    %741 = vector.broadcast %c1_i32_123 : i32 to vector<2x5xi32>
    %742 = arith.select %739, %741, %733 : vector<2x5xi1>, vector<2x5xi32>
    %743 = vector.extract_strided_slice %727 {offsets = [0, 2], sizes = [2, 1], strides = [1, 1]} : vector<2x5xf32> to vector<2x1xf32>
    %744 = vector.extract_strided_slice %571 {offsets = [2, 0], sizes = [1, 5], strides = [1, 1]} : vector<5x5xf32> to vector<1x5xf32>
    %745 = vector.broadcast %743 : vector<2x1xf32> to vector<2x5xf32>
    %746 = vector.broadcast %744 : vector<1x5xf32> to vector<2x5xf32>
    %747 = arith.addf %745, %746 : vector<2x5xf32>
    %748 = arith.cmpf ogt, %747, %740 : vector<2x5xf32>
    %749 = arith.select %748, %747, %740 : vector<2x5xi1>, vector<2x5xf32>
    %c2_i32_124 = arith.constant 2 : i32
    %750 = vector.broadcast %c2_i32_124 : i32 to vector<2x5xi32>
    %751 = arith.select %748, %750, %742 : vector<2x5xi1>, vector<2x5xi32>
    %752 = vector.extract_strided_slice %727 {offsets = [0, 3], sizes = [2, 1], strides = [1, 1]} : vector<2x5xf32> to vector<2x1xf32>
    %753 = vector.extract_strided_slice %571 {offsets = [3, 0], sizes = [1, 5], strides = [1, 1]} : vector<5x5xf32> to vector<1x5xf32>
    %754 = vector.broadcast %752 : vector<2x1xf32> to vector<2x5xf32>
    %755 = vector.broadcast %753 : vector<1x5xf32> to vector<2x5xf32>
    %756 = arith.addf %754, %755 : vector<2x5xf32>
    %757 = arith.cmpf ogt, %756, %749 : vector<2x5xf32>
    %758 = arith.select %757, %756, %749 : vector<2x5xi1>, vector<2x5xf32>
    %c3_i32_125 = arith.constant 3 : i32
    %759 = vector.broadcast %c3_i32_125 : i32 to vector<2x5xi32>
    %760 = arith.select %757, %759, %751 : vector<2x5xi1>, vector<2x5xi32>
    %761 = vector.extract_strided_slice %727 {offsets = [0, 4], sizes = [2, 1], strides = [1, 1]} : vector<2x5xf32> to vector<2x1xf32>
    %762 = vector.extract_strided_slice %571 {offsets = [4, 0], sizes = [1, 5], strides = [1, 1]} : vector<5x5xf32> to vector<1x5xf32>
    %763 = vector.broadcast %761 : vector<2x1xf32> to vector<2x5xf32>
    %764 = vector.broadcast %762 : vector<1x5xf32> to vector<2x5xf32>
    %765 = arith.addf %763, %764 : vector<2x5xf32>
    %766 = arith.cmpf ogt, %765, %758 : vector<2x5xf32>
    %767 = arith.select %766, %765, %758 : vector<2x5xi1>, vector<2x5xf32>
    %c4_i32_126 = arith.constant 4 : i32
    %768 = vector.broadcast %c4_i32_126 : i32 to vector<2x5xi32>
    %769 = arith.select %766, %768, %760 : vector<2x5xi1>, vector<2x5xi32>
    %770 = arith.addf %767, %586 : vector<2x5xf32>
    %771 = vector.extract_strided_slice %770 {offsets = [0, 0], sizes = [2, 1], strides = [1, 1]} : vector<2x5xf32> to vector<2x1xf32>
    %772 = vector.extract_strided_slice %571 {offsets = [0, 0], sizes = [1, 5], strides = [1, 1]} : vector<5x5xf32> to vector<1x5xf32>
    %773 = vector.broadcast %771 : vector<2x1xf32> to vector<2x5xf32>
    %774 = vector.broadcast %772 : vector<1x5xf32> to vector<2x5xf32>
    %775 = arith.addf %773, %774 : vector<2x5xf32>
    %c0_i32_127 = arith.constant 0 : i32
    %776 = vector.broadcast %c0_i32_127 : i32 to vector<2x5xi32>
    %777 = vector.extract_strided_slice %770 {offsets = [0, 1], sizes = [2, 1], strides = [1, 1]} : vector<2x5xf32> to vector<2x1xf32>
    %778 = vector.extract_strided_slice %571 {offsets = [1, 0], sizes = [1, 5], strides = [1, 1]} : vector<5x5xf32> to vector<1x5xf32>
    %779 = vector.broadcast %777 : vector<2x1xf32> to vector<2x5xf32>
    %780 = vector.broadcast %778 : vector<1x5xf32> to vector<2x5xf32>
    %781 = arith.addf %779, %780 : vector<2x5xf32>
    %782 = arith.cmpf ogt, %781, %775 : vector<2x5xf32>
    %783 = arith.select %782, %781, %775 : vector<2x5xi1>, vector<2x5xf32>
    %c1_i32_128 = arith.constant 1 : i32
    %784 = vector.broadcast %c1_i32_128 : i32 to vector<2x5xi32>
    %785 = arith.select %782, %784, %776 : vector<2x5xi1>, vector<2x5xi32>
    %786 = vector.extract_strided_slice %770 {offsets = [0, 2], sizes = [2, 1], strides = [1, 1]} : vector<2x5xf32> to vector<2x1xf32>
    %787 = vector.extract_strided_slice %571 {offsets = [2, 0], sizes = [1, 5], strides = [1, 1]} : vector<5x5xf32> to vector<1x5xf32>
    %788 = vector.broadcast %786 : vector<2x1xf32> to vector<2x5xf32>
    %789 = vector.broadcast %787 : vector<1x5xf32> to vector<2x5xf32>
    %790 = arith.addf %788, %789 : vector<2x5xf32>
    %791 = arith.cmpf ogt, %790, %783 : vector<2x5xf32>
    %792 = arith.select %791, %790, %783 : vector<2x5xi1>, vector<2x5xf32>
    %c2_i32_129 = arith.constant 2 : i32
    %793 = vector.broadcast %c2_i32_129 : i32 to vector<2x5xi32>
    %794 = arith.select %791, %793, %785 : vector<2x5xi1>, vector<2x5xi32>
    %795 = vector.extract_strided_slice %770 {offsets = [0, 3], sizes = [2, 1], strides = [1, 1]} : vector<2x5xf32> to vector<2x1xf32>
    %796 = vector.extract_strided_slice %571 {offsets = [3, 0], sizes = [1, 5], strides = [1, 1]} : vector<5x5xf32> to vector<1x5xf32>
    %797 = vector.broadcast %795 : vector<2x1xf32> to vector<2x5xf32>
    %798 = vector.broadcast %796 : vector<1x5xf32> to vector<2x5xf32>
    %799 = arith.addf %797, %798 : vector<2x5xf32>
    %800 = arith.cmpf ogt, %799, %792 : vector<2x5xf32>
    %801 = arith.select %800, %799, %792 : vector<2x5xi1>, vector<2x5xf32>
    %c3_i32_130 = arith.constant 3 : i32
    %802 = vector.broadcast %c3_i32_130 : i32 to vector<2x5xi32>
    %803 = arith.select %800, %802, %794 : vector<2x5xi1>, vector<2x5xi32>
    %804 = vector.extract_strided_slice %770 {offsets = [0, 4], sizes = [2, 1], strides = [1, 1]} : vector<2x5xf32> to vector<2x1xf32>
    %805 = vector.extract_strided_slice %571 {offsets = [4, 0], sizes = [1, 5], strides = [1, 1]} : vector<5x5xf32> to vector<1x5xf32>
    %806 = vector.broadcast %804 : vector<2x1xf32> to vector<2x5xf32>
    %807 = vector.broadcast %805 : vector<1x5xf32> to vector<2x5xf32>
    %808 = arith.addf %806, %807 : vector<2x5xf32>
    %809 = arith.cmpf ogt, %808, %801 : vector<2x5xf32>
    %810 = arith.select %809, %808, %801 : vector<2x5xi1>, vector<2x5xf32>
    %c4_i32_131 = arith.constant 4 : i32
    %811 = vector.broadcast %c4_i32_131 : i32 to vector<2x5xi32>
    %812 = arith.select %809, %811, %803 : vector<2x5xi1>, vector<2x5xi32>
    %813 = arith.addf %810, %589 : vector<2x5xf32>
    %814 = vector.extract_strided_slice %813 {offsets = [0, 0], sizes = [2, 1], strides = [1, 1]} : vector<2x5xf32> to vector<2x1xf32>
    %815 = vector.extract_strided_slice %571 {offsets = [0, 0], sizes = [1, 5], strides = [1, 1]} : vector<5x5xf32> to vector<1x5xf32>
    %816 = vector.broadcast %814 : vector<2x1xf32> to vector<2x5xf32>
    %817 = vector.broadcast %815 : vector<1x5xf32> to vector<2x5xf32>
    %818 = arith.addf %816, %817 : vector<2x5xf32>
    %c0_i32_132 = arith.constant 0 : i32
    %819 = vector.broadcast %c0_i32_132 : i32 to vector<2x5xi32>
    %820 = vector.extract_strided_slice %813 {offsets = [0, 1], sizes = [2, 1], strides = [1, 1]} : vector<2x5xf32> to vector<2x1xf32>
    %821 = vector.extract_strided_slice %571 {offsets = [1, 0], sizes = [1, 5], strides = [1, 1]} : vector<5x5xf32> to vector<1x5xf32>
    %822 = vector.broadcast %820 : vector<2x1xf32> to vector<2x5xf32>
    %823 = vector.broadcast %821 : vector<1x5xf32> to vector<2x5xf32>
    %824 = arith.addf %822, %823 : vector<2x5xf32>
    %825 = arith.cmpf ogt, %824, %818 : vector<2x5xf32>
    %826 = arith.select %825, %824, %818 : vector<2x5xi1>, vector<2x5xf32>
    %c1_i32_133 = arith.constant 1 : i32
    %827 = vector.broadcast %c1_i32_133 : i32 to vector<2x5xi32>
    %828 = arith.select %825, %827, %819 : vector<2x5xi1>, vector<2x5xi32>
    %829 = vector.extract_strided_slice %813 {offsets = [0, 2], sizes = [2, 1], strides = [1, 1]} : vector<2x5xf32> to vector<2x1xf32>
    %830 = vector.extract_strided_slice %571 {offsets = [2, 0], sizes = [1, 5], strides = [1, 1]} : vector<5x5xf32> to vector<1x5xf32>
    %831 = vector.broadcast %829 : vector<2x1xf32> to vector<2x5xf32>
    %832 = vector.broadcast %830 : vector<1x5xf32> to vector<2x5xf32>
    %833 = arith.addf %831, %832 : vector<2x5xf32>
    %834 = arith.cmpf ogt, %833, %826 : vector<2x5xf32>
    %835 = arith.select %834, %833, %826 : vector<2x5xi1>, vector<2x5xf32>
    %c2_i32_134 = arith.constant 2 : i32
    %836 = vector.broadcast %c2_i32_134 : i32 to vector<2x5xi32>
    %837 = arith.select %834, %836, %828 : vector<2x5xi1>, vector<2x5xi32>
    %838 = vector.extract_strided_slice %813 {offsets = [0, 3], sizes = [2, 1], strides = [1, 1]} : vector<2x5xf32> to vector<2x1xf32>
    %839 = vector.extract_strided_slice %571 {offsets = [3, 0], sizes = [1, 5], strides = [1, 1]} : vector<5x5xf32> to vector<1x5xf32>
    %840 = vector.broadcast %838 : vector<2x1xf32> to vector<2x5xf32>
    %841 = vector.broadcast %839 : vector<1x5xf32> to vector<2x5xf32>
    %842 = arith.addf %840, %841 : vector<2x5xf32>
    %843 = arith.cmpf ogt, %842, %835 : vector<2x5xf32>
    %844 = arith.select %843, %842, %835 : vector<2x5xi1>, vector<2x5xf32>
    %c3_i32_135 = arith.constant 3 : i32
    %845 = vector.broadcast %c3_i32_135 : i32 to vector<2x5xi32>
    %846 = arith.select %843, %845, %837 : vector<2x5xi1>, vector<2x5xi32>
    %847 = vector.extract_strided_slice %813 {offsets = [0, 4], sizes = [2, 1], strides = [1, 1]} : vector<2x5xf32> to vector<2x1xf32>
    %848 = vector.extract_strided_slice %571 {offsets = [4, 0], sizes = [1, 5], strides = [1, 1]} : vector<5x5xf32> to vector<1x5xf32>
    %849 = vector.broadcast %847 : vector<2x1xf32> to vector<2x5xf32>
    %850 = vector.broadcast %848 : vector<1x5xf32> to vector<2x5xf32>
    %851 = arith.addf %849, %850 : vector<2x5xf32>
    %852 = arith.cmpf ogt, %851, %844 : vector<2x5xf32>
    %853 = arith.select %852, %851, %844 : vector<2x5xi1>, vector<2x5xf32>
    %c4_i32_136 = arith.constant 4 : i32
    %854 = vector.broadcast %c4_i32_136 : i32 to vector<2x5xi32>
    %855 = arith.select %852, %854, %846 : vector<2x5xi1>, vector<2x5xi32>
    %856 = arith.addf %853, %592 : vector<2x5xf32>
    %857 = vector.extract_strided_slice %856 {offsets = [0, 0], sizes = [2, 1], strides = [1, 1]} : vector<2x5xf32> to vector<2x1xf32>
    %858 = vector.extract_strided_slice %571 {offsets = [0, 0], sizes = [1, 5], strides = [1, 1]} : vector<5x5xf32> to vector<1x5xf32>
    %859 = vector.broadcast %857 : vector<2x1xf32> to vector<2x5xf32>
    %860 = vector.broadcast %858 : vector<1x5xf32> to vector<2x5xf32>
    %861 = arith.addf %859, %860 : vector<2x5xf32>
    %c0_i32_137 = arith.constant 0 : i32
    %862 = vector.broadcast %c0_i32_137 : i32 to vector<2x5xi32>
    %863 = vector.extract_strided_slice %856 {offsets = [0, 1], sizes = [2, 1], strides = [1, 1]} : vector<2x5xf32> to vector<2x1xf32>
    %864 = vector.extract_strided_slice %571 {offsets = [1, 0], sizes = [1, 5], strides = [1, 1]} : vector<5x5xf32> to vector<1x5xf32>
    %865 = vector.broadcast %863 : vector<2x1xf32> to vector<2x5xf32>
    %866 = vector.broadcast %864 : vector<1x5xf32> to vector<2x5xf32>
    %867 = arith.addf %865, %866 : vector<2x5xf32>
    %868 = arith.cmpf ogt, %867, %861 : vector<2x5xf32>
    %869 = arith.select %868, %867, %861 : vector<2x5xi1>, vector<2x5xf32>
    %c1_i32_138 = arith.constant 1 : i32
    %870 = vector.broadcast %c1_i32_138 : i32 to vector<2x5xi32>
    %871 = arith.select %868, %870, %862 : vector<2x5xi1>, vector<2x5xi32>
    %872 = vector.extract_strided_slice %856 {offsets = [0, 2], sizes = [2, 1], strides = [1, 1]} : vector<2x5xf32> to vector<2x1xf32>
    %873 = vector.extract_strided_slice %571 {offsets = [2, 0], sizes = [1, 5], strides = [1, 1]} : vector<5x5xf32> to vector<1x5xf32>
    %874 = vector.broadcast %872 : vector<2x1xf32> to vector<2x5xf32>
    %875 = vector.broadcast %873 : vector<1x5xf32> to vector<2x5xf32>
    %876 = arith.addf %874, %875 : vector<2x5xf32>
    %877 = arith.cmpf ogt, %876, %869 : vector<2x5xf32>
    %878 = arith.select %877, %876, %869 : vector<2x5xi1>, vector<2x5xf32>
    %c2_i32_139 = arith.constant 2 : i32
    %879 = vector.broadcast %c2_i32_139 : i32 to vector<2x5xi32>
    %880 = arith.select %877, %879, %871 : vector<2x5xi1>, vector<2x5xi32>
    %881 = vector.extract_strided_slice %856 {offsets = [0, 3], sizes = [2, 1], strides = [1, 1]} : vector<2x5xf32> to vector<2x1xf32>
    %882 = vector.extract_strided_slice %571 {offsets = [3, 0], sizes = [1, 5], strides = [1, 1]} : vector<5x5xf32> to vector<1x5xf32>
    %883 = vector.broadcast %881 : vector<2x1xf32> to vector<2x5xf32>
    %884 = vector.broadcast %882 : vector<1x5xf32> to vector<2x5xf32>
    %885 = arith.addf %883, %884 : vector<2x5xf32>
    %886 = arith.cmpf ogt, %885, %878 : vector<2x5xf32>
    %887 = arith.select %886, %885, %878 : vector<2x5xi1>, vector<2x5xf32>
    %c3_i32_140 = arith.constant 3 : i32
    %888 = vector.broadcast %c3_i32_140 : i32 to vector<2x5xi32>
    %889 = arith.select %886, %888, %880 : vector<2x5xi1>, vector<2x5xi32>
    %890 = vector.extract_strided_slice %856 {offsets = [0, 4], sizes = [2, 1], strides = [1, 1]} : vector<2x5xf32> to vector<2x1xf32>
    %891 = vector.extract_strided_slice %571 {offsets = [4, 0], sizes = [1, 5], strides = [1, 1]} : vector<5x5xf32> to vector<1x5xf32>
    %892 = vector.broadcast %890 : vector<2x1xf32> to vector<2x5xf32>
    %893 = vector.broadcast %891 : vector<1x5xf32> to vector<2x5xf32>
    %894 = arith.addf %892, %893 : vector<2x5xf32>
    %895 = arith.cmpf ogt, %894, %887 : vector<2x5xf32>
    %896 = arith.select %895, %894, %887 : vector<2x5xi1>, vector<2x5xf32>
    %c4_i32_141 = arith.constant 4 : i32
    %897 = vector.broadcast %c4_i32_141 : i32 to vector<2x5xi32>
    %898 = arith.select %895, %897, %889 : vector<2x5xi1>, vector<2x5xi32>
    %899 = arith.addf %896, %595 : vector<2x5xf32>
    %c0_142 = arith.constant 0 : index
    %c0_143 = arith.constant 0 : index
    %900 = vector.load %arg15[%c0_142, %c0_143] : memref<1x5xf32, #tpu.memory_space<vmem>>, vector<1x5xf32>
    %901 = vector.broadcast %900 : vector<1x5xf32> to vector<2x5xf32>
    %902 = arith.addf %899, %901 : vector<2x5xf32>
    %903 = vector.extract_strided_slice %902 {offsets = [0, 0], sizes = [2, 1], strides = [1, 1]} : vector<2x5xf32> to vector<2x1xf32>
    %c0_i32_144 = arith.constant 0 : i32
    %904 = vector.broadcast %c0_i32_144 : i32 to vector<2x1xi32>
    %905 = vector.extract_strided_slice %902 {offsets = [0, 1], sizes = [2, 1], strides = [1, 1]} : vector<2x5xf32> to vector<2x1xf32>
    %906 = arith.cmpf ogt, %905, %903 : vector<2x1xf32>
    %907 = vector.extract_strided_slice %902 {offsets = [0, 1], sizes = [2, 1], strides = [1, 1]} : vector<2x5xf32> to vector<2x1xf32>
    %908 = arith.select %906, %907, %903 : vector<2x1xi1>, vector<2x1xf32>
    %c1_i32_145 = arith.constant 1 : i32
    %909 = vector.broadcast %c1_i32_145 : i32 to vector<2x1xi32>
    %910 = arith.select %906, %909, %904 : vector<2x1xi1>, vector<2x1xi32>
    %911 = vector.extract_strided_slice %902 {offsets = [0, 2], sizes = [2, 1], strides = [1, 1]} : vector<2x5xf32> to vector<2x1xf32>
    %912 = arith.cmpf ogt, %911, %908 : vector<2x1xf32>
    %913 = vector.extract_strided_slice %902 {offsets = [0, 2], sizes = [2, 1], strides = [1, 1]} : vector<2x5xf32> to vector<2x1xf32>
    %914 = arith.select %912, %913, %908 : vector<2x1xi1>, vector<2x1xf32>
    %c2_i32_146 = arith.constant 2 : i32
    %915 = vector.broadcast %c2_i32_146 : i32 to vector<2x1xi32>
    %916 = arith.select %912, %915, %910 : vector<2x1xi1>, vector<2x1xi32>
    %917 = vector.extract_strided_slice %902 {offsets = [0, 3], sizes = [2, 1], strides = [1, 1]} : vector<2x5xf32> to vector<2x1xf32>
    %918 = arith.cmpf ogt, %917, %914 : vector<2x1xf32>
    %919 = vector.extract_strided_slice %902 {offsets = [0, 3], sizes = [2, 1], strides = [1, 1]} : vector<2x5xf32> to vector<2x1xf32>
    %920 = arith.select %918, %919, %914 : vector<2x1xi1>, vector<2x1xf32>
    %c3_i32_147 = arith.constant 3 : i32
    %921 = vector.broadcast %c3_i32_147 : i32 to vector<2x1xi32>
    %922 = arith.select %918, %921, %916 : vector<2x1xi1>, vector<2x1xi32>
    %923 = vector.extract_strided_slice %902 {offsets = [0, 4], sizes = [2, 1], strides = [1, 1]} : vector<2x5xf32> to vector<2x1xf32>
    %924 = arith.cmpf ogt, %923, %920 : vector<2x1xf32>
    %c4_i32_148 = arith.constant 4 : i32
    %925 = vector.broadcast %c4_i32_148 : i32 to vector<2x1xi32>
    %926 = arith.select %924, %925, %922 : vector<2x1xi1>, vector<2x1xi32>
    %c0_i32_149 = arith.constant 0 : i32
    %927 = vector.broadcast %c0_i32_149 : i32 to vector<2x1xi32>
    %c0_i32_150 = arith.constant 0 : i32
    %928 = vector.broadcast %c0_i32_150 : i32 to vector<2x1xi32>
    %929 = arith.cmpi eq, %926, %928 : vector<2x1xi32>
    %930 = vector.extract_strided_slice %898 {offsets = [0, 0], sizes = [2, 1], strides = [1, 1]} : vector<2x5xi32> to vector<2x1xi32>
    %931 = arith.select %929, %930, %927 : vector<2x1xi1>, vector<2x1xi32>
    %c1_i32_151 = arith.constant 1 : i32
    %932 = vector.broadcast %c1_i32_151 : i32 to vector<2x1xi32>
    %933 = arith.cmpi eq, %926, %932 : vector<2x1xi32>
    %934 = vector.extract_strided_slice %898 {offsets = [0, 1], sizes = [2, 1], strides = [1, 1]} : vector<2x5xi32> to vector<2x1xi32>
    %935 = arith.select %933, %934, %931 : vector<2x1xi1>, vector<2x1xi32>
    %c2_i32_152 = arith.constant 2 : i32
    %936 = vector.broadcast %c2_i32_152 : i32 to vector<2x1xi32>
    %937 = arith.cmpi eq, %926, %936 : vector<2x1xi32>
    %938 = vector.extract_strided_slice %898 {offsets = [0, 2], sizes = [2, 1], strides = [1, 1]} : vector<2x5xi32> to vector<2x1xi32>
    %939 = arith.select %937, %938, %935 : vector<2x1xi1>, vector<2x1xi32>
    %c3_i32_153 = arith.constant 3 : i32
    %940 = vector.broadcast %c3_i32_153 : i32 to vector<2x1xi32>
    %941 = arith.cmpi eq, %926, %940 : vector<2x1xi32>
    %942 = vector.extract_strided_slice %898 {offsets = [0, 3], sizes = [2, 1], strides = [1, 1]} : vector<2x5xi32> to vector<2x1xi32>
    %943 = arith.select %941, %942, %939 : vector<2x1xi1>, vector<2x1xi32>
    %c4_i32_154 = arith.constant 4 : i32
    %944 = vector.broadcast %c4_i32_154 : i32 to vector<2x1xi32>
    %945 = arith.cmpi eq, %926, %944 : vector<2x1xi32>
    %946 = vector.extract_strided_slice %898 {offsets = [0, 4], sizes = [2, 1], strides = [1, 1]} : vector<2x5xi32> to vector<2x1xi32>
    %947 = arith.select %945, %946, %943 : vector<2x1xi1>, vector<2x1xi32>
    %c0_i32_155 = arith.constant 0 : i32
    %948 = vector.broadcast %c0_i32_155 : i32 to vector<2x1xi32>
    %c0_i32_156 = arith.constant 0 : i32
    %949 = vector.broadcast %c0_i32_156 : i32 to vector<2x1xi32>
    %950 = arith.cmpi eq, %947, %949 : vector<2x1xi32>
    %951 = vector.extract_strided_slice %855 {offsets = [0, 0], sizes = [2, 1], strides = [1, 1]} : vector<2x5xi32> to vector<2x1xi32>
    %952 = arith.select %950, %951, %948 : vector<2x1xi1>, vector<2x1xi32>
    %c1_i32_157 = arith.constant 1 : i32
    %953 = vector.broadcast %c1_i32_157 : i32 to vector<2x1xi32>
    %954 = arith.cmpi eq, %947, %953 : vector<2x1xi32>
    %955 = vector.extract_strided_slice %855 {offsets = [0, 1], sizes = [2, 1], strides = [1, 1]} : vector<2x5xi32> to vector<2x1xi32>
    %956 = arith.select %954, %955, %952 : vector<2x1xi1>, vector<2x1xi32>
    %c2_i32_158 = arith.constant 2 : i32
    %957 = vector.broadcast %c2_i32_158 : i32 to vector<2x1xi32>
    %958 = arith.cmpi eq, %947, %957 : vector<2x1xi32>
    %959 = vector.extract_strided_slice %855 {offsets = [0, 2], sizes = [2, 1], strides = [1, 1]} : vector<2x5xi32> to vector<2x1xi32>
    %960 = arith.select %958, %959, %956 : vector<2x1xi1>, vector<2x1xi32>
    %c3_i32_159 = arith.constant 3 : i32
    %961 = vector.broadcast %c3_i32_159 : i32 to vector<2x1xi32>
    %962 = arith.cmpi eq, %947, %961 : vector<2x1xi32>
    %963 = vector.extract_strided_slice %855 {offsets = [0, 3], sizes = [2, 1], strides = [1, 1]} : vector<2x5xi32> to vector<2x1xi32>
    %964 = arith.select %962, %963, %960 : vector<2x1xi1>, vector<2x1xi32>
    %c4_i32_160 = arith.constant 4 : i32
    %965 = vector.broadcast %c4_i32_160 : i32 to vector<2x1xi32>
    %966 = arith.cmpi eq, %947, %965 : vector<2x1xi32>
    %967 = vector.extract_strided_slice %855 {offsets = [0, 4], sizes = [2, 1], strides = [1, 1]} : vector<2x5xi32> to vector<2x1xi32>
    %968 = arith.select %966, %967, %964 : vector<2x1xi1>, vector<2x1xi32>
    %c0_i32_161 = arith.constant 0 : i32
    %969 = vector.broadcast %c0_i32_161 : i32 to vector<2x1xi32>
    %c0_i32_162 = arith.constant 0 : i32
    %970 = vector.broadcast %c0_i32_162 : i32 to vector<2x1xi32>
    %971 = arith.cmpi eq, %968, %970 : vector<2x1xi32>
    %972 = vector.extract_strided_slice %812 {offsets = [0, 0], sizes = [2, 1], strides = [1, 1]} : vector<2x5xi32> to vector<2x1xi32>
    %973 = arith.select %971, %972, %969 : vector<2x1xi1>, vector<2x1xi32>
    %c1_i32_163 = arith.constant 1 : i32
    %974 = vector.broadcast %c1_i32_163 : i32 to vector<2x1xi32>
    %975 = arith.cmpi eq, %968, %974 : vector<2x1xi32>
    %976 = vector.extract_strided_slice %812 {offsets = [0, 1], sizes = [2, 1], strides = [1, 1]} : vector<2x5xi32> to vector<2x1xi32>
    %977 = arith.select %975, %976, %973 : vector<2x1xi1>, vector<2x1xi32>
    %c2_i32_164 = arith.constant 2 : i32
    %978 = vector.broadcast %c2_i32_164 : i32 to vector<2x1xi32>
    %979 = arith.cmpi eq, %968, %978 : vector<2x1xi32>
    %980 = vector.extract_strided_slice %812 {offsets = [0, 2], sizes = [2, 1], strides = [1, 1]} : vector<2x5xi32> to vector<2x1xi32>
    %981 = arith.select %979, %980, %977 : vector<2x1xi1>, vector<2x1xi32>
    %c3_i32_165 = arith.constant 3 : i32
    %982 = vector.broadcast %c3_i32_165 : i32 to vector<2x1xi32>
    %983 = arith.cmpi eq, %968, %982 : vector<2x1xi32>
    %984 = vector.extract_strided_slice %812 {offsets = [0, 3], sizes = [2, 1], strides = [1, 1]} : vector<2x5xi32> to vector<2x1xi32>
    %985 = arith.select %983, %984, %981 : vector<2x1xi1>, vector<2x1xi32>
    %c4_i32_166 = arith.constant 4 : i32
    %986 = vector.broadcast %c4_i32_166 : i32 to vector<2x1xi32>
    %987 = arith.cmpi eq, %968, %986 : vector<2x1xi32>
    %988 = vector.extract_strided_slice %812 {offsets = [0, 4], sizes = [2, 1], strides = [1, 1]} : vector<2x5xi32> to vector<2x1xi32>
    %989 = arith.select %987, %988, %985 : vector<2x1xi1>, vector<2x1xi32>
    %c0_i32_167 = arith.constant 0 : i32
    %990 = vector.broadcast %c0_i32_167 : i32 to vector<2x1xi32>
    %c0_i32_168 = arith.constant 0 : i32
    %991 = vector.broadcast %c0_i32_168 : i32 to vector<2x1xi32>
    %992 = arith.cmpi eq, %989, %991 : vector<2x1xi32>
    %993 = vector.extract_strided_slice %769 {offsets = [0, 0], sizes = [2, 1], strides = [1, 1]} : vector<2x5xi32> to vector<2x1xi32>
    %994 = arith.select %992, %993, %990 : vector<2x1xi1>, vector<2x1xi32>
    %c1_i32_169 = arith.constant 1 : i32
    %995 = vector.broadcast %c1_i32_169 : i32 to vector<2x1xi32>
    %996 = arith.cmpi eq, %989, %995 : vector<2x1xi32>
    %997 = vector.extract_strided_slice %769 {offsets = [0, 1], sizes = [2, 1], strides = [1, 1]} : vector<2x5xi32> to vector<2x1xi32>
    %998 = arith.select %996, %997, %994 : vector<2x1xi1>, vector<2x1xi32>
    %c2_i32_170 = arith.constant 2 : i32
    %999 = vector.broadcast %c2_i32_170 : i32 to vector<2x1xi32>
    %1000 = arith.cmpi eq, %989, %999 : vector<2x1xi32>
    %1001 = vector.extract_strided_slice %769 {offsets = [0, 2], sizes = [2, 1], strides = [1, 1]} : vector<2x5xi32> to vector<2x1xi32>
    %1002 = arith.select %1000, %1001, %998 : vector<2x1xi1>, vector<2x1xi32>
    %c3_i32_171 = arith.constant 3 : i32
    %1003 = vector.broadcast %c3_i32_171 : i32 to vector<2x1xi32>
    %1004 = arith.cmpi eq, %989, %1003 : vector<2x1xi32>
    %1005 = vector.extract_strided_slice %769 {offsets = [0, 3], sizes = [2, 1], strides = [1, 1]} : vector<2x5xi32> to vector<2x1xi32>
    %1006 = arith.select %1004, %1005, %1002 : vector<2x1xi1>, vector<2x1xi32>
    %c4_i32_172 = arith.constant 4 : i32
    %1007 = vector.broadcast %c4_i32_172 : i32 to vector<2x1xi32>
    %1008 = arith.cmpi eq, %989, %1007 : vector<2x1xi32>
    %1009 = vector.extract_strided_slice %769 {offsets = [0, 4], sizes = [2, 1], strides = [1, 1]} : vector<2x5xi32> to vector<2x1xi32>
    %1010 = arith.select %1008, %1009, %1006 : vector<2x1xi1>, vector<2x1xi32>
    %c0_i32_173 = arith.constant 0 : i32
    %1011 = vector.broadcast %c0_i32_173 : i32 to vector<2x1xi32>
    %c0_i32_174 = arith.constant 0 : i32
    %1012 = vector.broadcast %c0_i32_174 : i32 to vector<2x1xi32>
    %1013 = arith.cmpi eq, %1010, %1012 : vector<2x1xi32>
    %1014 = vector.extract_strided_slice %726 {offsets = [0, 0], sizes = [2, 1], strides = [1, 1]} : vector<2x5xi32> to vector<2x1xi32>
    %1015 = arith.select %1013, %1014, %1011 : vector<2x1xi1>, vector<2x1xi32>
    %c1_i32_175 = arith.constant 1 : i32
    %1016 = vector.broadcast %c1_i32_175 : i32 to vector<2x1xi32>
    %1017 = arith.cmpi eq, %1010, %1016 : vector<2x1xi32>
    %1018 = vector.extract_strided_slice %726 {offsets = [0, 1], sizes = [2, 1], strides = [1, 1]} : vector<2x5xi32> to vector<2x1xi32>
    %1019 = arith.select %1017, %1018, %1015 : vector<2x1xi1>, vector<2x1xi32>
    %c2_i32_176 = arith.constant 2 : i32
    %1020 = vector.broadcast %c2_i32_176 : i32 to vector<2x1xi32>
    %1021 = arith.cmpi eq, %1010, %1020 : vector<2x1xi32>
    %1022 = vector.extract_strided_slice %726 {offsets = [0, 2], sizes = [2, 1], strides = [1, 1]} : vector<2x5xi32> to vector<2x1xi32>
    %1023 = arith.select %1021, %1022, %1019 : vector<2x1xi1>, vector<2x1xi32>
    %c3_i32_177 = arith.constant 3 : i32
    %1024 = vector.broadcast %c3_i32_177 : i32 to vector<2x1xi32>
    %1025 = arith.cmpi eq, %1010, %1024 : vector<2x1xi32>
    %1026 = vector.extract_strided_slice %726 {offsets = [0, 3], sizes = [2, 1], strides = [1, 1]} : vector<2x5xi32> to vector<2x1xi32>
    %1027 = arith.select %1025, %1026, %1023 : vector<2x1xi1>, vector<2x1xi32>
    %c4_i32_178 = arith.constant 4 : i32
    %1028 = vector.broadcast %c4_i32_178 : i32 to vector<2x1xi32>
    %1029 = arith.cmpi eq, %1010, %1028 : vector<2x1xi32>
    %1030 = vector.extract_strided_slice %726 {offsets = [0, 4], sizes = [2, 1], strides = [1, 1]} : vector<2x5xi32> to vector<2x1xi32>
    %1031 = arith.select %1029, %1030, %1027 : vector<2x1xi1>, vector<2x1xi32>
    %c0_i32_179 = arith.constant 0 : i32
    %1032 = vector.broadcast %c0_i32_179 : i32 to vector<2x1xi32>
    %c0_i32_180 = arith.constant 0 : i32
    %1033 = vector.broadcast %c0_i32_180 : i32 to vector<2x1xi32>
    %1034 = arith.cmpi eq, %1031, %1033 : vector<2x1xi32>
    %1035 = vector.extract_strided_slice %683 {offsets = [0, 0], sizes = [2, 1], strides = [1, 1]} : vector<2x5xi32> to vector<2x1xi32>
    %1036 = arith.select %1034, %1035, %1032 : vector<2x1xi1>, vector<2x1xi32>
    %c1_i32_181 = arith.constant 1 : i32
    %1037 = vector.broadcast %c1_i32_181 : i32 to vector<2x1xi32>
    %1038 = arith.cmpi eq, %1031, %1037 : vector<2x1xi32>
    %1039 = vector.extract_strided_slice %683 {offsets = [0, 1], sizes = [2, 1], strides = [1, 1]} : vector<2x5xi32> to vector<2x1xi32>
    %1040 = arith.select %1038, %1039, %1036 : vector<2x1xi1>, vector<2x1xi32>
    %c2_i32_182 = arith.constant 2 : i32
    %1041 = vector.broadcast %c2_i32_182 : i32 to vector<2x1xi32>
    %1042 = arith.cmpi eq, %1031, %1041 : vector<2x1xi32>
    %1043 = vector.extract_strided_slice %683 {offsets = [0, 2], sizes = [2, 1], strides = [1, 1]} : vector<2x5xi32> to vector<2x1xi32>
    %1044 = arith.select %1042, %1043, %1040 : vector<2x1xi1>, vector<2x1xi32>
    %c3_i32_183 = arith.constant 3 : i32
    %1045 = vector.broadcast %c3_i32_183 : i32 to vector<2x1xi32>
    %1046 = arith.cmpi eq, %1031, %1045 : vector<2x1xi32>
    %1047 = vector.extract_strided_slice %683 {offsets = [0, 3], sizes = [2, 1], strides = [1, 1]} : vector<2x5xi32> to vector<2x1xi32>
    %1048 = arith.select %1046, %1047, %1044 : vector<2x1xi1>, vector<2x1xi32>
    %c4_i32_184 = arith.constant 4 : i32
    %1049 = vector.broadcast %c4_i32_184 : i32 to vector<2x1xi32>
    %1050 = arith.cmpi eq, %1031, %1049 : vector<2x1xi32>
    %1051 = vector.extract_strided_slice %683 {offsets = [0, 4], sizes = [2, 1], strides = [1, 1]} : vector<2x5xi32> to vector<2x1xi32>
    %1052 = arith.select %1050, %1051, %1048 : vector<2x1xi1>, vector<2x1xi32>
    %c0_i32_185 = arith.constant 0 : i32
    %1053 = vector.broadcast %c0_i32_185 : i32 to vector<2x1xi32>
    %c0_i32_186 = arith.constant 0 : i32
    %1054 = vector.broadcast %c0_i32_186 : i32 to vector<2x1xi32>
    %1055 = arith.cmpi eq, %1052, %1054 : vector<2x1xi32>
    %1056 = vector.extract_strided_slice %640 {offsets = [0, 0], sizes = [2, 1], strides = [1, 1]} : vector<2x5xi32> to vector<2x1xi32>
    %1057 = arith.select %1055, %1056, %1053 : vector<2x1xi1>, vector<2x1xi32>
    %c1_i32_187 = arith.constant 1 : i32
    %1058 = vector.broadcast %c1_i32_187 : i32 to vector<2x1xi32>
    %1059 = arith.cmpi eq, %1052, %1058 : vector<2x1xi32>
    %1060 = vector.extract_strided_slice %640 {offsets = [0, 1], sizes = [2, 1], strides = [1, 1]} : vector<2x5xi32> to vector<2x1xi32>
    %1061 = arith.select %1059, %1060, %1057 : vector<2x1xi1>, vector<2x1xi32>
    %c2_i32_188 = arith.constant 2 : i32
    %1062 = vector.broadcast %c2_i32_188 : i32 to vector<2x1xi32>
    %1063 = arith.cmpi eq, %1052, %1062 : vector<2x1xi32>
    %1064 = vector.extract_strided_slice %640 {offsets = [0, 2], sizes = [2, 1], strides = [1, 1]} : vector<2x5xi32> to vector<2x1xi32>
    %1065 = arith.select %1063, %1064, %1061 : vector<2x1xi1>, vector<2x1xi32>
    %c3_i32_189 = arith.constant 3 : i32
    %1066 = vector.broadcast %c3_i32_189 : i32 to vector<2x1xi32>
    %1067 = arith.cmpi eq, %1052, %1066 : vector<2x1xi32>
    %1068 = vector.extract_strided_slice %640 {offsets = [0, 3], sizes = [2, 1], strides = [1, 1]} : vector<2x5xi32> to vector<2x1xi32>
    %1069 = arith.select %1067, %1068, %1065 : vector<2x1xi1>, vector<2x1xi32>
    %c4_i32_190 = arith.constant 4 : i32
    %1070 = vector.broadcast %c4_i32_190 : i32 to vector<2x1xi32>
    %1071 = arith.cmpi eq, %1052, %1070 : vector<2x1xi32>
    %1072 = vector.extract_strided_slice %640 {offsets = [0, 4], sizes = [2, 1], strides = [1, 1]} : vector<2x5xi32> to vector<2x1xi32>
    %1073 = arith.select %1071, %1072, %1069 : vector<2x1xi1>, vector<2x1xi32>
    %1074 = tpu.iota {dimensions = array<i32: 1>} : vector<2x8xi32>
    %c0_i32_191 = arith.constant 0 : i32
    %1075 = vector.broadcast %c0_i32_191 : i32 to vector<2x8xi32>
    %c0_i32_192 = arith.constant 0 : i32
    %1076 = vector.broadcast %c0_i32_192 : i32 to vector<2x8xi32>
    %1077 = arith.cmpi eq, %1074, %1076 : vector<2x8xi32>
    %1078 = vector.shape_cast %1073 : vector<2x1xi32> to vector<2x1xi32>
    %1079 = vector.broadcast %1078 : vector<2x1xi32> to vector<2x8xi32>
    %1080 = arith.select %1077, %1079, %1075 : vector<2x8xi1>, vector<2x8xi32>
    %c1_i32_193 = arith.constant 1 : i32
    %1081 = vector.broadcast %c1_i32_193 : i32 to vector<2x8xi32>
    %1082 = arith.cmpi eq, %1074, %1081 : vector<2x8xi32>
    %1083 = vector.shape_cast %1052 : vector<2x1xi32> to vector<2x1xi32>
    %1084 = vector.broadcast %1083 : vector<2x1xi32> to vector<2x8xi32>
    %1085 = arith.select %1082, %1084, %1080 : vector<2x8xi1>, vector<2x8xi32>
    %c2_i32_194 = arith.constant 2 : i32
    %1086 = vector.broadcast %c2_i32_194 : i32 to vector<2x8xi32>
    %1087 = arith.cmpi eq, %1074, %1086 : vector<2x8xi32>
    %1088 = vector.shape_cast %1031 : vector<2x1xi32> to vector<2x1xi32>
    %1089 = vector.broadcast %1088 : vector<2x1xi32> to vector<2x8xi32>
    %1090 = arith.select %1087, %1089, %1085 : vector<2x8xi1>, vector<2x8xi32>
    %c3_i32_195 = arith.constant 3 : i32
    %1091 = vector.broadcast %c3_i32_195 : i32 to vector<2x8xi32>
    %1092 = arith.cmpi eq, %1074, %1091 : vector<2x8xi32>
    %1093 = vector.shape_cast %1010 : vector<2x1xi32> to vector<2x1xi32>
    %1094 = vector.broadcast %1093 : vector<2x1xi32> to vector<2x8xi32>
    %1095 = arith.select %1092, %1094, %1090 : vector<2x8xi1>, vector<2x8xi32>
    %c4_i32_196 = arith.constant 4 : i32
    %1096 = vector.broadcast %c4_i32_196 : i32 to vector<2x8xi32>
    %1097 = arith.cmpi eq, %1074, %1096 : vector<2x8xi32>
    %1098 = vector.shape_cast %989 : vector<2x1xi32> to vector<2x1xi32>
    %1099 = vector.broadcast %1098 : vector<2x1xi32> to vector<2x8xi32>
    %1100 = arith.select %1097, %1099, %1095 : vector<2x8xi1>, vector<2x8xi32>
    %c5_i32 = arith.constant 5 : i32
    %1101 = vector.broadcast %c5_i32 : i32 to vector<2x8xi32>
    %1102 = arith.cmpi eq, %1074, %1101 : vector<2x8xi32>
    %1103 = vector.shape_cast %968 : vector<2x1xi32> to vector<2x1xi32>
    %1104 = vector.broadcast %1103 : vector<2x1xi32> to vector<2x8xi32>
    %1105 = arith.select %1102, %1104, %1100 : vector<2x8xi1>, vector<2x8xi32>
    %c6_i32 = arith.constant 6 : i32
    %1106 = vector.broadcast %c6_i32 : i32 to vector<2x8xi32>
    %1107 = arith.cmpi eq, %1074, %1106 : vector<2x8xi32>
    %1108 = vector.shape_cast %947 : vector<2x1xi32> to vector<2x1xi32>
    %1109 = vector.broadcast %1108 : vector<2x1xi32> to vector<2x8xi32>
    %1110 = arith.select %1107, %1109, %1105 : vector<2x8xi1>, vector<2x8xi32>
    %c7_i32 = arith.constant 7 : i32
    %1111 = vector.broadcast %c7_i32 : i32 to vector<2x8xi32>
    %1112 = arith.cmpi eq, %1074, %1111 : vector<2x8xi32>
    %1113 = vector.shape_cast %926 : vector<2x1xi32> to vector<2x1xi32>
    %1114 = vector.broadcast %1113 : vector<2x1xi32> to vector<2x8xi32>
    %1115 = arith.select %1112, %1114, %1110 : vector<2x8xi1>, vector<2x8xi32>
    %c0_197 = arith.constant 0 : index
    %c0_198 = arith.constant 0 : index
    %1116 = vector.load %arg21[%c0_197, %c0_198] : memref<2x8xi32, #tpu.memory_space<vmem>>, vector<2x8xi32>
    tpu.vector_store %arg21[%c0_197, %c0_198], %1115 {strides = array<i32>} : memref<2x8xi32, #tpu.memory_space<vmem>>, vector<2x8xi32>,
    %1117 = tpu.iota {dimensions = array<i32: 1>} : vector<8x5xi32>
    %c0_199 = arith.constant 0 : index
    %c0_200 = arith.constant 0 : index
    %1118 = vector.load %arg17[%c0_199, %c0_200] : memref<5x16xf32, #tpu.memory_space<vmem>>, vector<5x16xf32>
    %c0_201 = arith.constant 0 : index
    %c0_202 = arith.constant 0 : index
    %1119 = vector.load %arg18[%c0_201, %c0_202] : memref<5x16xf32, #tpu.memory_space<vmem>>, vector<5x16xf32>
    %c0_203 = arith.constant 0 : index
    %c0_204 = arith.constant 0 : index
    %1120 = vector.load %arg19[%c0_203, %c0_204] : memref<1x16xf32, #tpu.memory_space<vmem>>, vector<1x16xf32>
    %1121 = vector.extract_strided_slice %1073 {offsets = [0, 0], sizes = [1, 1], strides = [1, 1]} : vector<2x1xi32> to vector<1x1xi32>
    %1122 = vector.extract_strided_slice %1052 {offsets = [0, 0], sizes = [1, 1], strides = [1, 1]} : vector<2x1xi32> to vector<1x1xi32>
    %1123 = vector.extract_strided_slice %1031 {offsets = [0, 0], sizes = [1, 1], strides = [1, 1]} : vector<2x1xi32> to vector<1x1xi32>
    %1124 = vector.extract_strided_slice %1010 {offsets = [0, 0], sizes = [1, 1], strides = [1, 1]} : vector<2x1xi32> to vector<1x1xi32>
    %1125 = vector.extract_strided_slice %989 {offsets = [0, 0], sizes = [1, 1], strides = [1, 1]} : vector<2x1xi32> to vector<1x1xi32>
    %1126 = vector.extract_strided_slice %968 {offsets = [0, 0], sizes = [1, 1], strides = [1, 1]} : vector<2x1xi32> to vector<1x1xi32>
    %1127 = vector.extract_strided_slice %947 {offsets = [0, 0], sizes = [1, 1], strides = [1, 1]} : vector<2x1xi32> to vector<1x1xi32>
    %1128 = vector.extract_strided_slice %926 {offsets = [0, 0], sizes = [1, 1], strides = [1, 1]} : vector<2x1xi32> to vector<1x1xi32>
    %1129 = tpu.concatenate %1121, %1122, %1123, %1124, %1125, %1126, %1127, %1128 in 0 : vector<1x1xi32>, vector<1x1xi32>, vector<1x1xi32>, vector<1x1xi32>, vector<1x1xi32>, vector<1x1xi32>, vector<1x1xi32>, vector<1x1xi32> -> vector<8x1xi32>
    %1130 = vector.broadcast %1129 : vector<8x1xi32> to vector<8x5xi32>
    %1131 = arith.cmpi eq, %1117, %1130 : vector<8x5xi32>
    %1132 = arith.extui %1131 : vector<8x5xi1> to vector<8x5xi32>
    %1133 = arith.sitofp %1132 : vector<8x5xi32> to vector<8x5xf32>
    %1134 = vector.extract_strided_slice %565 {offsets = [0, 0], sizes = [8, 16], strides = [1, 1]} : vector<16x16xf32> to vector<8x16xf32>
    %cst_205 = arith.constant dense<0.000000e+00> : vector<8x16xf32>
    %1135 = tpu.matmul %1133, %1118, %cst_205 {dimension_numbers = #tpu.dot_dimension_numbers<[1], [0], [0], [1], [0, 0, 1, 1], [], []>} : vector<8x5xf32>, vector<5x16xf32>, vector<8x16xf32> -> vector<8x16xf32>
    %1136 = arith.addf %1134, %1135 : vector<8x16xf32>
    %1137 = vector.extract_strided_slice %566 {offsets = [0, 0], sizes = [8, 16], strides = [1, 1]} : vector<16x16xf32> to vector<8x16xf32>
    %cst_206 = arith.constant dense<0.000000e+00> : vector<8x16xf32>
    %1138 = tpu.matmul %1133, %1119, %cst_206 {dimension_numbers = #tpu.dot_dimension_numbers<[1], [0], [0], [1], [0, 0, 1, 1], [], []>} : vector<8x5xf32>, vector<5x16xf32>, vector<8x16xf32> -> vector<8x16xf32>
    %1139 = arith.addf %1137, %1138 : vector<8x16xf32>
    %1140 = vector.shape_cast %1136 : vector<8x16xf32> to vector<1x8x16xf32>
    %1141 = vector.shape_cast %1139 : vector<8x16xf32> to vector<8x1x16xf32>
    %1142 = vector.broadcast %1140 : vector<1x8x16xf32> to vector<8x8x16xf32>
    %1143 = vector.broadcast %1141 : vector<8x1x16xf32> to vector<8x8x16xf32>
    %1144 = arith.addf %1142, %1143 : vector<8x8x16xf32>
    %1145 = vector.shape_cast %1120 : vector<1x16xf32> to vector<1x1x16xf32>
    %1146 = vector.broadcast %1145 : vector<1x1x16xf32> to vector<8x8x16xf32>
    %1147 = arith.addf %1144, %1146 : vector<8x8x16xf32>
    %1148 = math.tanh %1147 : vector<8x8x16xf32>
    %1149 = vector.shape_cast %1148 : vector<8x8x16xf32> to vector<64x16xf32>
    %1150 = vector.extract_strided_slice %1073 {offsets = [1, 0], sizes = [1, 1], strides = [1, 1]} : vector<2x1xi32> to vector<1x1xi32>
    %1151 = vector.extract_strided_slice %1052 {offsets = [1, 0], sizes = [1, 1], strides = [1, 1]} : vector<2x1xi32> to vector<1x1xi32>
    %1152 = vector.extract_strided_slice %1031 {offsets = [1, 0], sizes = [1, 1], strides = [1, 1]} : vector<2x1xi32> to vector<1x1xi32>
    %1153 = vector.extract_strided_slice %1010 {offsets = [1, 0], sizes = [1, 1], strides = [1, 1]} : vector<2x1xi32> to vector<1x1xi32>
    %1154 = vector.extract_strided_slice %989 {offsets = [1, 0], sizes = [1, 1], strides = [1, 1]} : vector<2x1xi32> to vector<1x1xi32>
    %1155 = vector.extract_strided_slice %968 {offsets = [1, 0], sizes = [1, 1], strides = [1, 1]} : vector<2x1xi32> to vector<1x1xi32>
    %1156 = vector.extract_strided_slice %947 {offsets = [1, 0], sizes = [1, 1], strides = [1, 1]} : vector<2x1xi32> to vector<1x1xi32>
    %1157 = vector.extract_strided_slice %926 {offsets = [1, 0], sizes = [1, 1], strides = [1, 1]} : vector<2x1xi32> to vector<1x1xi32>
    %1158 = tpu.concatenate %1150, %1151, %1152, %1153, %1154, %1155, %1156, %1157 in 0 : vector<1x1xi32>, vector<1x1xi32>, vector<1x1xi32>, vector<1x1xi32>, vector<1x1xi32>, vector<1x1xi32>, vector<1x1xi32>, vector<1x1xi32> -> vector<8x1xi32>
    %1159 = vector.broadcast %1158 : vector<8x1xi32> to vector<8x5xi32>
    %1160 = arith.cmpi eq, %1117, %1159 : vector<8x5xi32>
    %1161 = arith.extui %1160 : vector<8x5xi1> to vector<8x5xi32>
    %1162 = arith.sitofp %1161 : vector<8x5xi32> to vector<8x5xf32>
    %1163 = vector.extract_strided_slice %565 {offsets = [8, 0], sizes = [8, 16], strides = [1, 1]} : vector<16x16xf32> to vector<8x16xf32>
    %cst_207 = arith.constant dense<0.000000e+00> : vector<8x16xf32>
    %1164 = tpu.matmul %1162, %1118, %cst_207 {dimension_numbers = #tpu.dot_dimension_numbers<[1], [0], [0], [1], [0, 0, 1, 1], [], []>} : vector<8x5xf32>, vector<5x16xf32>, vector<8x16xf32> -> vector<8x16xf32>
    %1165 = arith.addf %1163, %1164 : vector<8x16xf32>
    %1166 = vector.extract_strided_slice %566 {offsets = [8, 0], sizes = [8, 16], strides = [1, 1]} : vector<16x16xf32> to vector<8x16xf32>
    %cst_208 = arith.constant dense<0.000000e+00> : vector<8x16xf32>
    %1167 = tpu.matmul %1162, %1119, %cst_208 {dimension_numbers = #tpu.dot_dimension_numbers<[1], [0], [0], [1], [0, 0, 1, 1], [], []>} : vector<8x5xf32>, vector<5x16xf32>, vector<8x16xf32> -> vector<8x16xf32>
    %1168 = arith.addf %1166, %1167 : vector<8x16xf32>
    %1169 = vector.shape_cast %1165 : vector<8x16xf32> to vector<1x8x16xf32>
    %1170 = vector.shape_cast %1168 : vector<8x16xf32> to vector<8x1x16xf32>
    %1171 = vector.broadcast %1169 : vector<1x8x16xf32> to vector<8x8x16xf32>
    %1172 = vector.broadcast %1170 : vector<8x1x16xf32> to vector<8x8x16xf32>
    %1173 = arith.addf %1171, %1172 : vector<8x8x16xf32>
    %1174 = vector.shape_cast %1120 : vector<1x16xf32> to vector<1x1x16xf32>
    %1175 = vector.broadcast %1174 : vector<1x1x16xf32> to vector<8x8x16xf32>
    %1176 = arith.addf %1173, %1175 : vector<8x8x16xf32>
    %1177 = math.tanh %1176 : vector<8x8x16xf32>
    %1178 = vector.shape_cast %1177 : vector<8x8x16xf32> to vector<64x16xf32>
    %1179 = tpu.concatenate %1149, %1178 in 0 : vector<64x16xf32>, vector<64x16xf32> -> vector<128x16xf32>
    %c0_209 = arith.constant 0 : index
    %c0_210 = arith.constant 0 : index
    %1180 = vector.load %arg20[%c0_209, %c0_210] : memref<4x16xf32, #tpu.memory_space<vmem>>, vector<4x16xf32>
    %cst_211 = arith.constant dense<0.000000e+00> : vector<4x128xf32>
    %1181 = tpu.matmul %1180, %1179, %cst_211 {dimension_numbers = #tpu.dot_dimension_numbers<[1], [1], [0], [0], [0, 0, 1, 0], [], []>} : vector<4x16xf32>, vector<128x16xf32>, vector<4x128xf32> -> vector<4x128xf32>
    %c0_212 = arith.constant 0 : index
    %c0_213 = arith.constant 0 : index
    %1182 = vector.load %arg22[%c0_212, %c0_213] : memref<4x128xf32, #tpu.memory_space<vmem>>, vector<4x128xf32>
    tpu.vector_store %arg22[%c0_212, %c0_213], %1181 {strides = array<i32>} : memref<4x128xf32, #tpu.memory_space<vmem>>, vector<4x128xf32>,
    %cst_214 = arith.constant 0.405465096 : f32
    %1183 = vector.broadcast %cst_214 : f32 to vector<4x128xf32>
    %1184 = arith.cmpf ogt, %1181, %1183 : vector<4x128xf32>
    %1185 = arith.extui %1184 : vector<4x128xi1> to vector<4x128xi32>
    %c0_215 = arith.constant 0 : index
    %c0_216 = arith.constant 0 : index
    %1186 = vector.load %arg23[%c0_215, %c0_216] : memref<4x128xi32, #tpu.memory_space<vmem>>, vector<4x128xi32>
    tpu.vector_store %arg23[%c0_215, %c0_216], %1185 {strides = array<i32>} : memref<4x128xi32, #tpu.memory_space<vmem>>, vector<4x128xi32>,
    return
  }
}

</mosaic_0001>

<bundles_post_ra>
// kernel: joint_model_forward.1
= control target key start
LH: loop header
LB: loop body
LE: loop exit
PB: predicated region body
PF: predicated region fallthrough
CT: control target
= control target key end

     0   :  { %s7039_s0 = inlined_call_operand.vmem [shape: s32[16,1], index: 0, kind: input, shape index: {}]   ;;  %s7040_s1 = inlined_call_operand.vmem [shape: f32[100,32], index: 1, kind: input, shape index: {}]   ;;  %s7041_s2 = inlined_call_operand.vmem [shape: f32[2,32], index: 2, kind: input, shape index: {}]   ;;  %s7042_s3 = inlined_call_operand.vmem [shape: f32[2,32], index: 3, kind: input, shape index: {}]   ;;  %s7043_s4 = inlined_call_operand.vmem [shape: f32[32,96], index: 4, kind: input, shape index: {}]   ;;  %s7044_s5 = inlined_call_operand.vmem [shape: f32[32,96], index: 5, kind: input, shape index: {}]   ;;  %s7045_s6 = inlined_call_operand.vmem [shape: f32[1,96], index: 6, kind: input, shape index: {}]   ;;  %s7046_s7 = inlined_call_operand.vmem [shape: f32[1,96], index: 7, kind: input, shape index: {}]   ;;  %s7047_s8 = inlined_call_operand.vmem [shape: f32[32,96], index: 8, kind: input, shape index: {}]   ;;  %s7048_s9 = inlined_call_operand.vmem [shape: f32[32,96], index: 9, kind: input, shape index: {}]   ;;  %s7049_s10 = inlined_call_operand.vmem [shape: f32[1,96], index: 10, kind: input, shape index: {}]   ;;  %s7050_s11 = inlined_call_operand.vmem [shape: f32[1,96], index: 11, kind: input, shape index: {}]   ;;  %s7051_s12 = inlined_call_operand.vmem [shape: f32[64,37], index: 12, kind: input, shape index: {}]   ;;  %s7052_s13 = inlined_call_operand.vmem [shape: f32[1,5], index: 13, kind: input, shape index: {}]   ;;  %s7053_s14 = inlined_call_operand.vmem [shape: f32[1,5], index: 14, kind: input, shape index: {}]   ;;  %s7054_s15 = inlined_call_operand.vmem [shape: f32[1,5], index: 15, kind: input, shape index: {}]   ;;  %s7055_s16 = inlined_call_operand.vmem [shape: f32[5,5], index: 16, kind: input, shape index: {}]   ;;  %s7056_s17 = inlined_call_operand.vmem [shape: f32[5,16], index: 17, kind: input, shape index: {}]   ;;  %s7057_s18 = inlined_call_operand.vmem [shape: f32[5,16], index: 18, kind: input, shape index: {}]   ;;  %s7058_s19 = inlined_call_operand.vmem [shape: f32[1,16], index: 19, kind: input, shape index: {}]   ;;  %s7059_s20 = inlined_call_operand.vmem [shape: f32[4,16], index: 20, kind: input, shape index: {}]   ;;  %s7060_s21 = inlined_call_operand.hbm [shape: s32[2,8], index: 21, kind: output, shape index: {0}]   ;;  %s7061_s22 = inlined_call_operand.vmem [shape: f32[4,128], index: 22, kind: output, shape index: {1}]   ;;  %s7062_s23 = inlined_call_operand.vmem [shape: s32[4,128], index: 23, kind: output, shape index: {2}]  }
   0x1   :  { %7069 = sst [smem:[#allocation5_spill]] %s7039_s0 }
   0x2   :  { %7070 = sst [smem:[#allocation6_spill]] %s7040_s1 }
   0x3   :  { %7071 = sst [smem:[#allocation7_spill]] %s7041_s2 }
   0x4   :  { %7072 = sst [smem:[#allocation8_spill]] %s7042_s3 }
   0x5   :  { %7073 = sst [smem:[#allocation9_spill]] %s7043_s4 }
   0x6   :  { %7074 = sst [smem:[#allocation10_spill]] %s7044_s5 }
   0x7   :  { %7075 = sst [smem:[#allocation11_spill]] %s7045_s6 }
   0x8   :  { %7076 = sst [smem:[#allocation12_spill]] %s7046_s7 }
   0x9   :  { %7077 = sst [smem:[#allocation13_spill]] %s7057_s18 }
   0xa   :  { %s7078_s24 = sld [smem:[#allocation5_spill]]  ;;  %s7079_s18 = sld [smem:[#allocation6_spill]]  ;;  %v5745_v2 = vmov 0  }
   0xb   :  { %5554 = vset.pattern.permute.xlu0 %v5745_v2  ;;  %5555 = vset.pattern.permute.xlu1 %v5745_v2 }
  0x10   :  { %v72_v0 = vld [vmem:[%s7078_s24] sm:$0xff]  ;;  %v89_v3 = vld [vmem:[%s7079_s18 + $0x8] sm:$0xff]  ;;  %v90_v4 = vld [vmem:[%s7079_s18 + $0x10] sm:$0xff] }
  0x11   :  { %v88_v1 = vld [vmem:[%s7079_s18] sm:$0xff]  ;;  %v91_v5 = vld [vmem:[%s7079_s18 + $0x18] sm:$0xff]  ;;  %77 = vperm.xlu0 %5554, %v72_v0   ;;  %v73_v8 = vld [vmem:[%s7078_s24 + $0x8] sm:$0xff] }
  0x12   :  { %v5271_v6 = vpack.c.bf16 %v89_v3, %v88_v1  ;;  %v5275_v7 = vpack.c.bf16 %v91_v5, %v90_v4  ;;  %v92_v9 = vld [vmem:[%s7079_s18 + $0x20] sm:$0xff]  ;;  %v93_v10 = vld [vmem:[%s7079_s18 + $0x28] sm:$0xff] }
  0x14   :  { %5272 = vmatprep.subr.bf16.mxu0 %v5271_v6 }
  0x15   :  { %29 = vsyncpa [#allocation3], 0  ;;  %5274 = vmatpush3.bf16.msra.mxu0 %v5271_v6  ;;  %80 = vperm.xlu0 %5554, %v73_v8   ;;  %v5279_v11 = vpack.c.bf16 %v93_v10, %v92_v9  ;;  %v94_v12 = vld [vmem:[%s7079_s18 + $0x30] sm:$0xff]  ;;  %v95_v13 = vld [vmem:[%s7079_s18 + $0x38] sm:$0xff]  ;;  %v5746_v14 = vmov 0.0|0.0   ;;  %vm108_vm0 = vcmask 1043456   ;;  %v74_v23 = vlaneseq }
  0x16   :  { %5276 = vmatprep.subr.bf16.mxu0 %v5275_v7  ;;  %5325 = vmatprep.subr.bf16.mxu1 %v5746_v14  ;;  %v5283_v15 = vpack.c.bf16 %v95_v13, %v94_v12  ;;  %v96_v16 = vld [vmem:[%s7079_s18 + $0x40] sm:$0xff]  ;;  %v97_v17 = vld [vmem:[%s7079_s18 + $0x48] sm:$0xff]  ;;  %v98_v19 = vld [vmem:[%s7079_s18 + $0x50] sm:$0xff]  ;;  %vm101_vm1 = vcmask 818176   ;;  %s7080_s5 = sld [smem:[#allocation9_spill]]  ;;  %v5747_v28 = vmov 0.0  }
  0x17   :  { %v5287_v18 = vpack.c.bf16 %v97_v17, %v96_v16  ;;  %v99_v20 = vld [vmem:[%s7079_s18 + $0x58] sm:$0xff]  ;;  %v100_v22 = vld [vmem:[%s7079_s18 + $0x60] sm:$0xf]  ;;  %v5936_v24 = vand.u32 127, %v74_v23  ;;  %s7081_s28 = sld [smem:[#allocation10_spill]]  ;;  %vm5748_vm4 = vmmov 0  }
  0x18   :  { %v5291_v21 = vpack.c.bf16 %v99_v20, %v98_v19  ;;  %4908 = vmatprep.mubr.msk.f32.mxu1 %vm5748_vm4, %v5747_v28  ;;  %vm214_vm5 = vcmask 261120   ;;  %s7082_s1 = sld [smem:[#allocation7_spill]]  ;;  %s7083_s2 = sld [smem:[#allocation12_spill]]  ;;  %v198_v16 = vld [vmem:[%s7047_s8 + $0x8] sm:$0xff]  ;;  %v199_v19 = vld [vmem:[%s7047_s8 + $0x10] sm:$0xff]  ;;  %v200_v20 = vld [vmem:[%s7047_s8 + $0x18] sm:$0xff] }
  0x19   :  { %5278 = vmatpush3.bf16.msra.mxu0 %v5275_v7  ;;  %s5749_s6 = smov 64   ;;  %s5750_s29 = smov 32   ;;  %vm3051_vm6 = vcmask 1040384   ;;  %vm3053_vm7 = vcmask 1041408   ;;  %vm3055_vm8 = vcmask 1042432   ;;  %vm3058_vm9 = vcmask 1044480  }
  0x1a   :  { %5280 = vmatprep.subr.bf16.mxu0 %v5279_v11  ;;  %s5751_s3 = smov 96   ;;  %s7085_s24 = sld [smem:[#allocation8_spill]]  ;;  %vm3060_vm10 = vcmask 1045504   ;;  %vm3062_vm11 = vcmask 1046528   ;;  %vm3079_vm12 = vcmask 523264  }
  0x1b   :  { %s5759_s7 = smov 2   ;;  %s7086_s25 = sld [smem:[#allocation13_spill]] }
  0x1c   :  { %v187_v26 = vld [vmem:[%s7080_s5] sm:$0xff]  ;;  %v188_v27 = vld [vmem:[%s7080_s5 + $0x8] sm:$0xff]  ;;  %v189_v32 = vld [vmem:[%s7080_s5 + $0x10] sm:$0xff] }
  0x1d   :  { %5282 = vmatpush3.bf16.msra.mxu0 %v5279_v11  ;;  %v5946_v31 = vpack.c.bf16 %v188_v27, %v187_v26  ;;  %v190_v33 = vld [vmem:[%s7080_s5 + $0x18] sm:$0xff]  ;;  %v191_v36 = vld [vmem:[%s7081_s28] sm:$0xff]  ;;  %v192_v37 = vld [vmem:[%s7081_s28 + $0x8] sm:$0xff]  ;;  %s5760_s5 = smov 16  }
  0x1e   :  { %5284 = vmatprep.subr.bf16.mxu0 %v5283_v15  ;;  %v5957_v35 = vpack.c.bf16 %v190_v33, %v189_v32  ;;  %v5968_v38 = vpack.c.bf16 %v192_v37, %v191_v36  ;;  %v193_v39 = vld [vmem:[%s7081_s28 + $0x10] sm:$0xff]  ;;  %v194_v40 = vld [vmem:[%s7081_s28 + $0x18] sm:$0xff]  ;;  %v207_v44 = vld [vmem:[%s7082_s1] sm:$0x3]  ;;  %s7084_s28 = sld [smem:[#allocation11_spill]] }
  0x1f   :  { %v5982_v41 = vpack.c.bf16 %v194_v40, %v193_v39  ;;  %v6021_v48 = vld [vmem:[%s7083_s2] ss:$0 sm:$0xff] }
  0x20   :  { %5327 = vmatpush3.bf16.msra.mxu1 %v5968_v38 }
  0x21   :  { %5286 = vmatpush3.bf16.msra.mxu0 %v5283_v15  ;;  %5328 = vmatprep.subr.bf16.mxu1 %v5746_v14  ;;  %v197_v15 = vld [vmem:[%s7047_s8] sm:$0xff] }
  0x22   :  { %5288 = vmatprep.subr.bf16.mxu0 %v5287_v18  ;;  %v5392_v17 = vpack.c.bf16 %v198_v16, %v197_v15 }
  0x24   :  { %5330 = vmatpush3.bf16.msra.mxu1 %v5982_v41  ;;  %v6030_v54 = vld [vmem:[%s7084_s28] ss:$0 sm:$0xff] }
  0x25   :  { %5290 = vmatpush3.bf16.msra.mxu0 %v5287_v18  ;;  %5337 = vmatprep.subr.bf16.mxu1 %v5746_v14 }
  0x26   :  { %5292 = vmatprep.subr.bf16.mxu0 %v5291_v21 }
  0x29   :  { %5294 = vmatpush3.bf16.msra.mxu0 %v5291_v21  ;;  %v5395_v21 = vpack.c.bf16 %v200_v20, %v199_v19 }
  0x2a   :  { %4840 = vmatprep.subr.msk.mxu0 %vm108_vm0, %v100_v22 }
  0x2d   :  { %4841 = vmatpush3.msk.msra.mxu0 %vm108_vm0, %v100_v22 }
  0x2e   :  { %5295 = vmatprep.subr.bf16.mxu0 %v5746_v14 }
  0x90   :  { %v78_v25 = vpop.permute.xlu0 %77 }
  0x91   :  { %vm82_vm2 = vcmp.eq.s32.totalorder %v5936_v24, %v78_v25 }
  0x92   :  { %v4516_v29 = vsel %vm82_vm2, 1.0, %v5747_v28 }
  0x93   :  { %4842 = vmatprep.mubr.msk.f32.mxu0 %vm101_vm1, %v4516_v29 }
  0x94   :  { %v81_v30 = vpop.permute.xlu0 %80 }
  0x95   :  { %vm83_vm3 = vcmp.eq.s32.totalorder %v5936_v24, %v81_v30 }
  0x96   :  { %v4517_v34 = vsel %vm83_vm3, 1.0, %v5747_v28 }
  0x97   :  { %4843 = vmatmul.mubr.msk.f32.vlgmr.msra.gmra.mrb[0].mxu0 %vm101_vm1, %v4517_v34 }
  0x98   :  { %5297 = vmatpush3.bf16.msra.mxu0 %v5946_v31  ;;  %4853 = vmatprep.mubr.msk.f32.mxu0 %vm5748_vm4, %v5747_v28 }
  0x99   :  { %5298 = vmatprep.subr.bf16.mxu0 %v5746_v14 }
  0x9c   :  { %5300 = vmatpush3.bf16.msra.mxu0 %v5957_v35 }
  0x9d   :  { %5301 = vmatprep.subr.bf16.mxu0 %v5746_v14 }
 0x16a   :  { %v5986_v42 = vpop.f32.mrb[0].mxu0 }
 0x16b   :  { %v5988_v43 = vpop.f32.mrb[1].mxu0  ;;  %v1092_v12 = vrot.slane %v5986_v42, 2  ;;  %v1266_v13 = vrot.slane %v5986_v42, 4  ;;  %v1440_v18 = vrot.slane %v5986_v42, 6 }
 0x16c   :  { %4854 = vmatmul.mubr.msk.f32.vlgmr.msra.gmra.mrb[2].mxu0 %vm214_vm5, %v5988_v43  ;;  %v396_v45 = vrot.slane %v5988_v43, 2  ;;  %v570_v10 = vrot.slane %v5988_v43, 4  ;;  %v744_v11 = vrot.slane %v5988_v43, 6 }
 0x16d   :  { %5303 = vmatpush3.bf16.msra.mxu0 %v5968_v38  ;;  %4864 = vmatprep.mubr.msk.f32.mxu0 %vm5748_vm4, %v5747_v28 }
 0x16e   :  { %5304 = vmatprep.subr.bf16.mxu0 %v5746_v14 }
 0x171   :  { %5306 = vmatpush3.bf16.msra.mxu0 %v5982_v41 }
 0x172   :  { %5307 = vmatprep.subr.bf16.mxu0 %v5746_v14 }
 0x174   :  { %4865 = vmatmul.mubr.msk.f32.vlgmr.msra.gmra.mrb[4].mxu0 %vm214_vm5, %v207_v44 }
 0x175   :  { %5309 = vmatpush3.bf16.msra.mxu0 %v5946_v31  ;;  %4875 = vmatprep.mubr.msk.f32.mxu0 %vm5748_vm4, %v5747_v28 }
 0x176   :  { %5310 = vmatprep.subr.bf16.mxu0 %v5746_v14 }
 0x179   :  { %5312 = vmatpush3.bf16.msra.mxu0 %v5957_v35 }
 0x17a   :  { %5313 = vmatprep.subr.bf16.mxu0 %v5746_v14 }
 0x17c   :  { %4876 = vmatmul.mubr.msk.f32.vlgmr.msra.gmra.mrb[6].mxu0 %vm214_vm5, %v396_v45 }
 0x17d   :  { %5315 = vmatpush3.bf16.msra.mxu0 %v5968_v38  ;;  %4886 = vmatprep.mubr.msk.f32.mxu0 %vm5748_vm4, %v5747_v28 }
 0x17e   :  { %5316 = vmatprep.subr.bf16.mxu0 %v5746_v14 }
 0x181   :  { %5318 = vmatpush3.bf16.msra.mxu0 %v5982_v41 }
 0x182   :  { %5319 = vmatprep.subr.bf16.mxu0 %v5746_v14 }
 0x23f   :  { %v284_v46 = vpop.f32.mrb[2].mxu0 }
 0x240   :  { %v4855_v47 = vpop.f32.mrb[3].mxu0  ;;  %v285_v55 = vadd.f32 %v6030_v54, %v284_v46 }
 0x247   :  { %v363_v49 = vpop.f32.mrb[4].mxu0 }
 0x248   :  { %v364_v50 = vadd.f32 %v6021_v48, %v363_v49  ;;  %v4866_v51 = vpop.f32.mrb[5].mxu0 }
 0x24a   :  { %375 = vrot.lane.b32.xlu1 %v364_v50, %s5749_s6  ;;  %v367_v56 = vadd.f32 %v364_v50, %v285_v55 }
 0x24c   :  { %v4525_v57 = vmul.f32 -1.442695, %v367_v56 }
 0x24e   :  { %5591 = vpow2.f32 %v4525_v57 }
 0x24f   :  { %v6025_v52 = vpop.f32.mrb[6].mxu0 }
 0x250   :  { %v4877_v53 = vpop.f32.mrb[7].mxu0 }
 0x251   :  { %v466_v53 = vadd.f32 %v6030_v54, %v6025_v52 }
 0x258   :  { %v5592_v58 = vpop.eup %5591 }
 0x259   :  { %v371_v59 = vadd.f32 1.0, %v5592_v58 }
 0x25b   :  { %5593 = vrcp.f32 %v371_v59 }
 0x265   :  { %v5594_v60 = vpop.eup %5593 }
 0x266   :  { %v385_v4 = vsub.f32 1.0, %v5594_v60 }
 0x2bc   :  { %v376_v61 = vpop.permute.xlu1 %375 }
 0x2bd   :  { %v378_v62 = vmul.f32 %v5594_v60, %v376_v61 }
 0x2bf   :  { %380 = vrot.lane.b32.xlu1 %v378_v62, %s5749_s6 }
 0x2c3   :  { %391 = vrot.lane.b32.xlu1 %v207_v44, %s5750_s29  ;;  %v6174_v44 = vld [vmem:[%s7049_s10] ss:$0 sm:$0xff] }
 0x331   :  { %v381_v63 = vpop.permute.xlu1 %380 }
 0x332   :  { %v383_v0 = vadd.f32 %v381_v63, %v285_v55 }
 0x334   :  { %5595 = vtanh.f32 %v383_v0 }
 0x335   :  { %v392_v3 = vpop.permute.xlu1 %391 }
 0x336   :  { %v394_v6 = vmul.f32 %v5594_v60, %v392_v3 }
 0x33e   :  { %v5596_v1 = vpop.eup %5595 }
 0x33f   :  { %387 = vrot.lane.b32.xlu0 %v5596_v1, %s5751_s3 }
 0x3b1   :  { %v388_v5 = vpop.permute.xlu0 %387 }
 0x3b2   :  { %v390_v7 = vmul.f32 %v388_v5, %v385_v4 }
 0x3b4   :  { %v6036_v8 = vadd.f32 %v394_v6, %v390_v7 }
 0x3b6   :  { %470 = vrot.lane.b32.xlu0 %v6036_v8, %s5751_s3 }
 0x428   :  { %v6040_v9 = vpop.permute.xlu0 %470 }
 0x429   :  { %4887 = vmatmul.mubr.msk.f32.vlgmr.msra.gmra.mrb[8].mxu0 %vm214_vm5, %v6040_v9 }
 0x42a   :  { %5321 = vmatpush3.bf16.msra.mxu0 %v5946_v31  ;;  %4897 = vmatprep.mubr.msk.f32.mxu0 %vm5748_vm4, %v5747_v28 }
 0x42b   :  { %5322 = vmatprep.subr.bf16.mxu0 %v5746_v14 }
 0x42e   :  { %5324 = vmatpush3.bf16.msra.mxu0 %v5957_v35 }
 0x42f   :  { %5331 = vmatprep.subr.bf16.mxu0 %v5746_v14 }
 0x431   :  { %4898 = vmatmul.mubr.msk.f32.vlgmr.msra.gmra.mrb[10].mxu0 %vm214_vm5, %v570_v10 }
 0x432   :  { %5333 = vmatpush3.bf16.msra.mxu0 %v5946_v31  ;;  %4919 = vmatprep.mubr.msk.f32.mxu0 %vm5748_vm4, %v5747_v28 }
 0x433   :  { %5334 = vmatprep.subr.bf16.mxu0 %v5746_v14 }
 0x436   :  { %5336 = vmatpush3.bf16.msra.mxu0 %v5957_v35 }
 0x437   :  { %5343 = vmatprep.subr.bf16.mxu0 %v5746_v14 }
 0x439   :  { %4920 = vmatmul.mubr.msk.f32.vlgmr.msra.gmra.mrb[12].mxu0 %vm214_vm5, %v744_v11 }
 0x43a   :  { %5345 = vmatpush3.bf16.msra.mxu0 %v5946_v31  ;;  %4941 = vmatprep.mubr.msk.f32.mxu0 %vm5748_vm4, %v5747_v28 }
 0x43b   :  { %5346 = vmatprep.subr.bf16.mxu0 %v5746_v14 }
 0x43e   :  { %5348 = vmatpush3.bf16.msra.mxu0 %v5957_v35 }
 0x43f   :  { %5355 = vmatprep.subr.bf16.mxu0 %v5746_v14 }
 0x441   :  { %4942 = vmatmul.mubr.msk.f32.vlgmr.msra.gmra.mrb[14].mxu0 %vm214_vm5, %v5986_v42 }
 0x442   :  { %5357 = vmatpush3.bf16.msra.mxu0 %v5946_v31  ;;  %4963 = vmatprep.mubr.msk.f32.mxu0 %vm5748_vm4, %v5747_v28 }
 0x443   :  { %5358 = vmatprep.subr.bf16.mxu0 %v5746_v14 }
 0x446   :  { %5360 = vmatpush3.bf16.msra.mxu0 %v5957_v35 }
 0x447   :  { %5367 = vmatprep.subr.bf16.mxu0 %v5746_v14 }
 0x449   :  { %4964 = vmatmul.mubr.msk.f32.vlgmr.msra.gmra.mrb[16].mxu0 %vm214_vm5, %v1092_v12 }
 0x44a   :  { %5369 = vmatpush3.bf16.msra.mxu0 %v5946_v31  ;;  %4985 = vmatprep.mubr.msk.f32.mxu0 %vm5748_vm4, %v5747_v28 }
 0x44b   :  { %5370 = vmatprep.subr.bf16.mxu0 %v5746_v14 }
 0x44e   :  { %5372 = vmatpush3.bf16.msra.mxu0 %v5957_v35 }
 0x44f   :  { %5379 = vmatprep.subr.bf16.mxu0 %v5746_v14 }
 0x451   :  { %4986 = vmatmul.mubr.msk.f32.vlgmr.msra.gmra.mrb[18].mxu0 %vm214_vm5, %v1266_v13 }
 0x452   :  { %5381 = vmatpush3.bf16.msra.mxu0 %v5946_v31  ;;  %5007 = vmatprep.mubr.msk.f32.mxu0 %vm5748_vm4, %v5747_v28 }
 0x453   :  { %5382 = vmatprep.subr.bf16.mxu0 %v5746_v14 }
 0x456   :  { %5384 = vmatpush3.bf16.msra.mxu0 %v5957_v35 }
 0x457   :  { %5391 = vmatprep.subr.bf16.mxu0 %v5746_v14 }
 0x459   :  { %5008 = vmatmul.mubr.msk.f32.vlgmr.msra.gmra.mrb[20].mxu0 %vm214_vm5, %v1440_v18 }
 0x45a   :  { %5393 = vmatpush3.bf16.msra.mxu0 %v5392_v17  ;;  %5029 = vmatprep.mubr.msk.f32.mxu0 %vm5748_vm4, %v5747_v28 }
 0x45b   :  { %5394 = vmatprep.subr.bf16.mxu0 %v5746_v14 }
 0x45e   :  { %5396 = vmatpush3.bf16.msra.mxu0 %v5395_v21 }
 0x45f   :  { %5403 = vmatprep.subr.bf16.mxu0 %v5746_v14 }
 0x461   :  { %5030 = vmatmul.mubr.msk.f32.vlgmr.msra.gmra.mrb[22].mxu0 %vm214_vm5, %v1440_v18 }
 0x462   :  { %5405 = vmatpush3.bf16.msra.mxu0 %v5392_v17  ;;  %5051 = vmatprep.mubr.msk.f32.mxu0 %vm5748_vm4, %v5747_v28 }
 0x463   :  { %5406 = vmatprep.subr.bf16.mxu0 %v5746_v14 }
 0x466   :  { %5408 = vmatpush3.bf16.msra.mxu0 %v5395_v21 }
 0x467   :  { %5415 = vmatprep.subr.bf16.mxu0 %v5746_v14 }
 0x469   :  { %5052 = vmatmul.mubr.msk.f32.vlgmr.msra.gmra.mrb[24].mxu0 %vm214_vm5, %v1266_v13 }
 0x46a   :  { %5417 = vmatpush3.bf16.msra.mxu0 %v5392_v17  ;;  %5073 = vmatprep.mubr.msk.f32.mxu0 %vm5748_vm4, %v5747_v28 }
 0x46b   :  { %5418 = vmatprep.subr.bf16.mxu0 %v5746_v14 }
 0x46e   :  { %5420 = vmatpush3.bf16.msra.mxu0 %v5395_v21 }
 0x46f   :  { %5427 = vmatprep.subr.bf16.mxu0 %v5746_v14 }
 0x471   :  { %5074 = vmatmul.mubr.msk.f32.vlgmr.msra.gmra.mrb[26].mxu0 %vm214_vm5, %v1092_v12 }
 0x472   :  { %5429 = vmatpush3.bf16.msra.mxu0 %v5392_v17  ;;  %5095 = vmatprep.mubr.msk.f32.mxu0 %vm5748_vm4, %v5747_v28 }
 0x473   :  { %5430 = vmatprep.subr.bf16.mxu0 %v5746_v14 }
 0x476   :  { %5432 = vmatpush3.bf16.msra.mxu0 %v5395_v21 }
 0x477   :  { %5439 = vmatprep.subr.bf16.mxu0 %v5746_v14 }
 0x479   :  { %5096 = vmatmul.mubr.msk.f32.vlgmr.msra.gmra.mrb[28].mxu0 %vm214_vm5, %v5986_v42 }
 0x47a   :  { %5441 = vmatpush3.bf16.msra.mxu0 %v5392_v17  ;;  %5117 = vmatprep.mubr.msk.f32.mxu0 %vm5748_vm4, %v5747_v28 }
 0x47b   :  { %5442 = vmatprep.subr.bf16.mxu0 %v5746_v14 }
 0x47e   :  { %5444 = vmatpush3.bf16.msra.mxu0 %v5395_v21 }
 0x47f   :  { %5451 = vmatprep.subr.bf16.mxu0 %v5746_v14 }
 0x481   :  { %5118 = vmatmul.mubr.msk.f32.vlgmr.msra.gmra.mrb[30].mxu0 %vm214_vm5, %v744_v11 }
 0x482   :  { %5453 = vmatpush3.bf16.msra.mxu0 %v5392_v17  ;;  %5139 = vmatprep.mubr.msk.f32.mxu0 %vm5748_vm4, %v5747_v28 }
 0x483   :  { %5454 = vmatprep.subr.bf16.mxu0 %v5746_v14 }
 0x486   :  { %5456 = vmatpush3.bf16.msra.mxu0 %v5395_v21 }
 0x487   :  { %5463 = vmatprep.subr.bf16.mxu0 %v5746_v14 }
 0x489   :  { %5140 = vmatmul.mubr.msk.f32.vlgmr.msra.gmra.mrb[32].mxu0 %vm214_vm5, %v570_v10 }
 0x48a   :  { %5465 = vmatpush3.bf16.msra.mxu0 %v5392_v17  ;;  %5161 = vmatprep.mubr.msk.f32.mxu0 %vm5748_vm4, %v5747_v28 }
 0x48b   :  { %5466 = vmatprep.subr.bf16.mxu0 %v5746_v14 }
 0x48e   :  { %5468 = vmatpush3.bf16.msra.mxu0 %v5395_v21 }
 0x48f   :  { %5475 = vmatprep.subr.bf16.mxu0 %v5746_v14 }
 0x491   :  { %5162 = vmatmul.mubr.msk.f32.vlgmr.msra.gmra.mrb[34].mxu0 %vm214_vm5, %v396_v45 }
 0x492   :  { %5477 = vmatpush3.bf16.msra.mxu0 %v5392_v17  ;;  %5183 = vmatprep.mubr.msk.f32.mxu0 %vm5748_vm4, %v5747_v28 }
 0x493   :  { %5478 = vmatprep.subr.bf16.mxu0 %v5746_v14 }
 0x496   :  { %5480 = vmatpush3.bf16.msra.mxu0 %v5395_v21 }
 0x499   :  { %5184 = vmatmul.mubr.msk.f32.vlgmr.msra.gmra.mrb[36].mxu0 %vm214_vm5, %v5988_v43 }
 0x4fc   :  { %v540_v22 = vpop.f32.mrb[8].mxu0 }
 0x4fd   :  { %v541_v25 = vadd.f32 %v6021_v48, %v540_v22  ;;  %v4888_v26 = vpop.f32.mrb[9].mxu0 }
 0x4ff   :  { %552 = vrot.lane.b32.xlu1 %v541_v25, %s5749_s6  ;;  %v544_v58 = vadd.f32 %v541_v25, %v466_v53 }
 0x501   :  { %v4528_v59 = vmul.f32 -1.442695, %v544_v58 }
 0x503   :  { %5597 = vpow2.f32 %v4528_v59 }
 0x504   :  { %v6157_v27 = vpop.f32.mrb[10].mxu0 }
 0x505   :  { %v4899_v29 = vpop.f32.mrb[11].mxu0 }
 0x50c   :  { %v6159_v30 = vpop.f32.mrb[12].mxu0 }
 0x50d   :  { %v4921_v31 = vpop.f32.mrb[13].mxu0  ;;  %v5598_v3 = vpop.eup %5597 }
 0x50e   :  { %v548_v52 = vadd.f32 1.0, %v5598_v3 }
 0x510   :  { %5599 = vrcp.f32 %v548_v52  ;;  %v814_v52 = vadd.f32 %v6030_v54, %v6159_v30 }
 0x514   :  { %v6161_v32 = vpop.f32.mrb[14].mxu0 }
 0x515   :  { %v4943_v33 = vpop.f32.mrb[15].mxu0 }
 0x516   :  { %v640_v33 = vadd.f32 %v6030_v54, %v6157_v27 }
 0x51a   :  { %v5600_v12 = vpop.eup %5599 }
 0x51b   :  { %v562_v19 = vsub.f32 1.0, %v5600_v12  ;;  %v568_v21 = vmul.f32 %v5600_v12, %v6036_v8 }
 0x51c   :  { %v6163_v34 = vpop.f32.mrb[16].mxu0 }
 0x51d   :  { %v4965_v35 = vpop.f32.mrb[17].mxu0 }
 0x524   :  { %v6165_v36 = vpop.f32.mrb[18].mxu0 }
 0x525   :  { %v4987_v37 = vpop.f32.mrb[19].mxu0 }
 0x52c   :  { %v6167_v39 = vpop.f32.mrb[20].mxu0 }
 0x52d   :  { %v5009_v40 = vpop.f32.mrb[21].mxu0 }
 0x534   :  { %v6169_v42 = vpop.f32.mrb[22].mxu0 }
 0x535   :  { %v5031_v43 = vpop.f32.mrb[23].mxu0 }
 0x53c   :  { %v1865_v45 = vpop.f32.mrb[24].mxu0 }
 0x53d   :  { %v6177_v46 = vadd.f32 %v6174_v44, %v1865_v45  ;;  %v5053_v47 = vpop.f32.mrb[25].mxu0 }
 0x544   :  { %v2036_v49 = vpop.f32.mrb[26].mxu0 }
 0x545   :  { %v6180_v50 = vadd.f32 %v6174_v44, %v2036_v49  ;;  %v5075_v51 = vpop.f32.mrb[27].mxu0 }
 0x54c   :  { %v2207_v55 = vpop.f32.mrb[28].mxu0 }
 0x54d   :  { %v6185_v56 = vadd.f32 %v6174_v44, %v2207_v55  ;;  %v5097_v57 = vpop.f32.mrb[29].mxu0 }
 0x554   :  { %v2378_v60 = vpop.f32.mrb[30].mxu0 }
 0x555   :  { %v6188_v61 = vadd.f32 %v6174_v44, %v2378_v60  ;;  %v5119_v62 = vpop.f32.mrb[31].mxu0 }
 0x55c   :  { %v2549_v63 = vpop.f32.mrb[32].mxu0 }
 0x55d   :  { %v6191_v0 = vadd.f32 %v6174_v44, %v2549_v63  ;;  %v5141_v1 = vpop.f32.mrb[33].mxu0 }
 0x564   :  { %v2720_v4 = vpop.f32.mrb[34].mxu0 }
 0x565   :  { %v6194_v5 = vadd.f32 %v6174_v44, %v2720_v4  ;;  %v5163_v6 = vpop.f32.mrb[35].mxu0 }
 0x56c   :  { %v2891_v7 = vpop.f32.mrb[36].mxu0 }
 0x56d   :  { %v6197_v10 = vadd.f32 %v6174_v44, %v2891_v7  ;;  %v5185_v11 = vpop.f32.mrb[37].mxu0 }
 0x571   :  { %v553_v13 = vpop.permute.xlu1 %552 }
 0x572   :  { %v555_v15 = vmul.f32 %v5600_v12, %v553_v13 }
 0x574   :  { %557 = vrot.lane.b32.xlu0 %v555_v15, %s5749_s6 }
 0x5e6   :  { %v558_v16 = vpop.permute.xlu0 %557 }
 0x5e7   :  { %v560_v17 = vadd.f32 %v558_v16, %v466_v53 }
 0x5e9   :  { %5601 = vtanh.f32 %v560_v17 }
 0x5f3   :  { %v5602_v18 = vpop.eup %5601 }
 0x5f4   :  { %564 = vrot.lane.b32.xlu1 %v5602_v18, %s5751_s3 }
 0x666   :  { %v565_v20 = vpop.permute.xlu1 %564 }
 0x667   :  { %v567_v22 = vmul.f32 %v565_v20, %v562_v19 }
 0x669   :  { %v569_v25 = vadd.f32 %v568_v21, %v567_v22 }
 0x66b   :  { %644 = vrot.lane.b32.xlu0 %v569_v25, %s5751_s3 }
 0x6dd   :  { %v6203_v26 = vpop.permute.xlu0 %644 }
 0x6de   :  { %4909 = vmatmul.mubr.msk.f32.vlgmr.msra.gmra.mrb[0].mxu1 %vm214_vm5, %v6203_v26 }
 0x6df   :  { %5339 = vmatpush3.bf16.msra.mxu1 %v5968_v38  ;;  %4930 = vmatprep.mubr.msk.f32.mxu1 %vm5748_vm4, %v5747_v28 }
 0x6e0   :  { %5340 = vmatprep.subr.bf16.mxu1 %v5746_v14 }
 0x6e3   :  { %5342 = vmatpush3.bf16.msra.mxu1 %v5982_v41 }
 0x6e4   :  { %5349 = vmatprep.subr.bf16.mxu1 %v5746_v14 }
 0x7b1   :  { %v714_v8 = vpop.f32.mrb[0].mxu1 }
 0x7b2   :  { %v715_v29 = vadd.f32 %v6021_v48, %v714_v8  ;;  %v4910_v31 = vpop.f32.mrb[1].mxu1 }
 0x7b4   :  { %726 = vrot.lane.b32.xlu1 %v715_v29, %s5749_s6  ;;  %v718_v35 = vadd.f32 %v715_v29, %v640_v33 }
 0x7b6   :  { %v4531_v37 = vmul.f32 -1.442695, %v718_v35 }
 0x7b8   :  { %5603 = vpow2.f32 %v4531_v37 }
 0x7c2   :  { %v5604_v40 = vpop.eup %5603 }
 0x7c3   :  { %v722_v43 = vadd.f32 1.0, %v5604_v40 }
 0x7c5   :  { %5605 = vrcp.f32 %v722_v43 }
 0x7cf   :  { %v5606_v45 = vpop.eup %5605 }
 0x7d0   :  { %v736_v57 = vsub.f32 1.0, %v5606_v45  ;;  %v742_v27 = vmul.f32 %v5606_v45, %v569_v25 }
 0x826   :  { %v727_v47 = vpop.permute.xlu1 %726 }
 0x827   :  { %v729_v49 = vmul.f32 %v5606_v45, %v727_v47 }
 0x829   :  { %731 = vrot.lane.b32.xlu0 %v729_v49, %s5749_s6 }
 0x89b   :  { %v732_v51 = vpop.permute.xlu0 %731 }
 0x89c   :  { %v734_v53 = vadd.f32 %v732_v51, %v640_v33  ;;  %v988_v33 = vadd.f32 %v6030_v54, %v6161_v32 }
 0x89e   :  { %5607 = vtanh.f32 %v734_v53 }
 0x8a8   :  { %v5608_v55 = vpop.eup %5607 }
 0x8a9   :  { %738 = vrot.lane.b32.xlu1 %v5608_v55, %s5751_s3 }
 0x91b   :  { %v739_v58 = vpop.permute.xlu1 %738 }
 0x91c   :  { %v741_v59 = vmul.f32 %v739_v58, %v736_v57 }
 0x91e   :  { %v743_v60 = vadd.f32 %v742_v27, %v741_v59 }
 0x920   :  { %818 = vrot.lane.b32.xlu0 %v743_v60, %s5751_s3 }
 0x992   :  { %v6220_v62 = vpop.permute.xlu0 %818 }
 0x993   :  { %4931 = vmatmul.mubr.msk.f32.vlgmr.msra.gmra.mrb[2].mxu1 %vm214_vm5, %v6220_v62 }
 0x994   :  { %5351 = vmatpush3.bf16.msra.mxu1 %v5968_v38  ;;  %4952 = vmatprep.mubr.msk.f32.mxu1 %vm5748_vm4, %v5747_v28 }
 0x995   :  { %5352 = vmatprep.subr.bf16.mxu1 %v5746_v14 }
 0x998   :  { %5354 = vmatpush3.bf16.msra.mxu1 %v5982_v41 }
 0x999   :  { %5361 = vmatprep.subr.bf16.mxu1 %v5746_v14 }
 0xa66   :  { %v888_v63 = vpop.f32.mrb[2].mxu1 }
 0xa67   :  { %v889_v1 = vadd.f32 %v6021_v48, %v888_v63  ;;  %v4932_v3 = vpop.f32.mrb[3].mxu1 }
 0xa69   :  { %900 = vrot.lane.b32.xlu1 %v889_v1, %s5749_s6  ;;  %v892_v4 = vadd.f32 %v889_v1, %v814_v52 }
 0xa6b   :  { %v4534_v6 = vmul.f32 -1.442695, %v892_v4 }
 0xa6d   :  { %5609 = vpow2.f32 %v4534_v6 }
 0xa77   :  { %v5610_v7 = vpop.eup %5609 }
 0xa78   :  { %v896_v11 = vadd.f32 1.0, %v5610_v7 }
 0xa7a   :  { %5611 = vrcp.f32 %v896_v11 }
 0xa84   :  { %v5612_v12 = vpop.eup %5611 }
 0xa85   :  { %v910_v19 = vsub.f32 1.0, %v5612_v12  ;;  %v916_v30 = vmul.f32 %v5612_v12, %v743_v60 }
 0xadb   :  { %v901_v13 = vpop.permute.xlu1 %900 }
 0xadc   :  { %v903_v15 = vmul.f32 %v5612_v12, %v901_v13 }
 0xade   :  { %905 = vrot.lane.b32.xlu0 %v903_v15, %s5749_s6 }
 0xb50   :  { %v906_v16 = vpop.permute.xlu0 %905 }
 0xb51   :  { %v908_v17 = vadd.f32 %v906_v16, %v814_v52  ;;  %v1162_v52 = vadd.f32 %v6030_v54, %v6163_v34 }
 0xb53   :  { %5613 = vtanh.f32 %v908_v17 }
 0xb5d   :  { %v5614_v18 = vpop.eup %5613 }
 0xb5e   :  { %912 = vrot.lane.b32.xlu1 %v5614_v18, %s5751_s3 }
 0xbd0   :  { %v913_v20 = vpop.permute.xlu1 %912 }
 0xbd1   :  { %v915_v21 = vmul.f32 %v913_v20, %v910_v19 }
 0xbd3   :  { %v917_v22 = vadd.f32 %v916_v30, %v915_v21 }
 0xbd5   :  { %992 = vrot.lane.b32.xlu0 %v917_v22, %s5751_s3 }
 0xc47   :  { %v6237_v25 = vpop.permute.xlu0 %992 }
 0xc48   :  { %4953 = vmatmul.mubr.msk.f32.vlgmr.msra.gmra.mrb[4].mxu1 %vm214_vm5, %v6237_v25 }
 0xc49   :  { %5363 = vmatpush3.bf16.msra.mxu1 %v5968_v38  ;;  %4974 = vmatprep.mubr.msk.f32.mxu1 %vm5748_vm4, %v5747_v28 }
 0xc4a   :  { %5364 = vmatprep.subr.bf16.mxu1 %v5746_v14 }
 0xc4d   :  { %5366 = vmatpush3.bf16.msra.mxu1 %v5982_v41 }
 0xc4e   :  { %5373 = vmatprep.subr.bf16.mxu1 %v5746_v14 }
 0xd1b   :  { %v1062_v8 = vpop.f32.mrb[4].mxu1 }
 0xd1c   :  { %v1063_v29 = vadd.f32 %v6021_v48, %v1062_v8  ;;  %v4954_v31 = vpop.f32.mrb[5].mxu1 }
 0xd1e   :  { %1074 = vrot.lane.b32.xlu1 %v1063_v29, %s5749_s6  ;;  %v1066_v35 = vadd.f32 %v1063_v29, %v988_v33 }
 0xd20   :  { %v4537_v37 = vmul.f32 -1.442695, %v1066_v35 }
 0xd22   :  { %5615 = vpow2.f32 %v4537_v37 }
 0xd2c   :  { %v5616_v40 = vpop.eup %5615 }
 0xd2d   :  { %v1070_v43 = vadd.f32 1.0, %v5616_v40 }
 0xd2f   :  { %5617 = vrcp.f32 %v1070_v43 }
 0xd39   :  { %v5618_v45 = vpop.eup %5617 }
 0xd3a   :  { %v1084_v57 = vsub.f32 1.0, %v5618_v45  ;;  %v1090_v32 = vmul.f32 %v5618_v45, %v917_v22 }
 0xd90   :  { %v1075_v47 = vpop.permute.xlu1 %1074 }
 0xd91   :  { %v1077_v49 = vmul.f32 %v5618_v45, %v1075_v47 }
 0xd93   :  { %1079 = vrot.lane.b32.xlu0 %v1077_v49, %s5749_s6 }
 0xe05   :  { %v1080_v51 = vpop.permute.xlu0 %1079 }
 0xe06   :  { %v1082_v53 = vadd.f32 %v1080_v51, %v988_v33  ;;  %v1336_v33 = vadd.f32 %v6030_v54, %v6165_v36 }
 0xe08   :  { %5619 = vtanh.f32 %v1082_v53 }
 0xe12   :  { %v5620_v55 = vpop.eup %5619 }
 0xe13   :  { %1086 = vrot.lane.b32.xlu1 %v5620_v55, %s5751_s3 }
 0xe85   :  { %v1087_v58 = vpop.permute.xlu1 %1086 }
 0xe86   :  { %v1089_v27 = vmul.f32 %v1087_v58, %v1084_v57  ;;  %v201_v57 = vld [vmem:[%s7048_s9] sm:$0xff]  ;;  %v202_v58 = vld [vmem:[%s7048_s9 + $0x8] sm:$0xff] }
 0xe88   :  { %v1091_v59 = vadd.f32 %v1090_v32, %v1089_v27  ;;  %v6297_v32 = vpack.c.bf16 %v202_v58, %v201_v57  ;;  %v203_v27 = vld [vmem:[%s7048_s9 + $0x10] sm:$0xff] }
 0xe8a   :  { %1166 = vrot.lane.b32.xlu0 %v1091_v59, %s5751_s3 }
 0xefc   :  { %v6254_v60 = vpop.permute.xlu0 %1166 }
 0xefd   :  { %4975 = vmatmul.mubr.msk.f32.vlgmr.msra.gmra.mrb[6].mxu1 %vm214_vm5, %v6254_v60 }
 0xefe   :  { %5375 = vmatpush3.bf16.msra.mxu1 %v5968_v38  ;;  %4996 = vmatprep.mubr.msk.f32.mxu1 %vm5748_vm4, %v5747_v28 }
 0xeff   :  { %5376 = vmatprep.subr.bf16.mxu1 %v5746_v14 }
 0xf02   :  { %5378 = vmatpush3.bf16.msra.mxu1 %v5982_v41 }
 0xf03   :  { %5385 = vmatprep.subr.bf16.mxu1 %v5746_v14 }
 0xfd0   :  { %v1236_v63 = vpop.f32.mrb[6].mxu1 }
 0xfd1   :  { %v1237_v1 = vadd.f32 %v6021_v48, %v1236_v63  ;;  %v4976_v3 = vpop.f32.mrb[7].mxu1 }
 0xfd2   :  { %v1614_v3 = vld [vmem:[%s7085_s24] sm:$0x3] }
 0xfd3   :  { %1248 = vrot.lane.b32.xlu1 %v1237_v1, %s5749_s6  ;;  %v1240_v4 = vadd.f32 %v1237_v1, %v1162_v52 }
 0xfd5   :  { %v4540_v6 = vmul.f32 -1.442695, %v1240_v4 }
 0xfd7   :  { %5621 = vpow2.f32 %v4540_v6  ;;  %v6332_v6 = vld [vmem:[%s7050_s11] ss:$0 sm:$0xff] }
 0xfe1   :  { %v5622_v7 = vpop.eup %5621 }
 0xfe2   :  { %v1244_v11 = vadd.f32 1.0, %v5622_v7 }
 0xfe4   :  { %5623 = vrcp.f32 %v1244_v11 }
 0xfee   :  { %v5624_v12 = vpop.eup %5623 }
 0xfef   :  { %v1258_v19 = vsub.f32 1.0, %v5624_v12  ;;  %v1264_v34 = vmul.f32 %v5624_v12, %v1091_v59  ;;  %v204_v59 = vld [vmem:[%s7048_s9 + $0x18] sm:$0xff]  ;;  %s5763_s9 = smov [#allocation2]  }
 0xff0   :  { %v6310_v1 = vpack.c.bf16 %v204_v59, %v203_v27  ;;  %s4500_s8 = sshll.u32 %s5763_s9, 4  ;;  %s4501_s8 = int_to_ptr.vmem [resolvable:$true] %s4500_s8 }
 0xff1   :  { %s5721_s11 = scalar_lea.vmem %s4501_s8, 32  ;;  %p5726_p1 = scmp.lt.s32.totalorder %s4501_s8, %s4501_s8 }
 0xff2   :  { %p5722_p0 = scmp.ne.s32.totalorder %s4501_s8, %s5721_s11  ;;  %p5727_p2 = scmp.lt.s32.totalorder %s5721_s11, %s5721_s11 }
 0xff4   :  { %p5728_p3 = por %p5727_p2, %p5726_p1 }
 0xff6   :  { %p5729_p4 = pnand %p5728_p3, %p5722_p0 }
0x1045   :  { %v1249_v13 = vpop.permute.xlu1 %1248 }
0x1046   :  { %v1251_v15 = vmul.f32 %v5624_v12, %v1249_v13  ;;  %v1688_v13 = vadd.f32 %v6174_v44, %v6169_v42 }
0x1048   :  { %1253 = vrot.lane.b32.xlu0 %v1251_v15, %s5749_s6 }
0x10ba   :  { %v1254_v16 = vpop.permute.xlu0 %1253 }
0x10bb   :  { %v1256_v17 = vadd.f32 %v1254_v16, %v1162_v52 }
0x10bd   :  { %5625 = vtanh.f32 %v1256_v17 }
0x10c7   :  { %v5626_v18 = vpop.eup %5625 }
0x10c8   :  { %1260 = vrot.lane.b32.xlu1 %v5626_v18, %s5751_s3 }
0x113a   :  { %v1261_v20 = vpop.permute.xlu1 %1260 }
0x113b   :  { %v1263_v30 = vmul.f32 %v1261_v20, %v1258_v19 }
0x113d   :  { %v1265_v21 = vadd.f32 %v1264_v34, %v1263_v30 }
0x113f   :  { %1340 = vrot.lane.b32.xlu0 %v1265_v21, %s5751_s3 }
0x11b1   :  { %v6271_v22 = vpop.permute.xlu0 %1340 }
0x11b2   :  { %4997 = vmatmul.mubr.msk.f32.vlgmr.msra.gmra.mrb[8].mxu1 %vm214_vm5, %v6271_v22 }
0x11b3   :  { %5387 = vmatpush3.bf16.msra.mxu1 %v5968_v38  ;;  %5018 = vmatprep.mubr.msk.f32.mxu1 %vm5748_vm4, %v5747_v28 }
0x11b4   :  { %5388 = vmatprep.subr.bf16.mxu1 %v5746_v14 }
0x11b7   :  { %5390 = vmatpush3.bf16.msra.mxu1 %v5982_v41 }
0x11b8   :  { %5397 = vmatprep.subr.bf16.mxu1 %v5746_v14 }
0x1285   :  { %v1410_v8 = vpop.f32.mrb[8].mxu1 }
0x1286   :  { %v1411_v29 = vadd.f32 %v6021_v48, %v1410_v8  ;;  %v4998_v31 = vpop.f32.mrb[9].mxu1 }
0x1288   :  { %1422 = vrot.lane.b32.xlu1 %v1411_v29, %s5749_s6  ;;  %v1414_v35 = vadd.f32 %v1411_v29, %v1336_v33 }
0x128a   :  { %v4543_v38 = vmul.f32 -1.442695, %v1414_v35 }
0x128c   :  { %5627 = vpow2.f32 %v4543_v38 }
0x1296   :  { %v5628_v37 = vpop.eup %5627 }
0x1297   :  { %v1418_v40 = vadd.f32 1.0, %v5628_v37 }
0x1299   :  { %5629 = vrcp.f32 %v1418_v40 }
0x12a3   :  { %v5630_v43 = vpop.eup %5629 }
0x12a4   :  { %v1432_v51 = vsub.f32 1.0, %v5630_v43  ;;  %v1438_v54 = vmul.f32 %v5630_v43, %v1265_v21 }
0x12fa   :  { %v1423_v45 = vpop.permute.xlu1 %1422 }
0x12fb   :  { %v1425_v41 = vmul.f32 %v5630_v43, %v1423_v45 }
0x12fd   :  { %1427 = vrot.lane.b32.xlu0 %v1425_v41, %s5749_s6 }
0x136f   :  { %v1428_v47 = vpop.permute.xlu0 %1427 }
0x1370   :  { %v1430_v49 = vadd.f32 %v1428_v47, %v1336_v33 }
0x1372   :  { %5631 = vtanh.f32 %v1430_v49 }
0x137c   :  { %v5632_v48 = vpop.eup %5631 }
0x137d   :  { %1434 = vrot.lane.b32.xlu1 %v5632_v48, %s5751_s3 }
0x13ef   :  { %v1435_v53 = vpop.permute.xlu1 %1434 }
0x13f0   :  { %v1437_v36 = vmul.f32 %v1435_v53, %v1432_v51 }
0x13f2   :  { %v6287_v55 = vadd.f32 %v1438_v54, %v1437_v36 }
0x13f4   :  { %1514 = vrot.lane.b32.xlu0 %v6287_v55, %s5751_s3 }
0x1466   :  { %v6305_v63 = vpop.permute.xlu0 %1514 }
0x1467   :  { %5019 = vmatmul.mubr.msk.f32.vlgmr.msra.gmra.mrb[10].mxu1 %vm214_vm5, %v6305_v63 }
0x1468   :  { %5399 = vmatpush3.bf16.msra.mxu1 %v6297_v32  ;;  %5040 = vmatprep.mubr.msk.f32.mxu1 %vm5748_vm4, %v5747_v28 }
0x1469   :  { %5400 = vmatprep.subr.bf16.mxu1 %v5746_v14 }
0x146c   :  { %5402 = vmatpush3.bf16.msra.mxu1 %v6310_v1 }
0x146d   :  { %5409 = vmatprep.subr.bf16.mxu1 %v5746_v14 }
0x146f   :  { %5041 = vmatmul.mubr.msk.f32.vlgmr.msra.gmra.mrb[12].mxu1 %vm214_vm5, %v1614_v3 }
0x1470   :  { %5411 = vmatpush3.bf16.msra.mxu1 %v6297_v32  ;;  %5062 = vmatprep.mubr.msk.f32.mxu1 %vm5748_vm4, %v5747_v28 }
0x1471   :  { %5412 = vmatprep.subr.bf16.mxu1 %v5746_v14 }
0x1474   :  { %5414 = vmatpush3.bf16.msra.mxu1 %v6310_v1 }
0x1475   :  { %5421 = vmatprep.subr.bf16.mxu1 %v5746_v14 }
0x153a   :  { %v6327_v52 = vpop.f32.mrb[10].mxu1 }
0x153b   :  { %v5020_v4 = vpop.f32.mrb[11].mxu1 }
0x1542   :  { %v1766_v7 = vpop.f32.mrb[12].mxu1 }
0x1543   :  { %v1767_v11 = vadd.f32 %v6332_v6, %v1766_v7  ;;  %v5042_v12 = vpop.f32.mrb[13].mxu1 }
0x1545   :  { %1778 = vrot.lane.b32.xlu1 %v1767_v11, %s5749_s6  ;;  %v1770_v15 = vadd.f32 %v1767_v11, %v1688_v13 }
0x1547   :  { %v4551_v16 = vmul.f32 -1.442695, %v1770_v15 }
0x1549   :  { %5633 = vpow2.f32 %v4551_v16 }
0x1553   :  { %v5634_v17 = vpop.eup %5633 }
0x1554   :  { %v1774_v18 = vadd.f32 1.0, %v5634_v17 }
0x1556   :  { %5635 = vrcp.f32 %v1774_v18 }
0x1560   :  { %v5636_v19 = vpop.eup %5635 }
0x1561   :  { %v1788_v44 = vsub.f32 1.0, %v5636_v19 }
0x15b7   :  { %v1779_v20 = vpop.permute.xlu1 %1778 }
0x15b8   :  { %v1781_v34 = vmul.f32 %v5636_v19, %v1779_v20 }
0x15ba   :  { %1783 = vrot.lane.b32.xlu0 %v1781_v34, %s5749_s6 }
0x15be   :  { %1794 = vrot.lane.b32.xlu0 %v1614_v3, %s5750_s29 }
0x162c   :  { %v1784_v30 = vpop.permute.xlu0 %1783 }
0x162d   :  { %v1786_v21 = vadd.f32 %v1784_v30, %v1688_v13 }
0x162f   :  { %5637 = vtanh.f32 %v1786_v21 }
0x1630   :  { %v1795_v42 = vpop.permute.xlu0 %1794 }
0x1631   :  { %v1797_v31 = vmul.f32 %v5636_v19, %v1795_v42 }
0x1639   :  { %v5638_v8 = vpop.eup %5637 }
0x163a   :  { %1790 = vrot.lane.b32.xlu1 %v5638_v8, %s5751_s3 }
0x16ac   :  { %v1791_v29 = vpop.permute.xlu1 %1790 }
0x16ad   :  { %v1793_v33 = vmul.f32 %v1791_v29, %v1788_v44 }
0x16af   :  { %v6341_v35 = vadd.f32 %v1797_v31, %v1793_v33 }
0x16b1   :  { %1870 = vrot.lane.b32.xlu1 %v6341_v35, %s5751_s3 }
0x1723   :  { %v1871_v38 = vpop.permute.xlu1 %1870 }
0x1724   :  { %5063 = vmatmul.mubr.msk.f32.vlgmr.msra.gmra.mrb[14].mxu1 %vm214_vm5, %v1871_v38 }
0x1725   :  { %5423 = vmatpush3.bf16.msra.mxu1 %v6297_v32  ;;  %5084 = vmatprep.mubr.msk.f32.mxu1 %vm5748_vm4, %v5747_v28 }
0x1726   :  { %5424 = vmatprep.subr.bf16.mxu1 %v5746_v14 }
0x1729   :  { %5426 = vmatpush3.bf16.msra.mxu1 %v6310_v1 }
0x172a   :  { %5433 = vmatprep.subr.bf16.mxu1 %v5746_v14 }
0x17f7   :  { %v1940_v37 = vpop.f32.mrb[14].mxu1 }
0x17f8   :  { %v1941_v40 = vadd.f32 %v6332_v6, %v1940_v37  ;;  %v5064_v43 = vpop.f32.mrb[15].mxu1 }
0x17fa   :  { %1952 = vrot.lane.b32.xlu0 %v1941_v40, %s5749_s6  ;;  %v1944_v45 = vadd.f32 %v1941_v40, %v6177_v46 }
0x17fc   :  { %v4554_v41 = vmul.f32 -1.442695, %v1944_v45 }
0x17fe   :  { %5639 = vpow2.f32 %v4554_v41 }
0x1808   :  { %v5640_v47 = vpop.eup %5639 }
0x1809   :  { %v1948_v49 = vadd.f32 1.0, %v5640_v47 }
0x180b   :  { %5641 = vrcp.f32 %v1948_v49 }
0x1815   :  { %v5642_v48 = vpop.eup %5641 }
0x1816   :  { %v1962_v58 = vsub.f32 1.0, %v5642_v48  ;;  %v1968_v59 = vmul.f32 %v5642_v48, %v6341_v35 }
0x186c   :  { %v1953_v51 = vpop.permute.xlu0 %1952 }
0x186d   :  { %v1955_v53 = vmul.f32 %v5642_v48, %v1953_v51 }
0x186f   :  { %1957 = vrot.lane.b32.xlu1 %v1955_v53, %s5749_s6 }
0x18e1   :  { %v1958_v54 = vpop.permute.xlu1 %1957 }
0x18e2   :  { %v1960_v36 = vadd.f32 %v1958_v54, %v6177_v46 }
0x18e4   :  { %5643 = vtanh.f32 %v1960_v36 }
0x18ee   :  { %v5644_v57 = vpop.eup %5643 }
0x18ef   :  { %1964 = vrot.lane.b32.xlu0 %v5644_v57, %s5751_s3 }
0x1961   :  { %v1965_v27 = vpop.permute.xlu0 %1964 }
0x1962   :  { %v1967_v3 = vmul.f32 %v1965_v27, %v1962_v58 }
0x1964   :  { %v6359_v4 = vadd.f32 %v1968_v59, %v1967_v3 }
0x1966   :  { %2041 = vrot.lane.b32.xlu1 %v6359_v4, %s5751_s3 }
0x19d8   :  { %v2042_v7 = vpop.permute.xlu1 %2041 }
0x19d9   :  { %5085 = vmatmul.mubr.msk.f32.vlgmr.msra.gmra.mrb[16].mxu1 %vm214_vm5, %v2042_v7 }
0x19da   :  { %5435 = vmatpush3.bf16.msra.mxu1 %v6297_v32  ;;  %5106 = vmatprep.mubr.msk.f32.mxu1 %vm5748_vm4, %v5747_v28 }
0x19db   :  { %5436 = vmatprep.subr.bf16.mxu1 %v5746_v14 }
0x19de   :  { %5438 = vmatpush3.bf16.msra.mxu1 %v6310_v1 }
0x19df   :  { %5445 = vmatprep.subr.bf16.mxu1 %v5746_v14 }
0x1aac   :  { %v2111_v46 = vpop.f32.mrb[16].mxu1 }
0x1aad   :  { %v2112_v11 = vadd.f32 %v6332_v6, %v2111_v46  ;;  %v5086_v12 = vpop.f32.mrb[17].mxu1 }
0x1aaf   :  { %2123 = vrot.lane.b32.xlu0 %v2112_v11, %s5749_s6  ;;  %v2115_v13 = vadd.f32 %v2112_v11, %v6180_v50 }
0x1ab1   :  { %v4557_v15 = vmul.f32 -1.442695, %v2115_v13 }
0x1ab3   :  { %5645 = vpow2.f32 %v4557_v15 }
0x1abd   :  { %v5646_v16 = vpop.eup %5645 }
0x1abe   :  { %v2119_v17 = vadd.f32 1.0, %v5646_v16 }
0x1ac0   :  { %5647 = vrcp.f32 %v2119_v17 }
0x1aca   :  { %v5648_v18 = vpop.eup %5647 }
0x1acb   :  { %v2133_v8 = vsub.f32 1.0, %v5648_v18  ;;  %v2139_v44 = vmul.f32 %v5648_v18, %v6359_v4 }
0x1b21   :  { %v2124_v19 = vpop.permute.xlu0 %2123 }
0x1b22   :  { %v2126_v20 = vmul.f32 %v5648_v18, %v2124_v19 }
0x1b24   :  { %2128 = vrot.lane.b32.xlu1 %v2126_v20, %s5749_s6 }
0x1b96   :  { %v2129_v34 = vpop.permute.xlu1 %2128 }
0x1b97   :  { %v2131_v30 = vadd.f32 %v2129_v34, %v6180_v50 }
0x1b99   :  { %5649 = vtanh.f32 %v2131_v30 }
0x1ba3   :  { %v5650_v21 = vpop.eup %5649 }
0x1ba4   :  { %2135 = vrot.lane.b32.xlu0 %v5650_v21, %s5751_s3 }
0x1c16   :  { %v2136_v42 = vpop.permute.xlu0 %2135 }
0x1c17   :  { %v2138_v29 = vmul.f32 %v2136_v42, %v2133_v8 }
0x1c19   :  { %v6377_v31 = vadd.f32 %v2139_v44, %v2138_v29 }
0x1c1b   :  { %2212 = vrot.lane.b32.xlu1 %v6377_v31, %s5751_s3 }
0x1c8d   :  { %v2213_v33 = vpop.permute.xlu1 %2212 }
0x1c8e   :  { %5107 = vmatmul.mubr.msk.f32.vlgmr.msra.gmra.mrb[18].mxu1 %vm214_vm5, %v2213_v33 }
0x1c8f   :  { %5447 = vmatpush3.bf16.msra.mxu1 %v6297_v32  ;;  %5128 = vmatprep.mubr.msk.f32.mxu1 %vm5748_vm4, %v5747_v28 }
0x1c90   :  { %5448 = vmatprep.subr.bf16.mxu1 %v5746_v14 }
0x1c93   :  { %5450 = vmatpush3.bf16.msra.mxu1 %v6310_v1 }
0x1c94   :  { %5457 = vmatprep.subr.bf16.mxu1 %v5746_v14 }
0x1d61   :  { %v2282_v50 = vpop.f32.mrb[18].mxu1 }
0x1d62   :  { %v2283_v38 = vadd.f32 %v6332_v6, %v2282_v50  ;;  %v5108_v37 = vpop.f32.mrb[19].mxu1 }
0x1d64   :  { %2294 = vrot.lane.b32.xlu0 %v2283_v38, %s5749_s6  ;;  %v2286_v40 = vadd.f32 %v2283_v38, %v6185_v56 }
0x1d66   :  { %v4560_v43 = vmul.f32 -1.442695, %v2286_v40 }
0x1d68   :  { %5651 = vpow2.f32 %v4560_v43 }
0x1d72   :  { %v5652_v45 = vpop.eup %5651 }
0x1d73   :  { %v2290_v41 = vadd.f32 1.0, %v5652_v45 }
0x1d75   :  { %5653 = vrcp.f32 %v2290_v41 }
0x1d7f   :  { %v5654_v47 = vpop.eup %5653 }
0x1d80   :  { %v2304_v36 = vsub.f32 1.0, %v5654_v47  ;;  %v2310_v58 = vmul.f32 %v5654_v47, %v6377_v31 }
0x1dd6   :  { %v2295_v49 = vpop.permute.xlu0 %2294 }
0x1dd7   :  { %v2297_v48 = vmul.f32 %v5654_v47, %v2295_v49 }
0x1dd9   :  { %2299 = vrot.lane.b32.xlu1 %v2297_v48, %s5749_s6 }
0x1e4b   :  { %v2300_v51 = vpop.permute.xlu1 %2299 }
0x1e4c   :  { %v2302_v53 = vadd.f32 %v2300_v51, %v6185_v56 }
0x1e4e   :  { %5655 = vtanh.f32 %v2302_v53 }
0x1e58   :  { %v5656_v54 = vpop.eup %5655 }
0x1e59   :  { %2306 = vrot.lane.b32.xlu0 %v5656_v54, %s5751_s3 }
0x1ecb   :  { %v2307_v57 = vpop.permute.xlu0 %2306 }
0x1ecc   :  { %v2309_v27 = vmul.f32 %v2307_v57, %v2304_v36 }
0x1ece   :  { %v6395_v59 = vadd.f32 %v2310_v58, %v2309_v27 }
0x1ed0   :  { %2383 = vrot.lane.b32.xlu1 %v6395_v59, %s5751_s3 }
0x1f42   :  { %v2384_v3 = vpop.permute.xlu1 %2383 }
0x1f43   :  { %5129 = vmatmul.mubr.msk.f32.vlgmr.msra.gmra.mrb[20].mxu1 %vm214_vm5, %v2384_v3 }
0x1f44   :  { %5459 = vmatpush3.bf16.msra.mxu1 %v6297_v32  ;;  %5150 = vmatprep.mubr.msk.f32.mxu1 %vm5748_vm4, %v5747_v28 }
0x1f45   :  { %5460 = vmatprep.subr.bf16.mxu1 %v5746_v14 }
0x1f48   :  { %5462 = vmatpush3.bf16.msra.mxu1 %v6310_v1 }
0x1f49   :  { %5469 = vmatprep.subr.bf16.mxu1 %v5746_v14 }
0x2016   :  { %v2453_v56 = vpop.f32.mrb[20].mxu1 }
0x2017   :  { %v2454_v7 = vadd.f32 %v6332_v6, %v2453_v56  ;;  %v5130_v46 = vpop.f32.mrb[21].mxu1 }
0x2019   :  { %2465 = vrot.lane.b32.xlu0 %v2454_v7, %s5749_s6  ;;  %v2457_v11 = vadd.f32 %v2454_v7, %v6188_v61 }
0x201b   :  { %v4563_v12 = vmul.f32 -1.442695, %v2457_v11 }
0x201d   :  { %5657 = vpow2.f32 %v4563_v12 }
0x2027   :  { %v5658_v13 = vpop.eup %5657 }
0x2028   :  { %v2461_v15 = vadd.f32 1.0, %v5658_v13 }
0x202a   :  { %5659 = vrcp.f32 %v2461_v15 }
0x2034   :  { %v5660_v16 = vpop.eup %5659 }
0x2035   :  { %v2475_v30 = vsub.f32 1.0, %v5660_v16  ;;  %v2481_v8 = vmul.f32 %v5660_v16, %v6395_v59 }
0x208b   :  { %v2466_v17 = vpop.permute.xlu0 %2465 }
0x208c   :  { %v2468_v18 = vmul.f32 %v5660_v16, %v2466_v17 }
0x208e   :  { %2470 = vrot.lane.b32.xlu1 %v2468_v18, %s5749_s6  ;;  %v5719_v18 = vld [vmem:[%s7083_s2] ss:$0 sm:$0xff]  ;;  %s5756_s2 = smov 1  }
0x2100   :  { %v2471_v19 = vpop.permute.xlu1 %2470 }
0x2101   :  { %v2473_v20 = vadd.f32 %v2471_v19, %v6188_v61  ;;  %v1585_v19 = vadd.f32 %v5719_v18, %v6327_v52 }
0x2103   :  { %5661 = vtanh.f32 %v2473_v20  ;;  %v5720_v20 = vld [vmem:[%s7084_s28] ss:$0 sm:$0xff]  ;;  %s5758_s28 = smov 4  }
0x210d   :  { %v5662_v34 = vpop.eup %5661 }
0x210e   :  { %2477 = vrot.lane.b32.xlu0 %v5662_v34, %s5751_s3  ;;  %v1510_v34 = vadd.f32 %v5720_v20, %v6167_v39 }
0x2180   :  { %v2478_v21 = vpop.permute.xlu0 %2477 }
0x2181   :  { %v2480_v42 = vmul.f32 %v2478_v21, %v2475_v30  ;;  %v1588_v30 = vadd.f32 %v1585_v19, %v1510_v34 }
0x2183   :  { %v6413_v44 = vadd.f32 %v2481_v8, %v2480_v42 }
0x2185   :  { %2554 = vrot.lane.b32.xlu1 %v6413_v44, %s5751_s3 }
0x21f7   :  { %v2555_v29 = vpop.permute.xlu1 %2554 }
0x21f8   :  { %5151 = vmatmul.mubr.msk.f32.vlgmr.msra.gmra.mrb[22].mxu1 %vm214_vm5, %v2555_v29 }
0x21f9   :  { %5471 = vmatpush3.bf16.msra.mxu1 %v6297_v32  ;;  %5172 = vmatprep.mubr.msk.f32.mxu1 %vm5748_vm4, %v5747_v28 }
0x21fa   :  { %5472 = vmatprep.subr.bf16.mxu1 %v5746_v14 }
0x21fd   :  { %5474 = vmatpush3.bf16.msra.mxu1 %v6310_v1 }
0x21fe   :  { %5481 = vmatprep.subr.bf16.mxu1 %v5746_v14 }
0x22cb   :  { %v2624_v61 = vpop.f32.mrb[22].mxu1 }
0x22cc   :  { %v2625_v33 = vadd.f32 %v6332_v6, %v2624_v61  ;;  %v5152_v50 = vpop.f32.mrb[23].mxu1 }
0x22ce   :  { %2636 = vrot.lane.b32.xlu0 %v2625_v33, %s5749_s6  ;;  %v2628_v38 = vadd.f32 %v2625_v33, %v6191_v0 }
0x22d0   :  { %v4566_v37 = vmul.f32 -1.442695, %v2628_v38 }
0x22d2   :  { %5663 = vpow2.f32 %v4566_v37 }
0x22dc   :  { %v5664_v40 = vpop.eup %5663 }
0x22dd   :  { %v2632_v43 = vadd.f32 1.0, %v5664_v40 }
0x22df   :  { %5665 = vrcp.f32 %v2632_v43 }
0x22e9   :  { %v5666_v45 = vpop.eup %5665 }
0x22ea   :  { %v2646_v53 = vsub.f32 1.0, %v5666_v45  ;;  %v2652_v36 = vmul.f32 %v5666_v45, %v6413_v44 }
0x2340   :  { %v2637_v41 = vpop.permute.xlu0 %2636 }
0x2341   :  { %v2639_v47 = vmul.f32 %v5666_v45, %v2637_v41 }
0x2343   :  { %2641 = vrot.lane.b32.xlu1 %v2639_v47, %s5749_s6 }
0x23b5   :  { %v2642_v49 = vpop.permute.xlu1 %2641 }
0x23b6   :  { %v2644_v48 = vadd.f32 %v2642_v49, %v6191_v0 }
0x23b8   :  { %5667 = vtanh.f32 %v2644_v48 }
0x23c2   :  { %v5668_v51 = vpop.eup %5667 }
0x23c3   :  { %2648 = vrot.lane.b32.xlu0 %v5668_v51, %s5751_s3 }
0x2435   :  { %v2649_v54 = vpop.permute.xlu0 %2648 }
0x2436   :  { %v2651_v57 = vmul.f32 %v2649_v54, %v2646_v53 }
0x2438   :  { %v6431_v58 = vadd.f32 %v2652_v36, %v2651_v57 }
0x243a   :  { %2725 = vrot.lane.b32.xlu1 %v6431_v58, %s5751_s3 }
0x24ac   :  { %v2726_v27 = vpop.permute.xlu1 %2725 }
0x24ad   :  { %5173 = vmatmul.mubr.msk.f32.vlgmr.msra.gmra.mrb[24].mxu1 %vm214_vm5, %v2726_v27 }
0x24ae   :  { %5483 = vmatpush3.bf16.msra.mxu1 %v6297_v32  ;;  %5194 = vmatprep.mubr.msk.f32.mxu1 %vm5748_vm4, %v5747_v28 }
0x24af   :  { %5484 = vmatprep.subr.bf16.mxu1 %v5746_v14 }
0x24b2   :  { %5486 = vmatpush3.bf16.msra.mxu1 %v6310_v1 }
0x24b3   :  { %5216 = vmatprep.subr.mxu1 %v5747_v28 }
0x2580   :  { %v2795_v0 = vpop.f32.mrb[24].mxu1 }
0x2581   :  { %v2796_v3 = vadd.f32 %v6332_v6, %v2795_v0  ;;  %v5174_v56 = vpop.f32.mrb[25].mxu1 }
0x2583   :  { %2807 = vrot.lane.b32.xlu0 %v2796_v3, %s5749_s6  ;;  %v2799_v7 = vadd.f32 %v2796_v3, %v6194_v5 }
0x2585   :  { %v4569_v46 = vmul.f32 -1.442695, %v2799_v7 }
0x2587   :  { %5669 = vpow2.f32 %v4569_v46  ;;  %v3071_v46 = vld [vmem:[%s7051_s12] sm:$0xff] }
0x2591   :  { %v5670_v32 = vpop.eup %5669 }
0x2592   :  { %v2803_v11 = vadd.f32 1.0, %v5670_v32 }
0x2594   :  { %5671 = vrcp.f32 %v2803_v11 }
0x259e   :  { %v5672_v12 = vpop.eup %5671 }
0x259f   :  { %v2817_v42 = vsub.f32 1.0, %v5672_v12  ;;  %v2823_v61 = vmul.f32 %v5672_v12, %v6431_v58 }
0x25f5   :  { %v2808_v13 = vpop.permute.xlu0 %2807 }
0x25f6   :  { %v2810_v15 = vmul.f32 %v5672_v12, %v2808_v13  ;;  %v3073_v12 = vld [vmem:[%s7051_s12 + $0x10] sm:$0xff]  ;;  %v3074_v13 = vld [vmem:[%s7051_s12 + $0x18] sm:$0xff] }
0x25f8   :  { %2812 = vrot.lane.b32.xlu1 %v2810_v15, %s5749_s6 }
0x266a   :  { %v2813_v1 = vpop.permute.xlu1 %2812 }
0x266b   :  { %v2815_v16 = vadd.f32 %v2813_v1, %v6194_v5  ;;  %v4546_v5 = vmul.f32 -1.442695, %v1588_v30  ;;  %v5491_v1 = vpack.c.bf16 %v3074_v13, %v3073_v12  ;;  %v4575_v30 = vld [vmem:[%s7052_s13] ss:$0 sm:$0xff] }
0x266d   :  { %5673 = vtanh.f32 %v2815_v16  ;;  %v3075_v16 = vld [vmem:[%s7051_s12 + $0x20] sm:$0xff] }
0x266e   :  { %5675 = vpow2.f32 %v4546_v5 }
0x2677   :  { %v5674_v17 = vpop.eup %5673 }
0x2678   :  { %2819 = vrot.lane.b32.xlu0 %v5674_v17, %s5751_s3  ;;  %v5676_v21 = vpop.eup %5675  ;;  %v3076_v17 = vld [vmem:[%s7051_s12 + $0x28] sm:$0xff] }
0x2679   :  { %v1592_v8 = vadd.f32 1.0, %v5676_v21  ;;  %v5495_v18 = vpack.c.bf16 %v3076_v17, %v3075_v16  ;;  %v3009_v21 = vsel %vm214_vm5, %v6305_v63, %v6359_v4  ;;  %v3005_v63 = vsel %vm214_vm5, %v6254_v60, %v6395_v59 }
0x267a   :  { %v3003_v4 = vsel %vm214_vm5, %v6237_v25, %v6413_v44 }
0x267b   :  { %5677 = vrcp.f32 %v1592_v8 }
0x267c   :  { %1596 = vrot.lane.b32.xlu0 %v1585_v19, %s5749_s6  ;;  %v3077_v19 = vld [vmem:[%s7051_s12 + $0x30] sm:$0xff] }
0x2685   :  { %v5678_v50 = vpop.eup %5677 }
0x2686   :  { %v1606_v41 = vsub.f32 1.0, %v5678_v50  ;;  %v1612_v49 = vmul.f32 %v5678_v50, %v6287_v55 }
0x26ea   :  { %v2820_v29 = vpop.permute.xlu0 %2819 }
0x26eb   :  { %v2822_v33 = vmul.f32 %v2820_v29, %v2817_v42  ;;  %v3007_v42 = vsel %vm214_vm5, %v6271_v22, %v6377_v31  ;;  %v3031_v31 = vrot.slane %v3009_v21, 2 }
0x26ed   :  { %v6458_v52 = vadd.f32 %v2823_v61, %v2822_v33 }
0x26ee   :  { %v1597_v38 = vpop.permute.xlu0 %1596 }
0x26ef   :  { %v1599_v37 = vmul.f32 %v5678_v50, %v1597_v38  ;;  %2896 = vrot.lane.b32.xlu1 %v6458_v52, %s5751_s3  ;;  %v2999_v29 = vsel %vm214_vm5, %v6203_v26, %v6458_v52  ;;  %v3001_v50 = vsel %vm214_vm5, %v6220_v62, %v6431_v58  ;;  %v3028_v38 = vrot.slane %v3007_v42, 3 }
0x26f0   :  { %v3016_v26 = vrot.slane %v2999_v29, 7  ;;  %v3025_v58 = vrot.slane %v3005_v63, 4 }
0x26f1   :  { %1601 = vrot.lane.b32.xlu0 %v1599_v37, %s5749_s6 }
0x2761   :  { %v2897_v39 = vpop.permute.xlu1 %2896 }
0x2762   :  { %5195 = vmatmul.mubr.msk.f32.vlgmr.msra.gmra.mrb[26].mxu1 %vm214_vm5, %v2897_v39  ;;  %v3019_v39 = vrot.slane %v3001_v50, 6 }
0x2763   :  { %v1602_v40 = vpop.permute.xlu0 %1601  ;;  %5218 = vmatprep.mubr.msk.f32.mxu1 %vm5748_vm4, %v5747_v28 }
0x2764   :  { %v1604_v43 = vadd.f32 %v1602_v40, %v1510_v34  ;;  %v3022_v40 = vrot.slane %v3003_v4, 5 }
0x2766   :  { %5679 = vtanh.f32 %v1604_v43  ;;  %v3039_v43 = vrot.slane %v3001_v50, 7 }
0x2770   :  { %v5680_v45 = vpop.eup %5679 }
0x2771   :  { %1608 = vrot.lane.b32.xlu0 %v5680_v45, %s5751_s3  ;;  %v3041_v45 = vrot.slane %v3003_v4, 6 }
0x27e3   :  { %v1609_v47 = vpop.permute.xlu0 %1608 }
0x27e4   :  { %v1611_v48 = vmul.f32 %v1609_v47, %v1606_v41 }
0x27e6   :  { %v1613_v51 = vadd.f32 %v1612_v49, %v1611_v48 }
0x27e8   :  { %3011 = vrot.lane.b32.xlu0 %v1613_v51, %s5751_s3 }
0x2835   :  { %v2966_v53 = vpop.f32.mrb[26].mxu1 }
0x2836   :  { %v2967_v54 = vadd.f32 %v6332_v6, %v2966_v53  ;;  %v5196_v36 = vpop.f32.mrb[27].mxu1  ;;  %v3072_v6 = vld [vmem:[%s7051_s12 + $0x8] sm:$0xff] }
0x2837   :  { %v5487_v32 = vpack.c.bf16 %v3072_v6, %v3071_v46 }
0x2838   :  { %2978 = vrot.lane.b32.xlu1 %v2967_v54, %s5749_s6  ;;  %v2970_v57 = vadd.f32 %v2967_v54, %v6197_v10  ;;  %v3047_v54 = vrot.slane %v3009_v21, 3 }
0x2839   :  { %5488 = vmatprep.subr.bf16.mxu0 %v5487_v32 }
0x283a   :  { %v4572_v27 = vmul.f32 -1.442695, %v2970_v57  ;;  %5490 = vmatpush3.bf16.msra.mxu0 %v5487_v32 }
0x283b   :  { %5492 = vmatprep.subr.bf16.mxu0 %v5491_v1 }
0x283c   :  { %5681 = vpow2.f32 %v4572_v27 }
0x283e   :  { %5494 = vmatpush3.bf16.msra.mxu0 %v5491_v1 }
0x283f   :  { %5496 = vmatprep.subr.bf16.mxu0 %v5495_v18 }
0x2842   :  { %5498 = vmatpush3.bf16.msra.mxu0 %v5495_v18 }
0x2846   :  { %v5682_v0 = vpop.eup %5681 }
0x2847   :  { %v2974_v3 = vadd.f32 1.0, %v5682_v0 }
0x2849   :  { %5683 = vrcp.f32 %v2974_v3 }
0x2853   :  { %v5684_v56 = vpop.eup %5683 }
0x2854   :  { %v2988_v5 = vsub.f32 1.0, %v5684_v56  ;;  %v2994_v61 = vmul.f32 %v5684_v56, %v6458_v52  ;;  %v3045_v52 = vrot.slane %v3007_v42, 4 }
0x285a   :  { %v3012_v37 = vpop.permute.xlu0 %3011 }
0x285b   :  { %v3014_v25 = vsel %vm214_vm5, %v3012_v37, %v6341_v35  ;;  %v5753_v37 = vmov 4  }
0x285c   :  { %v3034_v51 = vrot.slane %v3014_v25, 1  ;;  %v3049_v27 = vrot.slane %v3014_v25, 2 }
0x28aa   :  { %v2979_v7 = vpop.permute.xlu1 %2978 }
0x28ab   :  { %v2981_v55 = vmul.f32 %v5684_v56, %v2979_v7 }
0x28ad   :  { %2983 = vrot.lane.b32.xlu1 %v2981_v55, %s5749_s6  ;;  %v5752_v55 = vmov 1   ;;  %s5762_s6 = smov 112  }
0x28ae   :  { %5556 = vset.pattern.permute.xlu0 %v5752_v55 }
0x291f   :  { %v2984_v11 = vpop.permute.xlu1 %2983 }
0x2920   :  { %v2986_v15 = vadd.f32 %v2984_v11, %v6197_v10  ;;  %v3078_v10 = vld [vmem:[%s7051_s12 + $0x38] sm:$0xff] }
0x2921   :  { %v5499_v20 = vpack.c.bf16 %v3078_v10, %v3077_v19 }
0x2922   :  { %5685 = vtanh.f32 %v2986_v15 }
0x2923   :  { %5500 = vmatprep.subr.bf16.mxu0 %v5499_v20 }
0x2924   :  { %5502 = vmatpush3.bf16.msra.mxu0 %v5499_v20 }
0x2925   :  { %5231 = vmatprep.subr.mxu0 %v5747_v28 }
0x292c   :  { %v5686_v34 = vpop.eup %5685 }
0x292d   :  { %2990 = vrot.lane.b32.xlu1 %v5686_v34, %s5751_s3 }
0x2931   :  { %3167 = vrot.lane.b32.xlu1 %v4575_v30, %s5750_s29 }
0x299f   :  { %v2991_v8 = vpop.permute.xlu1 %2990 }
0x29a0   :  { %v2993_v33 = vmul.f32 %v2991_v8, %v2988_v5 }
0x29a2   :  { %v2995_v22 = vadd.f32 %v2994_v61, %v2993_v33 }
0x29a3   :  { %v3168_v46 = vpop.permute.xlu1 %3167 }
0x29a4   :  { %v2997_v62 = vsel %vm214_vm5, %v6040_v9, %v2995_v22  ;;  %v3043_v9 = vrot.slane %v3005_v63, 5 }
0x29a5   :  { %v3037_v60 = vrot.slane %v2997_v62, 1  ;;  %v3052_v59 = vsel %vm3051_vm6, %v2997_v62, %v3016_v26  ;;  %v6581_v62 = vshrl.u32 %v74_v23, 7 }
0x29a6   :  { %v3054_v44 = vsel %vm3053_vm7, %v3052_v59, %v3019_v39  ;;  %v5755_v39 = vmov 3  }
0x29a7   :  { %v3064_v41 = vsel %vm3051_vm6, %v3037_v60, %v2999_v29  ;;  %v3056_v47 = vsel %vm3055_vm8, %v3054_v44, %v3022_v40  ;;  %v3239_v40 = vsub.s32 1, %v6581_v62  ;;  %v3172_v60 = vld [vmem:[%s7055_s16] sm:$0x1f]  ;;  %v3251_v25 = vsub.s32 2, %v6581_v62 }
0x29a8   :  { %v3065_v49 = vsel %vm3053_vm7, %v3064_v41, %v3039_v43  ;;  %v3057_v48 = vsel %vm108_vm0, %v3056_v47, %v3025_v58  ;;  %v6584_v58 = vsub.s32 0, %v6581_v62 }
0x29a9   :  { %v3059_v53 = vsel %vm3058_vm9, %v3057_v48, %v3028_v38  ;;  %v3066_v35 = vsel %vm3055_vm8, %v3065_v49, %v3041_v45  ;;  %v6590_v59 = vrot.slane %v3172_v60, %v3239_v40  ;;  %v6598_v47 = vrot.slane %v3172_v60, %v3251_v25 }
0x29aa   :  { %v3061_v36 = vsel %vm3060_vm10, %v3059_v53, %v3031_v31  ;;  %v3067_v57 = vsel %vm108_vm0, %v3066_v35, %v3043_v9  ;;  %v4576_v31 = vld [vmem:[%s7053_s14] ss:$0 sm:$0xff]  ;;  %v6593_v43 = vrot.slane %v3172_v60, %v6584_v58  ;;  %v3263_v9 = vsub.s32 3, %v6581_v62 }
0x29ab   :  { %v3063_v0 = vsel %vm3062_vm11, %v3061_v36, %v3034_v51  ;;  %v3068_v3 = vsel %vm3058_vm9, %v3067_v57, %v3045_v52  ;;  %v5754_v52 = vmov 2   ;;  %v3275_v49 = vsub.s32 4, %v6581_v62 }
0x29ac   :  { %5213 = vmatprep.mubr.msk.f32.mxu0 %vm3079_vm12, %v3063_v0  ;;  %v3069_v56 = vsel %vm3060_vm10, %v3068_v3, %v3047_v54  ;;  %v6603_v35 = vrot.slane %v3172_v60, %v3263_v9 }
0x29ad   :  { %v3070_v7 = vsel %vm3062_vm11, %v3069_v56, %v3049_v27  ;;  %v6606_v36 = vrot.slane %v3172_v60, %v3275_v49 }
0x29ae   :  { %5214 = vmatmul.mubr.msk.f32.vlgmr.msra.gmra.mrb[38].mxu0 %vm3079_vm12, %v3070_v7 }
0x29af   :  { %5233 = vmatprep.mubr.msk.f32.mxu0 %vm5748_vm4, %v5747_v28 }
0x2a81   :  { %v6544_v6 = vpop.f32.mrb[38].mxu0 }
0x2a82   :  { %v3171_v32 = vadd.f32 %v6544_v6, %v3168_v46  ;;  %v6547_v11 = vpop.f32.mrb[39].mxu0 }
0x2a83   :  { %v3170_v12 = vadd.f32 %v3168_v46, %v6547_v11 }
0x2a84   :  { %v3174_v13 = vrot.slane %v3171_v32, 7  ;;  %v3183_v15 = vrot.slane %v3171_v32, 1  ;;  %v3188_v1 = vrot.slane %v3171_v32, 2  ;;  %v3193_v16 = vrot.slane %v3171_v32, 3 }
0x2a85   :  { %v3178_v17 = vrot.slane %v3170_v12, 1  ;;  %v3181_v18 = vrot.slane %v3170_v12, 2  ;;  %v3186_v19 = vrot.slane %v3170_v12, 3  ;;  %v3191_v10 = vrot.slane %v3170_v12, 4 }
0x2a86   :  { %v3176_v20 = vsel %vm3051_vm6, %v3170_v12, %v3174_v13  ;;  %v3196_v34 = vrot.slane %v3170_v12, 5  ;;  %v3198_v30 = vrot.slane %v3171_v32, 4  ;;  %v3201_v5 = vrot.slane %v3170_v12, 6 }
0x2a87   :  { %3219 = vrot.lane.b32.xlu0 %v3176_v20, %s5751_s3  ;;  %v3180_v21 = vsel %vm3051_vm6, %v3178_v17, %v3171_v32  ;;  %v6554_v8 = vsel %vm3051_vm6, %v3181_v18, %v3183_v15  ;;  %v6557_v42 = vsel %vm3051_vm6, %v3186_v19, %v3188_v1  ;;  %v6560_v29 = vsel %vm3051_vm6, %v3191_v10, %v3193_v16 }
0x2a88   :  { %v6563_v61 = vsel %vm3051_vm6, %v3196_v34, %v3198_v30  ;;  %v3203_v33 = vrot.slane %v3171_v32, 5  ;;  %v3206_v50 = vrot.slane %v3170_v12, 7  ;;  %v3208_v63 = vrot.slane %v3171_v32, 6 }
0x2a8a   :  { %v6566_v4 = vsel %vm3051_vm6, %v3201_v5, %v3203_v33  ;;  %v6569_v22 = vsel %vm3051_vm6, %v3206_v50, %v3208_v63 }
0x2af9   :  { %v3220_v38 = vpop.permute.xlu0 %3219 }
0x2afa   :  { %v3222_v26 = vadd.f32 %v4576_v31, %v3220_v38 }
0x2afc   :  { %3234 = vperm.xlu0 %5556, %v3222_v26   ;;  %3225 = vperm.xlu1 %5555, %v3222_v26  }
0x2b00   :  { %5559 = vset.pattern.permute.xlu0 %v5753_v37  ;;  %5557 = vset.pattern.permute.xlu1 %v5754_v52 }
0x2b01   :  { %3270 = vperm.xlu0 %5559, %v3222_v26   ;;  %3246 = vperm.xlu1 %5557, %v3222_v26  }
0x2b05   :  { %5558 = vset.pattern.permute.xlu1 %v5755_v39  ;;  %5561 = vset.pattern.permute.xlu0 %v5752_v55 }
0x2b06   :  { %3258 = vperm.xlu1 %5558, %v3222_v26  }
0x2b0a   :  { %3282 = vrot.lane.b32.xlu1 %v3180_v21, %s5751_s3 }
0x2b0b   :  { %5560 = vset.pattern.permute.xlu1 %v5745_v2 }
0x2b7b   :  { %v3235_v44 = vpop.permute.xlu0 %3234  ;;  %v3226_v45 = vpop.permute.xlu1 %3225 }
0x2b7c   :  { %v3241_v23 = vadd.f32 %v6590_v59, %v3235_v44  ;;  %v3232_v41 = vadd.f32 %v6593_v43, %v3226_v45 }
0x2b7e   :  { %vm3242_vm13 = vcmp.gt.f32.partialorder %v3241_v23, %v3232_v41 }
0x2b7f   :  { %v3243_v53 = vsel %vm3242_vm13, %v3241_v23, %v3232_v41  ;;  %v3244_v54 = vsel %vm3242_vm13, 1, %v5745_v2 }
0x2b80   :  { %v3247_v48 = vpop.permute.xlu1 %3246  ;;  %v3271_v27 = vpop.permute.xlu0 %3270 }
0x2b81   :  { %v3253_v51 = vadd.f32 %v6598_v47, %v3247_v48  ;;  %v3277_v7 = vadd.f32 %v6606_v36, %v3271_v27 }
0x2b83   :  { %vm3254_vm14 = vcmp.gt.f32.partialorder %v3253_v51, %v3243_v53 }
0x2b84   :  { %v3256_v57 = vsel %vm3254_vm14, 2, %v3244_v54  ;;  %v3255_v56 = vsel %vm3254_vm14, %v3253_v51, %v3243_v53 }
0x2b85   :  { %v3259_v0 = vpop.permute.xlu1 %3258 }
0x2b86   :  { %v3265_v3 = vadd.f32 %v6603_v35, %v3259_v0 }
0x2b88   :  { %vm3266_vm15 = vcmp.gt.f32.partialorder %v3265_v3, %v3255_v56 }
0x2b89   :  { %v3268_v46 = vsel %vm3266_vm15, 3, %v3256_v57  ;;  %v3267_v32 = vsel %vm3266_vm15, %v3265_v3, %v3255_v56  ;;  %v3283_v13 = vpop.permute.xlu1 %3282 }
0x2b8a   :  { %vm3278_vm1 = vcmp.gt.f32.partialorder %v3277_v7, %v3267_v32 }
0x2b8b   :  { %v3279_v12 = vsel %vm3278_vm1, %v3277_v7, %v3267_v32  ;;  %v6610_v15 = vsel %vm3278_vm1, 4, %v3268_v46 }
0x2b8c   :  { %v3285_v1 = vadd.f32 %v3283_v13, %v3279_v12 }
0x2b8e   :  { %3293 = vperm.xlu0 %5561, %v3285_v1   ;;  %3288 = vperm.xlu1 %5560, %v3285_v1  }
0x2b92   :  { %5564 = vset.pattern.permute.xlu0 %v5753_v37  ;;  %5562 = vset.pattern.permute.xlu1 %v5754_v52 }
0x2b93   :  { %3317 = vperm.xlu0 %5564, %v3285_v1   ;;  %3301 = vperm.xlu1 %5562, %v3285_v1  }
0x2b97   :  { %5563 = vset.pattern.permute.xlu1 %v5755_v39  ;;  %5566 = vset.pattern.permute.xlu0 %v5752_v55 }
0x2b98   :  { %3309 = vperm.xlu1 %5563, %v3285_v1  }
0x2b9c   :  { %3325 = vrot.lane.b32.xlu1 %v6554_v8, %s5751_s3 }
0x2b9d   :  { %5565 = vset.pattern.permute.xlu1 %v5745_v2 }
0x2c0d   :  { %v3294_v16 = vpop.permute.xlu0 %3293  ;;  %v3289_v17 = vpop.permute.xlu1 %3288 }
0x2c0e   :  { %v3296_v18 = vadd.f32 %v3294_v16, %v6590_v59  ;;  %v3291_v19 = vadd.f32 %v3289_v17, %v6593_v43 }
0x2c10   :  { %vm3297_vm2 = vcmp.gt.f32.partialorder %v3296_v18, %v3291_v19 }
0x2c11   :  { %v3298_v34 = vsel %vm3297_vm2, %v3296_v18, %v3291_v19  ;;  %v3299_v30 = vsel %vm3297_vm2, 1, %v5745_v2 }
0x2c12   :  { %v3302_v10 = vpop.permute.xlu1 %3301  ;;  %v3318_v21 = vpop.permute.xlu0 %3317 }
0x2c13   :  { %v3304_v20 = vadd.f32 %v3302_v10, %v6598_v47  ;;  %v3320_v63 = vadd.f32 %v3318_v21, %v6606_v36 }
0x2c15   :  { %vm3305_vm3 = vcmp.gt.f32.partialorder %v3304_v20, %v3298_v34 }
0x2c16   :  { %v3307_v5 = vsel %vm3305_vm3, 2, %v3299_v30  ;;  %v3306_v50 = vsel %vm3305_vm3, %v3304_v20, %v3298_v34 }
0x2c17   :  { %v3310_v33 = vpop.permute.xlu1 %3309 }
0x2c18   :  { %v3312_v8 = vadd.f32 %v3310_v33, %v6603_v35 }
0x2c1a   :  { %vm3313_vm5 = vcmp.gt.f32.partialorder %v3312_v8, %v3306_v50 }
0x2c1b   :  { %v3315_v31 = vsel %vm3313_vm5, 3, %v3307_v5  ;;  %v3314_v38 = vsel %vm3313_vm5, %v3312_v8, %v3306_v50  ;;  %v3326_v40 = vpop.permute.xlu1 %3325 }
0x2c1c   :  { %vm3321_vm12 = vcmp.gt.f32.partialorder %v3320_v63, %v3314_v38 }
0x2c1d   :  { %v3322_v26 = vsel %vm3321_vm12, %v3320_v63, %v3314_v38  ;;  %v6625_v60 = vsel %vm3321_vm12, 4, %v3315_v31 }
0x2c1e   :  { %v3328_v25 = vadd.f32 %v3326_v40, %v3322_v26 }
0x2c20   :  { %3336 = vperm.xlu0 %5566, %v3328_v25   ;;  %3331 = vperm.xlu1 %5565, %v3328_v25  }
0x2c24   :  { %5569 = vset.pattern.permute.xlu0 %v5753_v37  ;;  %5567 = vset.pattern.permute.xlu1 %v5754_v52 }
0x2c25   :  { %3360 = vperm.xlu0 %5569, %v3328_v25   ;;  %3344 = vperm.xlu1 %5567, %v3328_v25  }
0x2c29   :  { %5568 = vset.pattern.permute.xlu1 %v5755_v39  ;;  %5571 = vset.pattern.permute.xlu0 %v5752_v55 }
0x2c2a   :  { %3352 = vperm.xlu1 %5568, %v3328_v25  }
0x2c2e   :  { %3368 = vrot.lane.b32.xlu1 %v6557_v42, %s5751_s3 }
0x2c2f   :  { %5570 = vset.pattern.permute.xlu1 %v5745_v2 }
0x2c9f   :  { %v3337_v44 = vpop.permute.xlu0 %3336  ;;  %v3332_v45 = vpop.permute.xlu1 %3331 }
0x2ca0   :  { %v3339_v23 = vadd.f32 %v3337_v44, %v6590_v59  ;;  %v3334_v41 = vadd.f32 %v3332_v45, %v6593_v43 }
0x2ca2   :  { %vm3340_vm13 = vcmp.gt.f32.partialorder %v3339_v23, %v3334_v41 }
0x2ca3   :  { %v3341_v48 = vsel %vm3340_vm13, %v3339_v23, %v3334_v41  ;;  %v3342_v51 = vsel %vm3340_vm13, 1, %v5745_v2 }
0x2ca4   :  { %v3345_v9 = vpop.permute.xlu1 %3344  ;;  %v3361_v54 = vpop.permute.xlu0 %3360 }
0x2ca5   :  { %v3347_v49 = vadd.f32 %v3345_v9, %v6598_v47  ;;  %v3363_v0 = vadd.f32 %v3361_v54, %v6606_v36 }
0x2ca7   :  { %vm3348_vm14 = vcmp.gt.f32.partialorder %v3347_v49, %v3341_v48 }
0x2ca8   :  { %v3350_v53 = vsel %vm3348_vm14, 2, %v3342_v51  ;;  %v3349_v27 = vsel %vm3348_vm14, %v3347_v49, %v3341_v48 }
0x2ca9   :  { %v3353_v57 = vpop.permute.xlu1 %3352 }
0x2caa   :  { %v3355_v42 = vadd.f32 %v3353_v57, %v6603_v35 }
0x2cac   :  { %vm3356_vm15 = vcmp.gt.f32.partialorder %v3355_v42, %v3349_v27 }
0x2cad   :  { %v3358_v3 = vsel %vm3356_vm15, 3, %v3350_v53  ;;  %v3357_v56 = vsel %vm3356_vm15, %v3355_v42, %v3349_v27  ;;  %v3369_v32 = vpop.permute.xlu1 %3368 }
0x2cae   :  { %vm3364_vm1 = vcmp.gt.f32.partialorder %v3363_v0, %v3357_v56 }
0x2caf   :  { %v3365_v7 = vsel %vm3364_vm1, %v3363_v0, %v3357_v56  ;;  %v6640_v46 = vsel %vm3364_vm1, 4, %v3358_v3 }
0x2cb0   :  { %v3371_v12 = vadd.f32 %v3369_v32, %v3365_v7 }
0x2cb2   :  { %3379 = vperm.xlu0 %5571, %v3371_v12   ;;  %3374 = vperm.xlu1 %5570, %v3371_v12  }
0x2cb6   :  { %5574 = vset.pattern.permute.xlu0 %v5753_v37  ;;  %5572 = vset.pattern.permute.xlu1 %v5754_v52 }
0x2cb7   :  { %3403 = vperm.xlu0 %5574, %v3371_v12   ;;  %3387 = vperm.xlu1 %5572, %v3371_v12  }
0x2cbb   :  { %5573 = vset.pattern.permute.xlu1 %v5755_v39  ;;  %5576 = vset.pattern.permute.xlu0 %v5752_v55 }
0x2cbc   :  { %3395 = vperm.xlu1 %5573, %v3371_v12  }
0x2cc0   :  { %3411 = vrot.lane.b32.xlu1 %v6560_v29, %s5751_s3 }
0x2cc1   :  { %5575 = vset.pattern.permute.xlu1 %v5745_v2 }
0x2d31   :  { %v3380_v13 = vpop.permute.xlu0 %3379  ;;  %v3375_v1 = vpop.permute.xlu1 %3374 }
0x2d32   :  { %v3382_v16 = vadd.f32 %v3380_v13, %v6590_v59  ;;  %v3377_v17 = vadd.f32 %v3375_v1, %v6593_v43 }
0x2d34   :  { %vm3383_vm2 = vcmp.gt.f32.partialorder %v3382_v16, %v3377_v17 }
0x2d35   :  { %v3384_v10 = vsel %vm3383_vm2, %v3382_v16, %v3377_v17  ;;  %v3385_v20 = vsel %vm3383_vm2, 1, %v5745_v2 }
0x2d36   :  { %v3388_v18 = vpop.permute.xlu1 %3387  ;;  %v3404_v30 = vpop.permute.xlu0 %3403 }
0x2d37   :  { %v3390_v19 = vadd.f32 %v3388_v18, %v6598_v47  ;;  %v3406_v33 = vadd.f32 %v3404_v30, %v6606_v36 }
0x2d39   :  { %vm3391_vm3 = vcmp.gt.f32.partialorder %v3390_v19, %v3384_v10 }
0x2d3a   :  { %v3393_v34 = vsel %vm3391_vm3, 2, %v3385_v20  ;;  %v3392_v21 = vsel %vm3391_vm3, %v3390_v19, %v3384_v10 }
0x2d3b   :  { %v3396_v5 = vpop.permute.xlu1 %3395 }
0x2d3c   :  { %v3398_v29 = vadd.f32 %v3396_v5, %v6603_v35 }
0x2d3e   :  { %vm3399_vm5 = vcmp.gt.f32.partialorder %v3398_v29, %v3392_v21 }
0x2d3f   :  { %v3401_v8 = vsel %vm3399_vm5, 3, %v3393_v34  ;;  %v3400_v50 = vsel %vm3399_vm5, %v3398_v29, %v3392_v21  ;;  %v3412_v38 = vpop.permute.xlu1 %3411 }
0x2d40   :  { %vm3407_vm12 = vcmp.gt.f32.partialorder %v3406_v33, %v3400_v50 }
0x2d41   :  { %v3408_v63 = vsel %vm3407_vm12, %v3406_v33, %v3400_v50  ;;  %v6655_v31 = vsel %vm3407_vm12, 4, %v3401_v8 }
0x2d42   :  { %v3414_v26 = vadd.f32 %v3412_v38, %v3408_v63 }
0x2d44   :  { %3422 = vperm.xlu0 %5576, %v3414_v26   ;;  %3417 = vperm.xlu1 %5575, %v3414_v26  }
0x2d48   :  { %5579 = vset.pattern.permute.xlu0 %v5753_v37  ;;  %5577 = vset.pattern.permute.xlu1 %v5754_v52 }
0x2d49   :  { %3446 = vperm.xlu0 %5579, %v3414_v26   ;;  %3430 = vperm.xlu1 %5577, %v3414_v26  }
0x2d4d   :  { %5578 = vset.pattern.permute.xlu1 %v5755_v39  ;;  %5581 = vset.pattern.permute.xlu0 %v5752_v55 }
0x2d4e   :  { %3438 = vperm.xlu1 %5578, %v3414_v26  }
0x2d52   :  { %3454 = vrot.lane.b32.xlu1 %v6563_v61, %s5751_s3 }
0x2d53   :  { %5580 = vset.pattern.permute.xlu1 %v5745_v2 }
0x2dc3   :  { %v3423_v40 = vpop.permute.xlu0 %3422  ;;  %v3418_v25 = vpop.permute.xlu1 %3417 }
0x2dc4   :  { %v3425_v44 = vadd.f32 %v3423_v40, %v6590_v59  ;;  %v3420_v45 = vadd.f32 %v3418_v25, %v6593_v43 }
0x2dc6   :  { %vm3426_vm13 = vcmp.gt.f32.partialorder %v3425_v44, %v3420_v45 }
0x2dc7   :  { %v3427_v9 = vsel %vm3426_vm13, %v3425_v44, %v3420_v45  ;;  %v3428_v49 = vsel %vm3426_vm13, 1, %v5745_v2 }
0x2dc8   :  { %v3431_v23 = vpop.permute.xlu1 %3430  ;;  %v3447_v51 = vpop.permute.xlu0 %3446 }
0x2dc9   :  { %v3433_v41 = vadd.f32 %v3431_v23, %v6598_v47  ;;  %v3449_v57 = vadd.f32 %v3447_v51, %v6606_v36 }
0x2dcb   :  { %vm3434_vm14 = vcmp.gt.f32.partialorder %v3433_v41, %v3427_v9 }
0x2dcc   :  { %v3436_v48 = vsel %vm3434_vm14, 2, %v3428_v49  ;;  %v3435_v54 = vsel %vm3434_vm14, %v3433_v41, %v3427_v9 }
0x2dcd   :  { %v3439_v53 = vpop.permute.xlu1 %3438 }
0x2dce   :  { %v3441_v61 = vadd.f32 %v3439_v53, %v6603_v35 }
0x2dd0   :  { %vm3442_vm15 = vcmp.gt.f32.partialorder %v3441_v61, %v3435_v54 }
0x2dd1   :  { %v3444_v42 = vsel %vm3442_vm15, 3, %v3436_v48  ;;  %v3443_v27 = vsel %vm3442_vm15, %v3441_v61, %v3435_v54  ;;  %v3455_v56 = vpop.permute.xlu1 %3454 }
0x2dd2   :  { %vm3450_vm1 = vcmp.gt.f32.partialorder %v3449_v57, %v3443_v27 }
0x2dd3   :  { %v3451_v0 = vsel %vm3450_vm1, %v3449_v57, %v3443_v27  ;;  %v6670_v3 = vsel %vm3450_vm1, 4, %v3444_v42 }
0x2dd4   :  { %v3457_v7 = vadd.f32 %v3455_v56, %v3451_v0 }
0x2dd6   :  { %3465 = vperm.xlu0 %5581, %v3457_v7   ;;  %3460 = vperm.xlu1 %5580, %v3457_v7  }
0x2dda   :  { %5584 = vset.pattern.permute.xlu0 %v5753_v37  ;;  %5582 = vset.pattern.permute.xlu1 %v5754_v52 }
0x2ddb   :  { %3489 = vperm.xlu0 %5584, %v3457_v7   ;;  %3473 = vperm.xlu1 %5582, %v3457_v7  }
0x2ddf   :  { %5583 = vset.pattern.permute.xlu1 %v5755_v39  ;;  %5586 = vset.pattern.permute.xlu0 %v5752_v55 }
0x2de0   :  { %3481 = vperm.xlu1 %5583, %v3457_v7  }
0x2de4   :  { %3497 = vrot.lane.b32.xlu1 %v6566_v4, %s5751_s3 }
0x2de5   :  { %5585 = vset.pattern.permute.xlu1 %v5745_v2 }
0x2e55   :  { %v3466_v32 = vpop.permute.xlu0 %3465  ;;  %v3461_v12 = vpop.permute.xlu1 %3460 }
0x2e56   :  { %v3468_v13 = vadd.f32 %v3466_v32, %v6590_v59  ;;  %v3463_v1 = vadd.f32 %v3461_v12, %v6593_v43 }
0x2e58   :  { %vm3469_vm2 = vcmp.gt.f32.partialorder %v3468_v13, %v3463_v1 }
0x2e59   :  { %v3470_v18 = vsel %vm3469_vm2, %v3468_v13, %v3463_v1  ;;  %v3471_v19 = vsel %vm3469_vm2, 1, %v5745_v2  ;;  %v6776_v13 = vld [vmem:[%s7056_s17] sm:$0x1f] }
0x2e5a   :  { %v3474_v16 = vpop.permute.xlu1 %3473  ;;  %v3490_v10 = vpop.permute.xlu0 %3489  ;;  %5217 = vmatpush3.msk.msra.mxu1 %vm3058_vm9, %v6776_v13 }
0x2e5b   :  { %v3476_v17 = vadd.f32 %v3474_v16, %v6598_v47  ;;  %v3492_v30 = vadd.f32 %v3490_v10, %v6606_v36  ;;  %5221 = vmatprep.subr.mxu1 %v5747_v28 }
0x2e5d   :  { %vm3477_vm3 = vcmp.gt.f32.partialorder %v3476_v17, %v3470_v18 }
0x2e5e   :  { %v3479_v55 = vsel %vm3477_vm3, 2, %v3471_v19  ;;  %v3478_v34 = vsel %vm3477_vm3, %v3476_v17, %v3470_v18 }
0x2e5f   :  { %v3482_v20 = vpop.permute.xlu1 %3481 }
0x2e60   :  { %v3484_v4 = vadd.f32 %v3482_v20, %v6603_v35 }
0x2e62   :  { %vm3485_vm5 = vcmp.gt.f32.partialorder %v3484_v4, %v3478_v34 }
0x2e63   :  { %v3487_v5 = vsel %vm3485_vm5, 3, %v3479_v55  ;;  %v3486_v29 = vsel %vm3485_vm5, %v3484_v4, %v3478_v34  ;;  %v3498_v8 = vpop.permute.xlu1 %3497 }
0x2e64   :  { %vm3493_vm12 = vcmp.gt.f32.partialorder %v3492_v30, %v3486_v29 }
0x2e65   :  { %v3494_v21 = vsel %vm3493_vm12, %v3492_v30, %v3486_v29  ;;  %v6685_v33 = vsel %vm3493_vm12, 4, %v3487_v5 }
0x2e66   :  { %v3500_v50 = vadd.f32 %v3498_v8, %v3494_v21 }
0x2e68   :  { %3508 = vperm.xlu0 %5586, %v3500_v50   ;;  %3503 = vperm.xlu1 %5585, %v3500_v50  }
0x2e6c   :  { %5589 = vset.pattern.permute.xlu0 %v5753_v37  ;;  %5587 = vset.pattern.permute.xlu1 %v5754_v52 }
0x2e6d   :  { %3532 = vperm.xlu0 %5589, %v3500_v50   ;;  %3516 = vperm.xlu1 %5587, %v3500_v50  }
0x2e71   :  { %5588 = vset.pattern.permute.xlu1 %v5755_v39 }
0x2e72   :  { %3524 = vperm.xlu1 %5588, %v3500_v50  }
0x2e76   :  { %3540 = vrot.lane.b32.xlu1 %v6569_v22, %s5751_s3 }
0x2e77   :  { %5590 = vset.pattern.permute.xlu1 %v5753_v37 }
0x2ee7   :  { %v3509_v63 = vpop.permute.xlu0 %3508  ;;  %v3504_v38 = vpop.permute.xlu1 %3503 }
0x2ee8   :  { %v3511_v26 = vadd.f32 %v3509_v63, %v6590_v59  ;;  %v3506_v40 = vadd.f32 %v3504_v38, %v6593_v43 }
0x2eea   :  { %vm3512_vm13 = vcmp.gt.f32.partialorder %v3511_v26, %v3506_v40 }
0x2eeb   :  { %v3513_v44 = vsel %vm3512_vm13, %v3511_v26, %v3506_v40  ;;  %v3514_v45 = vsel %vm3512_vm13, 1, %v5745_v2 }
0x2eec   :  { %v3517_v25 = vpop.permute.xlu1 %3516  ;;  %v3533_v23 = vpop.permute.xlu0 %3532 }
0x2eed   :  { %v3519_v52 = vadd.f32 %v3517_v25, %v6598_v47  ;;  %v3535_v9 = vadd.f32 %v3533_v23, %v6606_v36  ;;  %v4577_v47 = vld [vmem:[%s7054_s15] ss:$0 sm:$0xff]  ;;  %s5757_s15 = smov 3  }
0x2eef   :  { %vm3520_vm14 = vcmp.gt.f32.partialorder %v3519_v52, %v3513_v44 }
0x2ef0   :  { %v3522_v39 = vsel %vm3520_vm14, 2, %v3514_v45  ;;  %v3521_v37 = vsel %vm3520_vm14, %v3519_v52, %v3513_v44 }
0x2ef1   :  { %v3525_v41 = vpop.permute.xlu1 %3524 }
0x2ef2   :  { %v3527_v22 = vadd.f32 %v3525_v41, %v6603_v35 }
0x2ef4   :  { %vm3528_vm15 = vcmp.gt.f32.partialorder %v3527_v22, %v3521_v37 }
0x2ef5   :  { %v3530_v59 = vsel %vm3528_vm15, 3, %v3522_v39  ;;  %v3529_v49 = vsel %vm3528_vm15, %v3527_v22, %v3521_v37  ;;  %v3541_v51 = vpop.permute.xlu1 %3540 }
0x2ef6   :  { %vm3536_vm1 = vcmp.gt.f32.partialorder %v3535_v9, %v3529_v49 }
0x2ef7   :  { %v3537_v43 = vsel %vm3536_vm1, %v3535_v9, %v3529_v49  ;;  %v6699_v48 = vsel %vm3536_vm1, 4, %v3530_v59 }
0x2ef8   :  { %v3543_v53 = vadd.f32 %v3541_v51, %v3537_v43 }
0x2efa   :  { %v6704_v61 = vadd.f32 %v4577_v47, %v3543_v53 }
0x2efc   :  { %3553 = vrot.lane.b32.xlu1 %v6704_v61, %s5756_s2 }
0x2f6e   :  { %v3554_v35 = vpop.permute.xlu1 %3553 }
0x2f6f   :  { %vm3556_vm2 = vcmp.gt.f32.partialorder %v6704_v61, %v3554_v35 }
0x2f70   :  { %v3557_v36 = vsel %vm3556_vm2, %v6704_v61, %v3554_v35  ;;  %v3558_v54 = vsel %vm3556_vm2, 1, %v5745_v2 }
0x2f71   :  { %3565 = vrot.lane.b32.xlu1 %v3558_v54, %s5756_s2  ;;  %3560 = vrot.lane.b32.xlu0 %v3557_v36, %s5756_s2 }
0x2fe3   :  { %v3566_v57 = vpop.permute.xlu1 %3565  ;;  %v3561_v42 = vpop.permute.xlu0 %3560 }
0x2fe4   :  { %vm3563_vm3 = vcmp.gt.f32.partialorder %v6704_v61, %v3561_v42 }
0x2fe5   :  { %v3564_v27 = vsel %vm3563_vm3, %v6704_v61, %v3561_v42  ;;  %v3567_v0 = vsel %vm3563_vm3, 2, %v3566_v57 }
0x2fe6   :  { %3574 = vrot.lane.b32.xlu1 %v3567_v0, %s5756_s2  ;;  %3569 = vrot.lane.b32.xlu0 %v3564_v27, %s5756_s2 }
0x2fea   :  { %3590 = vrot.lane.b32.xlu1 %v6699_v48, %s5757_s15  ;;  %3586 = vrot.lane.b32.xlu0 %v6699_v48, %s5758_s28 }
0x2fee   :  { %3598 = vrot.lane.b32.xlu1 %v6699_v48, %s5756_s2  ;;  %3594 = vrot.lane.b32.xlu0 %v6699_v48, %s5759_s7 }
0x2ff2   :  { %3608 = vrot.lane.b32.xlu1 %v6685_v33, %s5757_s15  ;;  %3604 = vrot.lane.b32.xlu0 %v6685_v33, %s5758_s28 }
0x3058   :  { %v3575_v56 = vpop.permute.xlu1 %3574  ;;  %v3570_v7 = vpop.permute.xlu0 %3569 }
0x3059   :  { %vm3572_vm5 = vcmp.gt.f32.partialorder %v6704_v61, %v3570_v7 }
0x305a   :  { %v3573_v32 = vsel %vm3572_vm5, %v6704_v61, %v3570_v7  ;;  %v3576_v12 = vsel %vm3572_vm5, 3, %v3575_v56 }
0x305b   :  { %3582 = vrot.lane.b32.xlu1 %v3576_v12, %s5756_s2  ;;  %3578 = vrot.lane.b32.xlu0 %v3573_v32, %s5756_s2 }
0x305c   :  { %v3591_v1 = vpop.permute.xlu1 %3590  ;;  %v3587_v16 = vpop.permute.xlu0 %3586 }
0x305f   :  { %3616 = vrot.lane.b32.xlu1 %v6685_v33, %s5756_s2  ;;  %3612 = vrot.lane.b32.xlu0 %v6685_v33, %s5759_s7 }
0x3060   :  { %v3599_v17 = vpop.permute.xlu1 %3598  ;;  %v3595_v18 = vpop.permute.xlu0 %3594 }
0x3063   :  { %3626 = vrot.lane.b32.xlu1 %v6670_v3, %s5757_s15  ;;  %3622 = vrot.lane.b32.xlu0 %v6670_v3, %s5758_s28 }
0x3064   :  { %v3609_v19 = vpop.permute.xlu1 %3608  ;;  %v3605_v55 = vpop.permute.xlu0 %3604 }
0x3067   :  { %3634 = vrot.lane.b32.xlu1 %v6670_v3, %s5756_s2  ;;  %3630 = vrot.lane.b32.xlu0 %v6670_v3, %s5759_s7 }
0x306b   :  { %3644 = vrot.lane.b32.xlu1 %v6655_v31, %s5757_s15  ;;  %3640 = vrot.lane.b32.xlu0 %v6655_v31, %s5758_s28 }
0x306f   :  { %3652 = vrot.lane.b32.xlu1 %v6655_v31, %s5756_s2  ;;  %3648 = vrot.lane.b32.xlu0 %v6655_v31, %s5759_s7 }
0x3073   :  { %3662 = vrot.lane.b32.xlu1 %v6640_v46, %s5757_s15  ;;  %3658 = vrot.lane.b32.xlu0 %v6640_v46, %s5758_s28 }
0x3077   :  { %3670 = vrot.lane.b32.xlu1 %v6640_v46, %s5756_s2  ;;  %3666 = vrot.lane.b32.xlu0 %v6640_v46, %s5759_s7 }
0x307b   :  { %3680 = vrot.lane.b32.xlu1 %v6625_v60, %s5757_s15  ;;  %3676 = vrot.lane.b32.xlu0 %v6625_v60, %s5758_s28 }
0x307f   :  { %3688 = vrot.lane.b32.xlu1 %v6625_v60, %s5756_s2  ;;  %3684 = vrot.lane.b32.xlu0 %v6625_v60, %s5759_s7 }
0x3083   :  { %3698 = vrot.lane.b32.xlu1 %v6610_v15, %s5757_s15  ;;  %3694 = vrot.lane.b32.xlu0 %v6610_v15, %s5758_s28 }
0x3087   :  { %3706 = vrot.lane.b32.xlu1 %v6610_v15, %s5756_s2  ;;  %3702 = vrot.lane.b32.xlu0 %v6610_v15, %s5759_s7 }
0x30cd   :  { %v3583_v10 = vpop.permute.xlu1 %3582  ;;  %v3579_v20 = vpop.permute.xlu0 %3578 }
0x30ce   :  { %vm3581_vm12 = vcmp.gt.f32.partialorder %v6704_v61, %v3579_v20 }
0x30cf   :  { %v6786_v4 = vsel %vm3581_vm12, 4, %v3583_v10 }
0x30d0   :  { %vm3585_vm13 = vcmp.eq.s32.totalorder %v6786_v4, 0  ;;  %vm3589_vm14 = vcmp.eq.s32.totalorder %v6786_v4, 1  ;;  %vm3593_vm15 = vcmp.eq.s32.totalorder %v6786_v4, 2  ;;  %vm3597_vm1 = vcmp.eq.s32.totalorder %v6786_v4, 3 }
0x30d1   :  { %v3588_v34 = vsel %vm3585_vm13, %v3587_v16, 0  ;;  %v3617_v30 = vpop.permute.xlu1 %3616  ;;  %v3613_v5 = vpop.permute.xlu0 %3612  ;;  %vm3601_vm2 = vcmp.eq.s32.totalorder %v6786_v4, 4 }
0x30d2   :  { %v3592_v29 = vsel %vm3589_vm14, %v3591_v1, %v3588_v34 }
0x30d3   :  { %v3596_v21 = vsel %vm3593_vm15, %v3595_v18, %v3592_v29 }
0x30d4   :  { %v3600_v8 = vsel %vm3597_vm1, %v3599_v17, %v3596_v21 }
0x30d5   :  { %v6794_v50 = vsel %vm3601_vm2, %v6699_v48, %v3600_v8  ;;  %v3627_v63 = vpop.permute.xlu1 %3626  ;;  %v3623_v38 = vpop.permute.xlu0 %3622 }
0x30d6   :  { %vm3603_vm3 = vcmp.eq.s32.totalorder %v6794_v50, 0  ;;  %vm3607_vm5 = vcmp.eq.s32.totalorder %v6794_v50, 1  ;;  %vm3611_vm12 = vcmp.eq.s32.totalorder %v6794_v50, 2  ;;  %vm3615_vm13 = vcmp.eq.s32.totalorder %v6794_v50, 3 }
0x30d7   :  { %v3606_v26 = vsel %vm3603_vm3, %v3605_v55, 0  ;;  %vm3619_vm14 = vcmp.eq.s32.totalorder %v6794_v50, 4 }
0x30d8   :  { %v3610_v40 = vsel %vm3607_vm5, %v3609_v19, %v3606_v26 }
0x30d9   :  { %v3614_v25 = vsel %vm3611_vm12, %v3613_v5, %v3610_v40  ;;  %v3635_v52 = vpop.permute.xlu1 %3634  ;;  %v3631_v44 = vpop.permute.xlu0 %3630 }
0x30da   :  { %v3618_v45 = vsel %vm3615_vm13, %v3617_v30, %v3614_v25 }
0x30db   :  { %v6802_v39 = vsel %vm3619_vm14, %v6685_v33, %v3618_v45 }
0x30dc   :  { %vm3621_vm15 = vcmp.eq.s32.totalorder %v6802_v39, 0  ;;  %vm3625_vm1 = vcmp.eq.s32.totalorder %v6802_v39, 1  ;;  %vm3629_vm2 = vcmp.eq.s32.totalorder %v6802_v39, 2  ;;  %vm3633_vm3 = vcmp.eq.s32.totalorder %v6802_v39, 3 }
0x30dd   :  { %v3624_v23 = vsel %vm3621_vm15, %v3623_v38, 0  ;;  %v3645_v41 = vpop.permute.xlu1 %3644  ;;  %v3641_v22 = vpop.permute.xlu0 %3640  ;;  %vm3637_vm5 = vcmp.eq.s32.totalorder %v6802_v39, 4  ;;  %v3760_v45 = vrot.slane %v6802_v39, 3 }
0x30de   :  { %v3628_v37 = vsel %vm3625_vm1, %v3627_v63, %v3624_v23 }
0x30df   :  { %v3632_v9 = vsel %vm3629_vm2, %v3631_v44, %v3628_v37 }
0x30e0   :  { %v3636_v59 = vsel %vm3633_vm3, %v3635_v52, %v3632_v9 }
0x30e1   :  { %v6810_v49 = vsel %vm3637_vm5, %v6670_v3, %v3636_v59  ;;  %v3653_v33 = vpop.permute.xlu1 %3652  ;;  %v3649_v43 = vpop.permute.xlu0 %3648  ;;  %v3762_v59 = vrot.slane %v6786_v4, 1 }
0x30e2   :  { %vm3639_vm12 = vcmp.eq.s32.totalorder %v6810_v49, 0  ;;  %vm3643_vm13 = vcmp.eq.s32.totalorder %v6810_v49, 1  ;;  %vm3647_vm14 = vcmp.eq.s32.totalorder %v6810_v49, 2  ;;  %vm3651_vm15 = vcmp.eq.s32.totalorder %v6810_v49, 3 }
0x30e3   :  { %v3642_v48 = vsel %vm3639_vm12, %v3641_v22, 0  ;;  %vm3655_vm1 = vcmp.eq.s32.totalorder %v6810_v49, 4  ;;  %v3759_v25 = vrot.slane %v6810_v49, 4  ;;  %v4071_v37 = vrot.slane %v6810_v49, 5 }
0x30e4   :  { %v3646_v47 = vsel %vm3643_vm13, %v3645_v41, %v3642_v48  ;;  %v3761_v41 = vrot.slane %v6794_v50, 2 }
0x30e5   :  { %v3650_v51 = vsel %vm3647_vm14, %v3649_v43, %v3646_v47  ;;  %v3663_v53 = vpop.permute.xlu1 %3662  ;;  %v3659_v61 = vpop.permute.xlu0 %3658  ;;  %v4072_v43 = vrot.slane %v6802_v39, 4 }
0x30e6   :  { %v3654_v35 = vsel %vm3651_vm15, %v3653_v33, %v3650_v51  ;;  %v4073_v51 = vrot.slane %v6794_v50, 3 }
0x30e7   :  { %v6818_v3 = vsel %vm3655_vm1, %v6655_v31, %v3654_v35  ;;  %v4074_v35 = vrot.slane %v6786_v4, 2 }
0x30e8   :  { %vm3657_vm2 = vcmp.eq.s32.totalorder %v6818_v3, 0  ;;  %vm3661_vm3 = vcmp.eq.s32.totalorder %v6818_v3, 1  ;;  %vm3665_vm5 = vcmp.eq.s32.totalorder %v6818_v3, 2  ;;  %vm3669_vm12 = vcmp.eq.s32.totalorder %v6818_v3, 3 }
0x30e9   :  { %v3660_v36 = vsel %vm3657_vm2, %v3659_v61, 0  ;;  %v3671_v54 = vpop.permute.xlu1 %3670  ;;  %v3667_v57 = vpop.permute.xlu0 %3666  ;;  %vm3673_vm13 = vcmp.eq.s32.totalorder %v6818_v3, 4  ;;  %v3758_v26 = vrot.slane %v6818_v3, 5  ;;  %v4070_v23 = vrot.slane %v6818_v3, 6 }
0x30ea   :  { %v3664_v42 = vsel %vm3661_vm3, %v3663_v53, %v3660_v36 }
0x30eb   :  { %v3668_v27 = vsel %vm3665_vm5, %v3667_v57, %v3664_v42  ;;  %v3754_v42 = vld [vmem:[%s7086_s25] sm:$0x1f] }
0x30ec   :  { %v3672_v0 = vsel %vm3669_vm12, %v3671_v54, %v3668_v27  ;;  %5232 = vmatpush3.msk.msra.mxu0 %vm3058_vm9, %v3754_v42 }
0x30ed   :  { %v6826_v56 = vsel %vm3673_vm13, %v6640_v46, %v3672_v0  ;;  %v3681_v31 = vpop.permute.xlu1 %3680  ;;  %v3677_v7 = vpop.permute.xlu0 %3676 }
0x30ee   :  { %vm3675_vm14 = vcmp.eq.s32.totalorder %v6826_v56, 0  ;;  %vm3679_vm15 = vcmp.eq.s32.totalorder %v6826_v56, 1  ;;  %vm3683_vm1 = vcmp.eq.s32.totalorder %v6826_v56, 2  ;;  %vm3687_vm2 = vcmp.eq.s32.totalorder %v6826_v56, 3 }
0x30ef   :  { %v3678_v32 = vsel %vm3675_vm14, %v3677_v7, 0  ;;  %vm3691_vm3 = vcmp.eq.s32.totalorder %v6826_v56, 4  ;;  %v3757_v21 = vrot.slane %v6826_v56, 6  ;;  %v4069_v52 = vrot.slane %v6826_v56, 7 }
0x30f0   :  { %v3682_v12 = vsel %vm3679_vm15, %v3681_v31, %v3678_v32 }
0x30f1   :  { %v3689_v1 = vpop.permute.xlu1 %3688  ;;  %v3685_v16 = vpop.permute.xlu0 %3684 }
0x30f2   :  { %v3686_v17 = vsel %vm3683_vm1, %v3685_v16, %v3682_v12  ;;  %vm3726_vm1 = vcmp.eq.s32.totalorder %v5936_v24, 3 }
0x30f3   :  { %v3690_v18 = vsel %vm3687_vm2, %v3689_v1, %v3686_v17  ;;  %vm3731_vm2 = vcmp.eq.s32.totalorder %v5936_v24, 4 }
0x30f4   :  { %v6834_v46 = vsel %vm3691_vm3, %v6625_v60, %v3690_v18  ;;  %vm3736_vm3 = vcmp.eq.s32.totalorder %v5936_v24, 5 }
0x30f5   :  { %v3699_v19 = vpop.permute.xlu1 %3698  ;;  %vm3693_vm5 = vcmp.eq.s32.totalorder %v6834_v46, 0  ;;  %v3695_v55 = vpop.permute.xlu0 %3694  ;;  %vm3697_vm12 = vcmp.eq.s32.totalorder %v6834_v46, 1  ;;  %vm3701_vm13 = vcmp.eq.s32.totalorder %v6834_v46, 2  ;;  %vm3705_vm14 = vcmp.eq.s32.totalorder %v6834_v46, 3 }
0x30f6   :  { %v3696_v10 = vsel %vm3693_vm5, %v3695_v55, 0  ;;  %vm3709_vm15 = vcmp.eq.s32.totalorder %v6834_v46, 4  ;;  %v3756_v60 = vrot.slane %v6834_v46, 7  ;;  %vm3741_vm5 = vcmp.eq.s32.totalorder %v5936_v24, 6 }
0x30f7   :  { %v3700_v20 = vsel %vm3697_vm12, %v3699_v19, %v3696_v10  ;;  %vm3746_vm12 = vcmp.eq.s32.totalorder %v5936_v24, 7 }
0x30f9   :  { %v3707_v34 = vpop.permute.xlu1 %3706  ;;  %v3703_v30 = vpop.permute.xlu0 %3702 }
0x30fa   :  { %v3704_v5 = vsel %vm3701_vm13, %v3703_v30, %v3700_v20  ;;  %v5761_v20 = vmov 1966171168   ;;  %vm3751_vm13 = vcmask 58368  }
0x30fb   :  { %v3708_v29 = vsel %vm3705_vm14, %v3707_v34, %v3704_v5  ;;  %v3935_v34 = vunpack.c.l.s4 %v5761_v20 }
0x30fc   :  { %v6844_v8 = vsel %vm3709_vm15, %v6610_v15, %v3708_v29 }
0x30fd   :  { %v3763_v63 = vsel %vm3051_vm6, %v6844_v8, %v3756_v60  ;;  %v4068_v38 = vrot.slane %v6844_v8, 1 }
0x30fe   :  { %v3764_v40 = vsel %vm3053_vm7, %v3763_v63, %v3757_v21 }
0x30ff   :  { %v4075_v44 = vsel %vm3051_vm6, %v4068_v38, %v6834_v46  ;;  %v3765_v15 = vsel %vm3055_vm8, %v3764_v40, %v3758_v26 }
0x3100   :  { %v3766_v22 = vsel %vm108_vm0, %v3765_v15, %v3759_v25  ;;  %v4076_v9 = vsel %vm3053_vm7, %v4075_v44, %v4069_v52 }
0x3101   :  { %v3767_v33 = vsel %vm3058_vm9, %v3766_v22, %v3760_v45  ;;  %v4077_v48 = vsel %vm3055_vm8, %v4076_v9, %v4070_v23 }
0x3102   :  { %v3768_v47 = vsel %vm3060_vm10, %v3767_v33, %v3761_v41  ;;  %v4078_v53 = vsel %vm108_vm0, %v4077_v48, %v4071_v37  ;;  %vm3776_vm0 = vcmask 39936  }
0x3103   :  { %v3769_v61 = vsel %vm3062_vm11, %v3768_v47, %v3762_v59  ;;  %v4079_v36 = vsel %vm3058_vm9, %v4078_v53, %v4072_v43 }
0x3104   :  { %3771 = vperm.xlu0 %5589, %v3769_v61   ;;  %v4080_v54 = vsel %vm3060_vm10, %v4079_v36, %v4073_v51  ;;  %vm3716_vm10 = vcmp.eq.s32.totalorder %v5936_v24, 1 }
0x3105   :  { %v4081_v57 = vsel %vm3062_vm11, %v4080_v54, %v4074_v35  ;;  %vm3721_vm11 = vcmp.eq.s32.totalorder %v5936_v24, 2 }
0x3106   :  { %4083 = vperm.xlu1 %5590, %v4081_v57  }
0x3183   :  { %v3772_v27 = vpop.permute.xlu0 %3771 }
0x3184   :  { %vm3773_vm6 = vcmp.eq.s32.totalorder %v5936_v24, %v3772_v27 }
0x3185   :  { %v4578_v0 = vsel %vm3773_vm6, 1.0, %v5747_v28  ;;  %v4084_v31 = vpop.permute.xlu1 %4083 }
0x3186   :  { %vm4085_vm7 = vcmp.eq.s32.totalorder %v5936_v24, %v4084_v31  ;;  %5219 = vmatmul.mubr.msk.f32.vlgmr.msra.gmra.mrb[28].mxu1 %vm3776_vm0, %v4578_v0 }
0x3187   :  { %v4584_v7 = vsel %vm4085_vm7, 1.0, %v5747_v28  ;;  %5222 = vmatpush3.msk.msra.mxu1 %vm3058_vm9, %v3754_v42  ;;  %5223 = vmatprep.mubr.msk.f32.mxu1 %vm5748_vm4, %v5747_v28 }
0x3188   :  { %5234 = vmatmul.mubr.msk.f32.vlgmr.msra.gmra.mrb[40].mxu0 %vm3776_vm0, %v4584_v7  ;;  %5226 = vmatprep.subr.mxu1 %v5747_v28 }
0x318a   :  { %5224 = vmatmul.mubr.msk.f32.vlgmr.msra.gmra.mrb[30].mxu1 %vm3776_vm0, %v4578_v0 }
0x318b   :  { %5227 = vmatpush3.msk.msra.mxu1 %vm3058_vm9, %v6776_v13  ;;  %5228 = vmatprep.mubr.msk.f32.mxu1 %vm5748_vm4, %v5747_v28  ;;  %vm3711_vm9 = vcmp.eq.s32.totalorder %v5936_v24, 0 }
0x318c   :  { %5503 = vmatprep.subr.bf16.mxu1 %v5746_v14 }
0x318e   :  { %5229 = vmatmul.mubr.msk.f32.vlgmr.msra.gmra.mrb[32].mxu1 %vm3776_vm0, %v4584_v7 }
0x318f   :  { %5268 = vmatprep.mubr.msk.f32.mxu1 %vm5748_vm4, %v5747_v28  ;;  %v3936_v28 = vunpack.c.0.s8 %v3935_v34  ;;  %vm4368_vm4 = vcmask 130048  }
0x3190   :  { %vm6960_vm8 = vmpackc.low %vm4368_vm4, %vm4368_vm4 }
0x3191   :  { %v3939_v60 = vsub.s32 %v3936_v28, %v6581_v62 }
0x3259   :  { %v3849_v32 = vpop.f32.mrb[28].mxu1 }
0x325a   :  { %v6894_v12 = vadd.f32 %v3849_v32, %v6547_v11  ;;  %v5220_v1 = vpop.f32.mrb[29].mxu1 }
0x325b   :  { %v4228_v16 = vpop.f32.mrb[40].mxu0 }
0x325c   :  { %4233 = vrot.lane.b32.xlu1 %v4228_v16, %s5760_s5  ;;  %v5235_v17 = vpop.f32.mrb[41].mxu0 }
0x325d   :  { %v3923_v18 = vpop.f32.mrb[30].mxu1 }
0x325e   :  { %3928 = vrot.lane.b32.xlu0 %v3923_v18, %s5760_s5  ;;  %v5225_v13 = vpop.f32.mrb[31].mxu1 }
0x3261   :  { %v4157_v19 = vpop.f32.mrb[32].mxu1 }
0x3262   :  { %v6897_v55 = vadd.f32 %v6544_v6, %v4157_v19  ;;  %v5230_v10 = vpop.f32.mrb[33].mxu1 }
0x32ce   :  { %v4234_v40 = vpop.permute.xlu1 %4233 }
0x32cf   :  { %v4236_v45 = vadd.f32 %v6544_v6, %v4234_v40 }
0x32d0   :  { %v3929_v30 = vpop.permute.xlu0 %3928 }
0x32d1   :  { %v3931_v5 = vadd.f32 %v3929_v30, %v6547_v11  ;;  %v4245_v22 = vrot.slane %v4236_v45, %v3939_v60  ;;  %v4238_v33 = vcombine.high %v4236_v45, %v4236_v45 }
0x32d3   :  { %v3933_v29 = vcombine.high %v3931_v5, %v3931_v5  ;;  %v3940_v21 = vrot.slane %v3931_v5, %v3939_v60  ;;  %v4253_v43 = vcombine.high %v4245_v22, %v4245_v22  ;;  %v4261_v51 = vrot.slane %v4245_v22, %v3939_v60 }
0x32d4   :  { %v4252_v61 = vrot.slane %v4238_v33, %v3939_v60 }
0x32d5   :  { %v3947_v63 = vrot.slane %v3933_v29, %v3939_v60  ;;  %v3948_v38 = vcombine.high %v3940_v21, %v3940_v21  ;;  %v3956_v26 = vrot.slane %v3940_v21, %v3939_v60  ;;  %v4275_v35 = vrot.slane %v4253_v43, %v3939_v60 }
0x32d6   :  { %v4283_v54 = vcombine.high %v4261_v51, %v4261_v51  ;;  %v4290_v57 = vrot.slane %v4261_v51, %v6584_v58  ;;  %v4254_v42 = vcombine.high %v4252_v61, %v4252_v61  ;;  %v4268_v31 = vrot.slane %v4252_v61, %v3939_v60 }
0x32d7   :  { %v3970_v25 = vrot.slane %v3948_v38, %v3939_v60  ;;  %v3978_v52 = vcombine.high %v3956_v26, %v3956_v26  ;;  %v3985_v44 = vrot.slane %v3956_v26, %v6584_v58  ;;  %v3949_v15 = vcombine.high %v3947_v63, %v3947_v63 }
0x32d8   :  { %v3963_v11 = vrot.slane %v3947_v63, %v3939_v60  ;;  %v4285_v27 = vcombine.high %v4275_v35, %v4275_v35  ;;  %v4294_v0 = vrot.slane %v4275_v35, %v6584_v58  ;;  %v4298_v7 = vrot.slane %v4283_v54, %v6584_v58 }
0x32d9   :  { %v3980_v23 = vcombine.high %v3970_v25, %v3970_v25  ;;  %v3989_v41 = vrot.slane %v3970_v25, %v6584_v58  ;;  %4014 = vrot.lane.b32.xlu0 %v3985_v44, %s5762_s6  ;;  %v3993_v62 = vrot.slane %v3978_v52, %v6584_v58  ;;  %v3977_v37 = vrot.slane %v3949_v15, %v3939_v60 }
0x32da   :  { %v3979_v6 = vcombine.high %v3963_v11, %v3963_v11  ;;  %v4001_v59 = vrot.slane %v3963_v11, %v6584_v58  ;;  %v4282_v32 = vrot.slane %v4254_v42, %v3939_v60  ;;  %v4302_v1 = vrot.slane %v4285_v27, %v6584_v58 }
0x32db   :  { %4016 = vrot.lane.b32.xlu1 %v3989_v41, %s5762_s6  ;;  %v3997_v9 = vrot.slane %v3980_v23, %v6584_v58  ;;  %v4005_v48 = vrot.slane %v3977_v37, %v6584_v58  ;;  %v3981_v47 = vcombine.high %v3977_v37, %v3977_v37  ;;  %v4284_v16 = vcombine.high %v4268_v31, %v4268_v31 }
0x32dc   :  { %v4009_v53 = vrot.slane %v3979_v6, %v6584_v58  ;;  %v4306_v17 = vrot.slane %v4268_v31, %v6584_v58  ;;  %v4310_v18 = vrot.slane %v4282_v32, %v6584_v58  ;;  %v4286_v13 = vcombine.high %v4282_v32, %v4282_v32 }
0x32dd   :  { %4018 = vrot.lane.b32.xlu0 %v3993_v62, %s5762_s6  ;;  %v4013_v36 = vrot.slane %v3981_v47, %v6584_v58  ;;  %v4314_v19 = vrot.slane %v4284_v16, %v6584_v58 }
0x32de   :  { %v4318_v10 = vrot.slane %v4286_v13, %v6584_v58  ;;  %v6945_v58 = vld [vmem:[%s7058_s19] ss:$0 sm:$0xff] }
0x32df   :  { %4020 = vrot.lane.b32.xlu1 %v3997_v9, %s5762_s6 }
0x32e1   :  { %4022 = vrot.lane.b32.xlu0 %v4001_v59, %s5762_s6 }
0x32e3   :  { %4024 = vrot.lane.b32.xlu1 %v4005_v48, %s5762_s6 }
0x32e5   :  { %4026 = vrot.lane.b32.xlu0 %v4009_v53, %s5762_s6 }
0x32e7   :  { %4028 = vrot.lane.b32.xlu1 %v4013_v36, %s5762_s6 }
0x32e9   :  { %4319 = vrot.lane.b32.xlu0 %v4290_v57, %s5762_s6 }
0x32eb   :  { %4321 = vrot.lane.b32.xlu1 %v4294_v0, %s5762_s6 }
0x32ed   :  { %4323 = vrot.lane.b32.xlu0 %v4298_v7, %s5762_s6 }
0x32ef   :  { %4325 = vrot.lane.b32.xlu1 %v4302_v1, %s5762_s6 }
0x32f1   :  { %4327 = vrot.lane.b32.xlu0 %v4306_v17, %s5762_s6 }
0x32f3   :  { %4329 = vrot.lane.b32.xlu1 %v4310_v18, %s5762_s6 }
0x32f5   :  { %4331 = vrot.lane.b32.xlu0 %v4314_v19, %s5762_s6 }
0x32f7   :  { %4333 = vrot.lane.b32.xlu1 %v4318_v10, %s5762_s6 }
0x32f9   :  { %3713 = vperm.xlu0 %5589, %v6844_v8  }
0x32fb   :  { %3718 = vperm.xlu1 %5590, %v6834_v46  }
0x32fd   :  { %3723 = vperm.xlu0 %5589, %v6826_v56  }
0x32ff   :  { %3728 = vperm.xlu1 %5590, %v6818_v3  }
0x3301   :  { %3733 = vperm.xlu0 %5589, %v6810_v49  }
0x3303   :  { %3738 = vperm.xlu1 %5590, %v6802_v39  }
0x3305   :  { %3743 = vperm.xlu0 %5589, %v6794_v50  }
0x3307   :  { %3748 = vperm.xlu1 %5590, %v6786_v4  }
0x334b   :  { %v4015_v8 = vpop.permute.xlu0 %4014 }
0x334c   :  { %v4038_v46 = vadd.f32 %v4015_v8, %v6894_v12 }
0x334d   :  { %v4017_v20 = vpop.permute.xlu1 %4016 }
0x334e   :  { %v4039_v56 = vadd.f32 %v4017_v20, %v6894_v12  ;;  %v4052_v3 = vadd.f32 %v6945_v58, %v4038_v46 }
0x334f   :  { %v4019_v39 = vpop.permute.xlu0 %4018 }
0x3350   :  { %v4053_v49 = vadd.f32 %v6945_v58, %v4039_v56  ;;  %5687 = vtanh.f32 %v4052_v3  ;;  %v4040_v4 = vadd.f32 %v4019_v39, %v6894_v12 }
0x3351   :  { %v4021_v50 = vpop.permute.xlu1 %4020 }
0x3352   :  { %5689 = vtanh.f32 %v4053_v49  ;;  %v4041_v34 = vadd.f32 %v4021_v50, %v6894_v12  ;;  %v4054_v5 = vadd.f32 %v6945_v58, %v4040_v4 }
0x3353   :  { %v4023_v60 = vpop.permute.xlu0 %4022 }
0x3354   :  { %v4055_v28 = vadd.f32 %v6945_v58, %v4041_v34  ;;  %v4042_v21 = vadd.f32 %v4023_v60, %v6894_v12 }
0x3355   :  { %v4025_v30 = vpop.permute.xlu1 %4024 }
0x3356   :  { %5691 = vtanh.f32 %v4055_v28  ;;  %v4043_v29 = vadd.f32 %v4025_v30, %v6894_v12  ;;  %v4056_v45 = vadd.f32 %v6945_v58, %v4042_v21 }
0x3357   :  { %5693 = vtanh.f32 %v4054_v5  ;;  %v4027_v25 = vpop.permute.xlu0 %4026 }
0x3358   :  { %v4057_v26 = vadd.f32 %v6945_v58, %v4043_v29  ;;  %v4044_v41 = vadd.f32 %v4027_v25, %v6894_v12 }
0x3359   :  { %v4029_v52 = vpop.permute.xlu1 %4028 }
0x335a   :  { %v5688_v63 = vpop.eup %5687  ;;  %5695 = vtanh.f32 %v4057_v26  ;;  %v4045_v15 = vadd.f32 %v4029_v52, %v6894_v12  ;;  %v4058_v6 = vadd.f32 %v6945_v58, %v4044_v41 }
0x335b   :  { %5697 = vtanh.f32 %v4056_v45  ;;  %v4320_v11 = vpop.permute.xlu0 %4319 }
0x335c   :  { %v5690_v38 = vpop.eup %5689  ;;  %v4059_v22 = vadd.f32 %v6945_v58, %v4045_v15  ;;  %v4343_v12 = vadd.f32 %v4320_v11, %v6897_v55 }
0x335d   :  { %v5504_v44 = vpack.c.bf16 %v5690_v38, %v5688_v63  ;;  %v4322_v37 = vpop.permute.xlu1 %4321 }
0x335e   :  { %5699 = vtanh.f32 %v4059_v22  ;;  %v4344_v59 = vadd.f32 %v4322_v37, %v6897_v55  ;;  %v4351_v61 = vadd.f32 %v6945_v58, %v4343_v12 }
0x335f   :  { %5506 = vmatpush3.bf16.xpose.msk.msra.mxu1 %vm6960_vm8, %v5504_v44  ;;  %v4324_v33 = vpop.permute.xlu0 %4323  ;;  %5701 = vtanh.f32 %v4058_v6 }
0x3360   :  { %5507 = vmatprep.subr.bf16.mxu1 %v5746_v14  ;;  %v5692_v23 = vpop.eup %5691  ;;  %v4352_v51 = vadd.f32 %v6945_v58, %v4344_v59  ;;  %v4345_v42 = vadd.f32 %v4324_v33, %v6897_v55 }
0x3361   :  { %v5694_v62 = vpop.eup %5693  ;;  %v4326_v48 = vpop.permute.xlu1 %4325 }
0x3362   :  { %v5508_v9 = vpack.c.bf16 %v5692_v23, %v5694_v62  ;;  %5703 = vtanh.f32 %v4352_v51  ;;  %v4346_v36 = vadd.f32 %v4326_v48, %v6897_v55  ;;  %v4353_v32 = vadd.f32 %v6945_v58, %v4345_v42  ;;  %v4367_v62 = vld [vmem:[%s7059_s20] sm:$0xf] }
0x3363   :  { %v4328_v35 = vpop.permute.xlu0 %4327  ;;  %5705 = vtanh.f32 %v4351_v61 }
0x3364   :  { %v5696_v43 = vpop.eup %5695  ;;  %v4354_v0 = vadd.f32 %v6945_v58, %v4346_v36  ;;  %v4347_v13 = vadd.f32 %v4328_v35, %v6897_v55 }
0x3365   :  { %v5698_v47 = vpop.eup %5697  ;;  %v4330_v54 = vpop.permute.xlu1 %4329 }
0x3366   :  { %v5512_v53 = vpack.c.bf16 %v5696_v43, %v5698_v47  ;;  %5707 = vtanh.f32 %v4354_v0  ;;  %v4348_v16 = vadd.f32 %v4330_v54, %v6897_v55  ;;  %v4355_v49 = vadd.f32 %v6945_v58, %v4347_v13 }
0x3367   :  { %5510 = vmatpush3.bf16.xpose.msk.msra.mxu1 %vm6960_vm8, %v5508_v9  ;;  %v4332_v31 = vpop.permute.xlu0 %4331  ;;  %5709 = vtanh.f32 %v4353_v32 }
0x3368   :  { %5511 = vmatprep.subr.bf16.mxu1 %v5746_v14  ;;  %v5700_v57 = vpop.eup %5699  ;;  %v4356_v20 = vadd.f32 %v6945_v58, %v4348_v16  ;;  %v4349_v5 = vadd.f32 %v4332_v31, %v6897_v55 }
0x3369   :  { %v5702_v27 = vpop.eup %5701  ;;  %v4334_v1 = vpop.permute.xlu1 %4333 }
0x336a   :  { %v5516_v7 = vpack.c.bf16 %v5700_v57, %v5702_v27  ;;  %5711 = vtanh.f32 %v4356_v20  ;;  %v4350_v34 = vadd.f32 %v4334_v1, %v6897_v55  ;;  %v4357_v52 = vadd.f32 %v6945_v58, %v4349_v5 }
0x336b   :  { %5713 = vtanh.f32 %v4355_v49 }
0x336c   :  { %v5704_v18 = vpop.eup %5703  ;;  %v4358_v38 = vadd.f32 %v6945_v58, %v4350_v34 }
0x336d   :  { %v5706_v46 = vpop.eup %5705 }
0x336e   :  { %v5520_v3 = vpack.c.bf16 %v5704_v18, %v5706_v46  ;;  %5715 = vtanh.f32 %v4358_v38 }
0x336f   :  { %5514 = vmatpush3.bf16.xpose.msk.msra.mxu1 %vm6960_vm8, %v5512_v53  ;;  %5717 = vtanh.f32 %v4357_v52 }
0x3370   :  { %5515 = vmatprep.subr.bf16.mxu1 %v5746_v14  ;;  %v5708_v30 = vpop.eup %5707 }
0x3371   :  { %v5710_v63 = vpop.eup %5709 }
0x3372   :  { %v5524_v25 = vpack.c.bf16 %v5708_v30, %v5710_v63 }
0x3374   :  { %v5712_v55 = vpop.eup %5711 }
0x3375   :  { %v5714_v23 = vpop.eup %5713 }
0x3376   :  { %v5528_v41 = vpack.c.bf16 %v5712_v55, %v5714_v23 }
0x3377   :  { %5518 = vmatpush3.bf16.xpose.msk.msra.mxu1 %vm6960_vm8, %v5516_v7 }
0x3378   :  { %5519 = vmatprep.subr.bf16.mxu1 %v5746_v14  ;;  %v3714_v17 = vpop.permute.xlu0 %3713  ;;  %v5716_v24 = vpop.eup %5715 }
0x3379   :  { %v3715_v19 = vsel %vm3711_vm9, %v3714_v17, 0  ;;  %v5718_v58 = vpop.eup %5717 }
0x337a   :  { %v3719_v10 = vpop.permute.xlu1 %3718  ;;  %v5532_v11 = vpack.c.bf16 %v5716_v24, %v5718_v58 }
0x337b   :  { %v3720_v8 = vsel %vm3716_vm10, %v3719_v10, %v3715_v19 }
0x337c   :  { %v3724_v56 = vpop.permute.xlu0 %3723 }
0x337d   :  { %v3725_v39 = vsel %vm3721_vm11, %v3724_v56, %v3720_v8 }
0x337e   :  { %v3729_v50 = vpop.permute.xlu1 %3728 }
0x337f   :  { %v3730_v4 = vsel %vm3726_vm1, %v3729_v50, %v3725_v39  ;;  %5522 = vmatpush3.bf16.xpose.msk.msra.mxu1 %vm6960_vm8, %v5520_v3 }
0x3380   :  { %5523 = vmatprep.subr.bf16.mxu1 %v5746_v14  ;;  %v3734_v28 = vpop.permute.xlu0 %3733 }
0x3381   :  { %v3735_v60 = vsel %vm3731_vm2, %v3734_v28, %v3730_v4 }
0x3382   :  { %v3739_v29 = vpop.permute.xlu1 %3738 }
0x3383   :  { %v3740_v21 = vsel %vm3736_vm3, %v3739_v29, %v3735_v60 }
0x3384   :  { %v3744_v26 = vpop.permute.xlu0 %3743 }
0x3385   :  { %v3745_v44 = vsel %vm3741_vm5, %v3744_v26, %v3740_v21 }
0x3386   :  { %v3749_v45 = vpop.permute.xlu1 %3748 }
0x3387   :  { %v3750_v15 = vsel %vm3746_vm12, %v3749_v45, %v3745_v44  ;;  %5526 = vmatpush3.bf16.xpose.msk.msra.mxu1 %vm6960_vm8, %v5524_v25 }
0x3388   :  { %5527 = vmatprep.subr.bf16.mxu1 %v5746_v14  ;;  %3752 = vst.msk [vmem:[#allocation2] sm:$0x3] %vm3751_vm13, %v3750_v15 }
0x338f   :  { %5530 = vmatpush3.bf16.xpose.msk.msra.mxu1 %vm6960_vm8, %v5528_v41 }
0x3390   :  { %5531 = vmatprep.subr.bf16.mxu1 %v5746_v14 }
0x3397   :  { %5534 = vmatpush3.bf16.xpose.msk.msra.mxu1 %vm6960_vm8, %v5532_v11 }
0x339e   :  { %5269 = vmatmul.mubr.msk.f32.vlgmr.msra.gmra.mrb[34].mxu1 %vm4368_vm4, %v4367_v62 }
0x339f   :  { %5732 = shalt.err (!%p5729_p4)
}
0x33a0   :  { %s5733_s27 = scalar_lea.hbm %s7060_s21, 32 }
0x33a1   :  { %p5734_p5 = scmp.ne.s32.totalorder %s7060_s21, %s5733_s27  ;;  %p5737_p6 = scmp.lt.u32.totalorder %s5733_s27, %s7060_s21 }
0x33a3   :  { %p5739_p7 = pnand %p5737_p6, %p5734_p5 }
0x33a5   :  { %5742 = shalt.err (!%p5739_p7)
}
0x33a6   :  { %4503 = dma.vmem_to_hbm [thread:$0]  %s4501_s8, 32, %s7060_s21, [#allocation3]  }
0x3471   :  { %v4486_v14 = vpop.f32.mrb[34].mxu1 }
0x3472   :  { %4490 = vst [vmem:[%s7061_s22] sm:$0xf] %v4486_v14  ;;  %vm4491_vm14 = vcmp.gt.f32.partialorder %v4486_v14, 0.4054651  ;;  %v5270_v40 = vpop.f32.mrb[35].mxu1 }
0x3473   :  { %v4492_v22 = vsel %vm4491_vm14, 1, %v5745_v2 }
0x3474   :  { %4493 = vst [vmem:[%s7062_s23] sm:$0xf] %v4492_v22 }
0x3475   :  { %5743 = dma.done.wait [#allocation3], 32  }
0x3476   :  { %5744 = vsyncadd [#allocation3], 4294967264 }
0x3477   :  { %4515 = vsyncpa [#allocation3], 1 }

</bundles_post_ra>
